<compile_context>
chip_gen: v7x
topology: tpu7x:2x2x1
jax: 0.10.0
libtpu: 0.0.40
codegen_flags: <defaults>
</compile_context>

<pallas_src>
import functools

import jax
import jax.numpy as jnp
from jax.experimental import pallas as pl
from jax.experimental.pallas import tpu as pltpu


# ---------------------------------------------------------------------------
# Kernel: one grid step = one encoder layer (full batch processed inside).
# ---------------------------------------------------------------------------
def _siglip_encoder_kernel(
    x_hbm,                       # (B, S, D) f32, memory_space=pl.ANY (read once)
    wqv_ref,                     # (1, D, 2D) bf16   [Wq | Wv]
    wo_ref,                      # (1, D, D)  bf16
    w1_ref,                      # (1, D, I)  bf16
    w2_ref,                      # (1, I, D)  bf16
    vec_ref,                     # (1, 8, D)  f32    rows: g1,be1,g2,be2,bq,bv,bo,b2
    b1_ref,                      # (1, 1, I)  f32
    o_ref,                       # (B, S, D)  residual stream (resident across layers)
    ctx_ref,                     # (B, S, D)  bf16 VMEM scratch (per-head context)
    seed_sem,                    # DMA semaphore for the layer-0 seed copy
    *, num_heads, head_dim, eps, scale,
):
    f32, bf16 = jnp.float32, jnp.bfloat16
    B, S, D = o_ref.shape
    BS = B * S
    layer = pl.program_id(0)

    # Seed the resident residual stream from the input embeddings at layer 0.
    @pl.when(layer == 0)
    def _():
        cp = pltpu.make_async_copy(x_hbm, o_ref, seed_sem)
        cp.start()
        cp.wait()

    vecs = vec_ref[0]                       # (8, D) f32, single load
    g1, be1 = vecs[0:1], vecs[1:2]
    g2, be2 = vecs[2:3], vecs[3:4]
    bq, bv = vecs[4:5], vecs[5:6]
    bo, b2 = vecs[6:7], vecs[7:8]

    x = o_ref[...].reshape(BS, D).astype(f32)          # (BS, D) residual stream

    def layer_norm(z, g, b):
        # one-pass mean / mean-of-squares (biased variance, like nn.LayerNorm)
        mu = jnp.mean(z, axis=-1, keepdims=True)
        ms = jnp.mean(z * z, axis=-1, keepdims=True)
        var = jnp.maximum(ms - mu * mu, 0.0)
        return (z - mu) * jax.lax.rsqrt(var + eps) * g + b

    # ---- LayerNorm 1 (f32) ----
    xn = layer_norm(x, g1, be1).astype(bf16)           # (BS, D)

    # ---- Fused Q|V projection (one deep GEMM), split at lane-aligned D ----
    qv = jnp.dot(xn, wqv_ref[0], preferred_element_type=f32)   # (BS, 2D) f32
    q = qv[:, :D] + bq
    v = qv[:, D:] + bv
    k = q                                  # source bug: key_states = q_proj(x)
    q = q * scale                          # fold softmax scale into q once

    q3 = q.reshape(B, S, D)
    k3 = k.reshape(B, S, D)
    v3 = v.reshape(B, S, D)

    # ---- Per-head attention; context written into a (B,S,D) bf16 scratch ----
    for h in range(num_heads):
        lo = h * head_dim
        qh = q3[:, :, lo:lo + head_dim].astype(bf16)    # (B, S, hd)
        kh = k3[:, :, lo:lo + head_dim].astype(bf16)
        vh = v3[:, :, lo:lo + head_dim].astype(bf16)
        s = jnp.einsum('bqd,bkd->bqk', qh, kh,
                       preferred_element_type=f32)      # (B, S, S) f32
        m = jnp.max(s, axis=-1, keepdims=True)
        e = jnp.exp(s - m)
        p = e * pl.reciprocal(jnp.sum(e, axis=-1, keepdims=True), approx=True)
        ctx_h = jnp.einsum('bqk,bkd->bqd', p.astype(bf16), vh,
                           preferred_element_type=f32)  # (B, S, hd) f32
        ctx_ref[:, :, lo:lo + head_dim] = ctx_h.astype(bf16)

    # ---- ONE deep output-projection GEMM over the full D contraction ----
    ctx = ctx_ref[...].reshape(BS, D)                   # (BS, D) bf16
    attn = jnp.dot(ctx, wo_ref[0], preferred_element_type=f32) + bo

    h1 = x + attn                                       # residual 1 (f32)

    # ---- LayerNorm 2 + MLP (tanh-approx GELU) ----
    hn = layer_norm(h1, g2, be2).astype(bf16)
    f = jnp.dot(hn, w1_ref[0], preferred_element_type=f32) + b1_ref[0]
    f = jax.nn.gelu(f, approximate=True)                # f32
    f = jnp.dot(f.astype(bf16), w2_ref[0], preferred_element_type=f32) + b2

    o_ref[...] = (h1 + f).reshape(B, S, D).astype(o_ref.dtype)   # residual 2


# ---------------------------------------------------------------------------
# Wrapper: single pallas_call, grid over layers only (weights DMA'd once/layer).
# ---------------------------------------------------------------------------
def siglip_encoder(x, params, *, num_heads, eps):
    wqv, wo, w1, w2, vecs, b1 = params
    B, S, D = x.shape
    L = wqv.shape[0]
    inter = w1.shape[-1]
    assert D % num_heads == 0
    assert S % 8 == 0, "pad S to a multiple of 8 in the wrapper"  # TODO(synk): auto-pad
    head_dim = D // num_heads

    kern = functools.partial(
        _siglip_encoder_kernel,
        num_heads=num_heads, head_dim=head_dim, eps=eps,
        scale=head_dim ** (-0.5),
    )

    def layer_spec(p):
        return pl.BlockSpec((1,) + tuple(p.shape[1:]), lambda l: (l, 0, 0))

    in_specs = [pl.BlockSpec(memory_space=pl.ANY)]      # x: raw HBM, no pinned slab
    in_specs += [layer_spec(p) for p in (wqv, wo, w1, w2, vecs, b1)]
    out_spec = pl.BlockSpec((B, S, D), lambda l: (0, 0, 0))

    # VMEM budget: double-buffered per-layer weight slabs + resident residual /
    # ctx scratch + activation working set, clamped to the chip's capacity.
    per_layer_w = sum((p.size // L) * p.dtype.itemsize for p in (wqv, wo, w1, w2))
    per_layer_v = sum((p.size // L) * p.dtype.itemsize for p in (vecs, b1))
    bs = B * S
    act_bytes = 4 * bs * (10 * D + 3 * inter) + 4 * B * S * S * 4 + 2 * bs * D
    est = (2 * (per_layer_w + per_layer_v) + 2 * B * S * D * x.dtype.itemsize
           + 2 * bs * D + act_bytes + (4 << 20))
    try:
        cap = int(pltpu.get_tpu_info().vmem_capacity_bytes)
    except Exception:
        cap = 64 << 20
    vmem_limit = int(max(min(max(est, 32 << 20), cap - (8 << 20)), 16 << 20))

    return pl.pallas_call(
        kern,
        out_shape=jax.ShapeDtypeStruct((B, S, D), x.dtype),
        grid=(L,),
        in_specs=in_specs,
        out_specs=out_spec,
        scratch_shapes=[
            pltpu.VMEM((B, S, D), jnp.bfloat16),        # per-head context
            pltpu.SemaphoreType.DMA,                    # layer-0 seed copy
        ],
        compiler_params=pltpu.CompilerParams(
            dimension_semantics=("arbitrary",),
            vmem_limit_bytes=vmem_limit,
        ),
    )(x, wqv, wo, w1, w2, vecs, b1)


# ---------------------------------------------------------------------------
# Pure-JAX reference mirroring the kernel numerics (same bf16 operand casts,
# same f32 accumulation, same LN formula, same scale folding, same source
# bugs).  Softmax uses an exact divide (kernel uses approx reciprocal).
# ---------------------------------------------------------------------------
def _ref_encoder(x, params, *, num_heads, eps):
    wqv, wo, w1, w2, vecs, b1 = params
    L = wqv.shape[0]
    B, S, D = x.shape
    hd = D // num_heads
    scale = hd ** (-0.5)
    f32, bf16 = jnp.float32, jnp.bfloat16

    def ln(z, g, b):
        mu = jnp.mean(z, -1, keepdims=True)
        ms = jnp.mean(z * z, -1, keepdims=True)
        var = jnp.maximum(ms - mu * mu, 0.0)
        return (z - mu) * jax.lax.rsqrt(var + eps) * g + b

    h = x
    for l in range(L):
        g1, be1, g2, be2, bq, bv, bo, b2 = [vecs[l, i] for i in range(8)]
        xf = h.astype(f32)
        xn = ln(xf, g1, be1).astype(bf16)
        qv = jnp.einsum('bsd,de->bse', xn, wqv[l], preferred_element_type=f32)
        q = qv[..., :D] + bq
        v = qv[..., D:] + bv
        k = q
        q = q * scale
        qh = q.reshape(B, S, num_heads, hd).transpose(0, 2, 1, 3).astype(bf16)
        kh = k.reshape(B, S, num_heads, hd).transpose(0, 2, 1, 3).astype(bf16)
        vh = v.reshape(B, S, num_heads, hd).transpose(0, 2, 1, 3).astype(bf16)
        s = jnp.einsum('bhqd,bhkd->bhqk', qh, kh, preferred_element_type=f32)
        p = jax.nn.softmax(s, axis=-1)
        ctx = jnp.einsum('bhqk,bhkd->bhqd', p.astype(bf16), vh,
                         preferred_element_type=f32)
        ctx = ctx.transpose(0, 2, 1, 3).reshape(B, S, D).astype(bf16)
        attn = jnp.einsum('bsd,de->bse', ctx, wo[l],
                          preferred_element_type=f32) + bo
        h1 = xf + attn
        hn = ln(h1, g2, be2).astype(bf16)
        f = jnp.einsum('bsd,di->bsi', hn, w1[l], preferred_element_type=f32) + b1[l, 0]
        f = jax.nn.gelu(f, approximate=True)
        f = jnp.einsum('bsi,id->bsd', f.astype(bf16), w2[l],
                       preferred_element_type=f32) + b2
        h = (h1 + f).astype(x.dtype)
    return h


# ---------------------------------------------------------------------------
# Parameter init: matmul weights stored bf16 (HBM/DMA/MXU win); biases and
# LayerNorm params packed into one (L,8,D) f32 array (+ (L,1,I) for fc1 bias).
# nn.Linear weights kept as (in, out).  k_proj is dead code -> not made.
# ---------------------------------------------------------------------------
def init_stacked_params(key, num_layers, hidden, intermediate):
    L, D, I = num_layers, hidden, intermediate
    ks = jax.random.split(key, 14)
    std = 0.02

    def w(k, shape):
        return (std * jax.random.normal(k, shape, jnp.float32)).astype(jnp.bfloat16)

    wq = w(ks[0], (L, D, D))
    wv = w(ks[1], (L, D, D))
    wqv = jnp.concatenate([wq, wv], axis=-1)            # (L, D, 2D)
    wo = w(ks[2], (L, D, D))
    w1 = w(ks[3], (L, D, I))
    w2 = w(ks[4], (L, I, D))

    bq = 0.02 * jax.random.normal(ks[5], (L, D), jnp.float32)
    bv = 0.02 * jax.random.normal(ks[6], (L, D), jnp.float32)
    bo = 0.02 * jax.random.normal(ks[7], (L, D), jnp.float32)
    b2 = 0.02 * jax.random.normal(ks[8], (L, D), jnp.float32)
    b1 = 0.02 * jax.random.normal(ks[9], (L, 1, I), jnp.float32)
    g1 = 1.0 + 0.1 * jax.random.normal(ks[10], (L, D), jnp.float32)
    be1 = 0.05 * jax.random.normal(ks[11], (L, D), jnp.float32)
    g2 = 1.0 + 0.1 * jax.random.normal(ks[12], (L, D), jnp.float32)
    be2 = 0.05 * jax.random.normal(ks[13], (L, D), jnp.float32)
    vecs = jnp.stack([g1, be1, g2, be2, bq, bv, bo, b2], axis=1)   # (L, 8, D)
    return (wqv, wo, w1, w2, vecs, b1)


if __name__ == "__main__":
    # Small config consistent with SiglipVisionConfig semantics
    # (lane-aligned D, sublane-aligned S so the test isn't padding-dominated).
    B, S = 2, 64                      # batch, num_patches
    hidden, intermediate = 128, 256
    num_heads, num_layers = 4, 2
    eps = 1e-6

    key = jax.random.PRNGKey(0)
    kx, kp = jax.random.split(key)
    x = jax.random.normal(kx, (B, S, hidden), jnp.float32)
    params = init_stacked_params(kp, num_layers, hidden, intermediate)

    out = siglip_encoder(x, params, num_heads=num_heads, eps=eps)
    out = jax.block_until_ready(out)

    ref = _ref_encoder(x, params, num_heads=num_heads, eps=eps)
    assert out.shape == (B, S, hidden)
    max_err = float(jnp.max(jnp.abs(out - ref)))
    assert jnp.allclose(out, ref, atol=2e-2, rtol=2e-2), (
        f"mismatch vs. reference, max abs err {max_err}")
    print("KERNEL_OK")
</pallas_src>

<mosaic_0001>
module attributes {stable_mosaic.version = 11 : i64} {
  func.func @_siglip_encoder_kernel(%arg0: i32, %arg1: memref<2x64x128xf32, #tpu.memory_space<any>>, %arg2: memref<1x128x256xbf16, #tpu.memory_space<vmem>>, %arg3: memref<1x128x128xbf16, #tpu.memory_space<vmem>>, %arg4: memref<1x128x256xbf16, #tpu.memory_space<vmem>>, %arg5: memref<1x256x128xbf16, #tpu.memory_space<vmem>>, %arg6: memref<1x8x128xf32, #tpu.memory_space<vmem>>, %arg7: memref<1x1x256xf32, #tpu.memory_space<vmem>>, %arg8: memref<2x64x128xf32, #tpu.memory_space<vmem>>, %arg9: memref<2x64x128xbf16, #tpu.memory_space<vmem>>, %arg10: memref<!tpu.dma_semaphore, #tpu.memory_space<semaphore_mem>>) attributes {dimension_semantics = [#tpu.dimension_semantics<arbitrary>], iteration_bounds = array<i64: 2>, scalar_prefetch = 0 : i64, scratch_operands = 2 : i64, tpu.core_type = #tpu.core_type<tc>, window_params = [{}, {transform_indices = @transform_1, window_bounds = array<i64: 1, 128, 256>}, {transform_indices = @transform_2, window_bounds = array<i64: 1, 128, 128>}, {transform_indices = @transform_3, window_bounds = array<i64: 1, 128, 256>}, {transform_indices = @transform_4, window_bounds = array<i64: 1, 256, 128>}, {transform_indices = @transform_5, window_bounds = array<i64: 1, 8, 128>}, {transform_indices = @transform_6, window_bounds = array<i64: 1, 1, 256>}, {pipeline_mode = #tpu.pipeline_mode<synchronous>, transform_indices = @transform_7, window_bounds = array<i64: 2, 64, 128>}]} {
    %c0_i32 = arith.constant 0 : i32
    %0 = arith.cmpi eq, %arg0, %c0_i32 : i32
    %1 = arith.extui %0 : i1 to i32
    %c0_i32_0 = arith.constant 0 : i32
    %2 = arith.cmpi ne, %1, %c0_i32_0 : i32
    scf.if %2 {
      tpu.enqueue_dma source(%arg1 : memref<2x64x128xf32, #tpu.memory_space<any>>) target(%arg8 : memref<2x64x128xf32, #tpu.memory_space<vmem>>) target_semaphore(%arg10 : memref<!tpu.dma_semaphore, #tpu.memory_space<semaphore_mem>>)
      tpu.wait_dma2 semaphore(%arg10 : memref<!tpu.dma_semaphore, #tpu.memory_space<semaphore_mem>>) src(%arg1 : memref<2x64x128xf32, #tpu.memory_space<any>>) dst(%arg8 : memref<2x64x128xf32, #tpu.memory_space<vmem>>)
    } else {
    }
    %c0 = arith.constant 0 : index
    %c0_1 = arith.constant 0 : index
    %c0_2 = arith.constant 0 : index
    %3 = vector.load %arg6[%c0, %c0_1, %c0_2] : memref<1x8x128xf32, #tpu.memory_space<vmem>>, vector<1x8x128xf32>
    %4 = vector.shape_cast %3 : vector<1x8x128xf32> to vector<8x128xf32>
    %5 = vector.extract_strided_slice %4 {offsets = [0, 0], sizes = [1, 128], strides = [1, 1]} : vector<8x128xf32> to vector<1x128xf32>
    %6 = vector.extract_strided_slice %4 {offsets = [1, 0], sizes = [1, 128], strides = [1, 1]} : vector<8x128xf32> to vector<1x128xf32>
    %7 = vector.extract_strided_slice %4 {offsets = [2, 0], sizes = [1, 128], strides = [1, 1]} : vector<8x128xf32> to vector<1x128xf32>
    %8 = vector.extract_strided_slice %4 {offsets = [3, 0], sizes = [1, 128], strides = [1, 1]} : vector<8x128xf32> to vector<1x128xf32>
    %9 = vector.extract_strided_slice %4 {offsets = [4, 0], sizes = [1, 128], strides = [1, 1]} : vector<8x128xf32> to vector<1x128xf32>
    %10 = vector.extract_strided_slice %4 {offsets = [5, 0], sizes = [1, 128], strides = [1, 1]} : vector<8x128xf32> to vector<1x128xf32>
    %11 = vector.extract_strided_slice %4 {offsets = [6, 0], sizes = [1, 128], strides = [1, 1]} : vector<8x128xf32> to vector<1x128xf32>
    %12 = vector.extract_strided_slice %4 {offsets = [7, 0], sizes = [1, 128], strides = [1, 1]} : vector<8x128xf32> to vector<1x128xf32>
    %c0_3 = arith.constant 0 : index
    %c0_4 = arith.constant 0 : index
    %c0_5 = arith.constant 0 : index
    %13 = vector.load %arg8[%c0_3, %c0_4, %c0_5] : memref<2x64x128xf32, #tpu.memory_space<vmem>>, vector<2x64x128xf32>
    %14 = vector.shape_cast %13 : vector<2x64x128xf32> to vector<128x128xf32>
    %cst = arith.constant dense<0.000000e+00> : vector<128xf32>
    %15 = vector.multi_reduction <add>, %14, %cst [1] : vector<128x128xf32> to vector<128xf32>
    %16 = vector.shape_cast %15 : vector<128xf32> to vector<128x1xf32>
    %cst_6 = arith.constant 1.280000e+02 : f32
    %17 = vector.broadcast %cst_6 : f32 to vector<128x1xf32>
    %18 = arith.divf %16, %17 : vector<128x1xf32>
    %19 = arith.mulf %14, %14 : vector<128x128xf32>
    %cst_7 = arith.constant dense<0.000000e+00> : vector<128xf32>
    %20 = vector.multi_reduction <add>, %19, %cst_7 [1] : vector<128x128xf32> to vector<128xf32>
    %21 = vector.shape_cast %20 : vector<128xf32> to vector<128x1xf32>
    %cst_8 = arith.constant 1.280000e+02 : f32
    %22 = vector.broadcast %cst_8 : f32 to vector<128x1xf32>
    %23 = arith.divf %21, %22 : vector<128x1xf32>
    %24 = arith.mulf %18, %18 : vector<128x1xf32>
    %25 = arith.subf %23, %24 : vector<128x1xf32>
    %cst_9 = arith.constant 0.000000e+00 : f32
    %26 = vector.broadcast %cst_9 : f32 to vector<128x1xf32>
    %27 = arith.maximumf %25, %26 : vector<128x1xf32>
    %28 = vector.broadcast %18 : vector<128x1xf32> to vector<128x128xf32>
    %29 = arith.subf %14, %28 : vector<128x128xf32>
    %cst_10 = arith.constant 9.99999997E-7 : f32
    %30 = vector.broadcast %cst_10 : f32 to vector<128x1xf32>
    %31 = arith.addf %27, %30 : vector<128x1xf32>
    %32 = math.rsqrt %31 : vector<128x1xf32>
    %33 = vector.broadcast %32 : vector<128x1xf32> to vector<128x128xf32>
    %34 = arith.mulf %29, %33 : vector<128x128xf32>
    %35 = vector.broadcast %5 : vector<1x128xf32> to vector<128x128xf32>
    %36 = arith.mulf %34, %35 : vector<128x128xf32>
    %37 = vector.broadcast %6 : vector<1x128xf32> to vector<128x128xf32>
    %38 = arith.addf %36, %37 : vector<128x128xf32>
    %39 = arith.truncf %38 : vector<128x128xf32> to vector<128x128xbf16>
    %c0_11 = arith.constant 0 : index
    %c0_12 = arith.constant 0 : index
    %c0_13 = arith.constant 0 : index
    %40 = vector.load %arg2[%c0_11, %c0_12, %c0_13] : memref<1x128x256xbf16, #tpu.memory_space<vmem>>, vector<1x128x256xbf16>
    %41 = vector.shape_cast %40 : vector<1x128x256xbf16> to vector<128x256xbf16>
    %cst_14 = arith.constant dense<0.000000e+00> : vector<128x256xf32>
    %42 = tpu.matmul %39, %41, %cst_14 {dimension_numbers = #tpu.dot_dimension_numbers<[1], [0], [0], [1], [0, 0, 1, 1], [], []>} : vector<128x128xbf16>, vector<128x256xbf16>, vector<128x256xf32> -> vector<128x256xf32>
    %43 = vector.extract_strided_slice %42 {offsets = [0, 0], sizes = [128, 128], strides = [1, 1]} : vector<128x256xf32> to vector<128x128xf32>
    %44 = vector.broadcast %9 : vector<1x128xf32> to vector<128x128xf32>
    %45 = arith.addf %43, %44 : vector<128x128xf32>
    %46 = vector.extract_strided_slice %42 {offsets = [0, 128], sizes = [128, 128], strides = [1, 1]} : vector<128x256xf32> to vector<128x128xf32>
    %47 = vector.broadcast %10 : vector<1x128xf32> to vector<128x128xf32>
    %48 = arith.addf %46, %47 : vector<128x128xf32>
    %cst_15 = arith.constant 0.176776692 : f32
    %49 = vector.broadcast %cst_15 : f32 to vector<128x128xf32>
    %50 = arith.mulf %45, %49 : vector<128x128xf32>
    %51 = vector.shape_cast %50 : vector<128x128xf32> to vector<2x64x128xf32>
    %52 = vector.shape_cast %45 : vector<128x128xf32> to vector<2x64x128xf32>
    %53 = vector.shape_cast %48 : vector<128x128xf32> to vector<2x64x128xf32>
    %54 = vector.extract_strided_slice %51 {offsets = [0, 0, 0], sizes = [2, 64, 32], strides = [1, 1, 1]} : vector<2x64x128xf32> to vector<2x64x32xf32>
    %55 = arith.truncf %54 : vector<2x64x32xf32> to vector<2x64x32xbf16>
    %56 = vector.extract_strided_slice %52 {offsets = [0, 0, 0], sizes = [2, 64, 32], strides = [1, 1, 1]} : vector<2x64x128xf32> to vector<2x64x32xf32>
    %57 = arith.truncf %56 : vector<2x64x32xf32> to vector<2x64x32xbf16>
    %58 = vector.extract_strided_slice %53 {offsets = [0, 0, 0], sizes = [2, 64, 32], strides = [1, 1, 1]} : vector<2x64x128xf32> to vector<2x64x32xf32>
    %59 = arith.truncf %58 : vector<2x64x32xf32> to vector<2x64x32xbf16>
    "tpu.trace_start"() <{level = 10 : i32, message = "bqd,bkd->bqk"}> : () -> ()
    %cst_16 = arith.constant dense<0.000000e+00> : vector<2x64x64xf32>
    %60 = tpu.matmul %55, %57, %cst_16 {dimension_numbers = #tpu.dot_dimension_numbers<[2], [2], [1], [1], [0, 0, 0, 1, 1, 1], [0], [0]>} : vector<2x64x32xbf16>, vector<2x64x32xbf16>, vector<2x64x64xf32> -> vector<2x64x64xf32>
    "tpu.trace_stop"() : () -> ()
    %cst_17 = arith.constant dense<0xFF800000> : vector<2x64xf32>
    %61 = vector.multi_reduction <maximumf>, %60, %cst_17 [2] : vector<2x64x64xf32> to vector<2x64xf32>
    %62 = vector.shape_cast %61 : vector<2x64xf32> to vector<2x64x1xf32>
    %63 = vector.broadcast %62 : vector<2x64x1xf32> to vector<2x64x64xf32>
    %64 = arith.subf %60, %63 : vector<2x64x64xf32>
    %65 = math.exp %64 : vector<2x64x64xf32>
    %cst_18 = arith.constant dense<0.000000e+00> : vector<2x64xf32>
    %66 = vector.multi_reduction <add>, %65, %cst_18 [2] : vector<2x64x64xf32> to vector<2x64xf32>
    %67 = vector.shape_cast %66 : vector<2x64xf32> to vector<2x64x1xf32>
    %68 = tpu.reciprocal %67 {approx = true} : vector<2x64x1xf32> -> vector<2x64x1xf32>
    %69 = vector.broadcast %68 : vector<2x64x1xf32> to vector<2x64x64xf32>
    %70 = arith.mulf %65, %69 : vector<2x64x64xf32>
    %71 = arith.truncf %70 : vector<2x64x64xf32> to vector<2x64x64xbf16>
    "tpu.trace_start"() <{level = 10 : i32, message = "bqk,bkd->bqd"}> : () -> ()
    %cst_19 = arith.constant dense<0.000000e+00> : vector<2x64x32xf32>
    %72 = tpu.matmul %71, %59, %cst_19 {dimension_numbers = #tpu.dot_dimension_numbers<[2], [1], [1], [2], [0, 0, 0, 1, 1, 2], [0], [0]>} : vector<2x64x64xbf16>, vector<2x64x32xbf16>, vector<2x64x32xf32> -> vector<2x64x32xf32>
    "tpu.trace_stop"() : () -> ()
    %73 = arith.truncf %72 : vector<2x64x32xf32> to vector<2x64x32xbf16>
    %c0_20 = arith.constant 0 : index
    %c0_21 = arith.constant 0 : index
    %c0_22 = arith.constant 0 : index
    %74 = vector.load %arg9[%c0_20, %c0_21, %c0_22] : memref<2x64x128xbf16, #tpu.memory_space<vmem>>, vector<2x64x32xbf16>
    tpu.vector_store %arg9[%c0_20, %c0_21, %c0_22], %73 {strides = array<i32>} : memref<2x64x128xbf16, #tpu.memory_space<vmem>>, vector<2x64x32xbf16>,
    %75 = vector.extract_strided_slice %51 {offsets = [0, 0, 32], sizes = [2, 64, 32], strides = [1, 1, 1]} : vector<2x64x128xf32> to vector<2x64x32xf32>
    %76 = arith.truncf %75 : vector<2x64x32xf32> to vector<2x64x32xbf16>
    %77 = vector.extract_strided_slice %52 {offsets = [0, 0, 32], sizes = [2, 64, 32], strides = [1, 1, 1]} : vector<2x64x128xf32> to vector<2x64x32xf32>
    %78 = arith.truncf %77 : vector<2x64x32xf32> to vector<2x64x32xbf16>
    %79 = vector.extract_strided_slice %53 {offsets = [0, 0, 32], sizes = [2, 64, 32], strides = [1, 1, 1]} : vector<2x64x128xf32> to vector<2x64x32xf32>
    %80 = arith.truncf %79 : vector<2x64x32xf32> to vector<2x64x32xbf16>
    "tpu.trace_start"() <{level = 10 : i32, message = "bqd,bkd->bqk"}> : () -> ()
    %cst_23 = arith.constant dense<0.000000e+00> : vector<2x64x64xf32>
    %81 = tpu.matmul %76, %78, %cst_23 {dimension_numbers = #tpu.dot_dimension_numbers<[2], [2], [1], [1], [0, 0, 0, 1, 1, 1], [0], [0]>} : vector<2x64x32xbf16>, vector<2x64x32xbf16>, vector<2x64x64xf32> -> vector<2x64x64xf32>
    "tpu.trace_stop"() : () -> ()
    %cst_24 = arith.constant dense<0xFF800000> : vector<2x64xf32>
    %82 = vector.multi_reduction <maximumf>, %81, %cst_24 [2] : vector<2x64x64xf32> to vector<2x64xf32>
    %83 = vector.shape_cast %82 : vector<2x64xf32> to vector<2x64x1xf32>
    %84 = vector.broadcast %83 : vector<2x64x1xf32> to vector<2x64x64xf32>
    %85 = arith.subf %81, %84 : vector<2x64x64xf32>
    %86 = math.exp %85 : vector<2x64x64xf32>
    %cst_25 = arith.constant dense<0.000000e+00> : vector<2x64xf32>
    %87 = vector.multi_reduction <add>, %86, %cst_25 [2] : vector<2x64x64xf32> to vector<2x64xf32>
    %88 = vector.shape_cast %87 : vector<2x64xf32> to vector<2x64x1xf32>
    %89 = tpu.reciprocal %88 {approx = true} : vector<2x64x1xf32> -> vector<2x64x1xf32>
    %90 = vector.broadcast %89 : vector<2x64x1xf32> to vector<2x64x64xf32>
    %91 = arith.mulf %86, %90 : vector<2x64x64xf32>
    %92 = arith.truncf %91 : vector<2x64x64xf32> to vector<2x64x64xbf16>
    "tpu.trace_start"() <{level = 10 : i32, message = "bqk,bkd->bqd"}> : () -> ()
    %cst_26 = arith.constant dense<0.000000e+00> : vector<2x64x32xf32>
    %93 = tpu.matmul %92, %80, %cst_26 {dimension_numbers = #tpu.dot_dimension_numbers<[2], [1], [1], [2], [0, 0, 0, 1, 1, 2], [0], [0]>} : vector<2x64x64xbf16>, vector<2x64x32xbf16>, vector<2x64x32xf32> -> vector<2x64x32xf32>
    "tpu.trace_stop"() : () -> ()
    %94 = arith.truncf %93 : vector<2x64x32xf32> to vector<2x64x32xbf16>
    %c0_27 = arith.constant 0 : index
    %c0_28 = arith.constant 0 : index
    %c32 = arith.constant 32 : index
    %95 = vector.load %arg9[%c0_27, %c0_28, %c32] : memref<2x64x128xbf16, #tpu.memory_space<vmem>>, vector<2x64x32xbf16>
    tpu.vector_store %arg9[%c0_27, %c0_28, %c32], %94 {strides = array<i32>} : memref<2x64x128xbf16, #tpu.memory_space<vmem>>, vector<2x64x32xbf16>,
    %96 = vector.extract_strided_slice %51 {offsets = [0, 0, 64], sizes = [2, 64, 32], strides = [1, 1, 1]} : vector<2x64x128xf32> to vector<2x64x32xf32>
    %97 = arith.truncf %96 : vector<2x64x32xf32> to vector<2x64x32xbf16>
    %98 = vector.extract_strided_slice %52 {offsets = [0, 0, 64], sizes = [2, 64, 32], strides = [1, 1, 1]} : vector<2x64x128xf32> to vector<2x64x32xf32>
    %99 = arith.truncf %98 : vector<2x64x32xf32> to vector<2x64x32xbf16>
    %100 = vector.extract_strided_slice %53 {offsets = [0, 0, 64], sizes = [2, 64, 32], strides = [1, 1, 1]} : vector<2x64x128xf32> to vector<2x64x32xf32>
    %101 = arith.truncf %100 : vector<2x64x32xf32> to vector<2x64x32xbf16>
    "tpu.trace_start"() <{level = 10 : i32, message = "bqd,bkd->bqk"}> : () -> ()
    %cst_29 = arith.constant dense<0.000000e+00> : vector<2x64x64xf32>
    %102 = tpu.matmul %97, %99, %cst_29 {dimension_numbers = #tpu.dot_dimension_numbers<[2], [2], [1], [1], [0, 0, 0, 1, 1, 1], [0], [0]>} : vector<2x64x32xbf16>, vector<2x64x32xbf16>, vector<2x64x64xf32> -> vector<2x64x64xf32>
    "tpu.trace_stop"() : () -> ()
    %cst_30 = arith.constant dense<0xFF800000> : vector<2x64xf32>
    %103 = vector.multi_reduction <maximumf>, %102, %cst_30 [2] : vector<2x64x64xf32> to vector<2x64xf32>
    %104 = vector.shape_cast %103 : vector<2x64xf32> to vector<2x64x1xf32>
    %105 = vector.broadcast %104 : vector<2x64x1xf32> to vector<2x64x64xf32>
    %106 = arith.subf %102, %105 : vector<2x64x64xf32>
    %107 = math.exp %106 : vector<2x64x64xf32>
    %cst_31 = arith.constant dense<0.000000e+00> : vector<2x64xf32>
    %108 = vector.multi_reduction <add>, %107, %cst_31 [2] : vector<2x64x64xf32> to vector<2x64xf32>
    %109 = vector.shape_cast %108 : vector<2x64xf32> to vector<2x64x1xf32>
    %110 = tpu.reciprocal %109 {approx = true} : vector<2x64x1xf32> -> vector<2x64x1xf32>
    %111 = vector.broadcast %110 : vector<2x64x1xf32> to vector<2x64x64xf32>
    %112 = arith.mulf %107, %111 : vector<2x64x64xf32>
    %113 = arith.truncf %112 : vector<2x64x64xf32> to vector<2x64x64xbf16>
    "tpu.trace_start"() <{level = 10 : i32, message = "bqk,bkd->bqd"}> : () -> ()
    %cst_32 = arith.constant dense<0.000000e+00> : vector<2x64x32xf32>
    %114 = tpu.matmul %113, %101, %cst_32 {dimension_numbers = #tpu.dot_dimension_numbers<[2], [1], [1], [2], [0, 0, 0, 1, 1, 2], [0], [0]>} : vector<2x64x64xbf16>, vector<2x64x32xbf16>, vector<2x64x32xf32> -> vector<2x64x32xf32>
    "tpu.trace_stop"() : () -> ()
    %115 = arith.truncf %114 : vector<2x64x32xf32> to vector<2x64x32xbf16>
    %c0_33 = arith.constant 0 : index
    %c0_34 = arith.constant 0 : index
    %c64 = arith.constant 64 : index
    %116 = vector.load %arg9[%c0_33, %c0_34, %c64] : memref<2x64x128xbf16, #tpu.memory_space<vmem>>, vector<2x64x32xbf16>
    tpu.vector_store %arg9[%c0_33, %c0_34, %c64], %115 {strides = array<i32>} : memref<2x64x128xbf16, #tpu.memory_space<vmem>>, vector<2x64x32xbf16>,
    %117 = vector.extract_strided_slice %51 {offsets = [0, 0, 96], sizes = [2, 64, 32], strides = [1, 1, 1]} : vector<2x64x128xf32> to vector<2x64x32xf32>
    %118 = arith.truncf %117 : vector<2x64x32xf32> to vector<2x64x32xbf16>
    %119 = vector.extract_strided_slice %52 {offsets = [0, 0, 96], sizes = [2, 64, 32], strides = [1, 1, 1]} : vector<2x64x128xf32> to vector<2x64x32xf32>
    %120 = arith.truncf %119 : vector<2x64x32xf32> to vector<2x64x32xbf16>
    %121 = vector.extract_strided_slice %53 {offsets = [0, 0, 96], sizes = [2, 64, 32], strides = [1, 1, 1]} : vector<2x64x128xf32> to vector<2x64x32xf32>
    %122 = arith.truncf %121 : vector<2x64x32xf32> to vector<2x64x32xbf16>
    "tpu.trace_start"() <{level = 10 : i32, message = "bqd,bkd->bqk"}> : () -> ()
    %cst_35 = arith.constant dense<0.000000e+00> : vector<2x64x64xf32>
    %123 = tpu.matmul %118, %120, %cst_35 {dimension_numbers = #tpu.dot_dimension_numbers<[2], [2], [1], [1], [0, 0, 0, 1, 1, 1], [0], [0]>} : vector<2x64x32xbf16>, vector<2x64x32xbf16>, vector<2x64x64xf32> -> vector<2x64x64xf32>
    "tpu.trace_stop"() : () -> ()
    %cst_36 = arith.constant dense<0xFF800000> : vector<2x64xf32>
    %124 = vector.multi_reduction <maximumf>, %123, %cst_36 [2] : vector<2x64x64xf32> to vector<2x64xf32>
    %125 = vector.shape_cast %124 : vector<2x64xf32> to vector<2x64x1xf32>
    %126 = vector.broadcast %125 : vector<2x64x1xf32> to vector<2x64x64xf32>
    %127 = arith.subf %123, %126 : vector<2x64x64xf32>
    %128 = math.exp %127 : vector<2x64x64xf32>
    %cst_37 = arith.constant dense<0.000000e+00> : vector<2x64xf32>
    %129 = vector.multi_reduction <add>, %128, %cst_37 [2] : vector<2x64x64xf32> to vector<2x64xf32>
    %130 = vector.shape_cast %129 : vector<2x64xf32> to vector<2x64x1xf32>
    %131 = tpu.reciprocal %130 {approx = true} : vector<2x64x1xf32> -> vector<2x64x1xf32>
    %132 = vector.broadcast %131 : vector<2x64x1xf32> to vector<2x64x64xf32>
    %133 = arith.mulf %128, %132 : vector<2x64x64xf32>
    %134 = arith.truncf %133 : vector<2x64x64xf32> to vector<2x64x64xbf16>
    "tpu.trace_start"() <{level = 10 : i32, message = "bqk,bkd->bqd"}> : () -> ()
    %cst_38 = arith.constant dense<0.000000e+00> : vector<2x64x32xf32>
    %135 = tpu.matmul %134, %122, %cst_38 {dimension_numbers = #tpu.dot_dimension_numbers<[2], [1], [1], [2], [0, 0, 0, 1, 1, 2], [0], [0]>} : vector<2x64x64xbf16>, vector<2x64x32xbf16>, vector<2x64x32xf32> -> vector<2x64x32xf32>
    "tpu.trace_stop"() : () -> ()
    %136 = arith.truncf %135 : vector<2x64x32xf32> to vector<2x64x32xbf16>
    %c0_39 = arith.constant 0 : index
    %c0_40 = arith.constant 0 : index
    %c96 = arith.constant 96 : index
    %137 = vector.load %arg9[%c0_39, %c0_40, %c96] : memref<2x64x128xbf16, #tpu.memory_space<vmem>>, vector<2x64x32xbf16>
    tpu.vector_store %arg9[%c0_39, %c0_40, %c96], %136 {strides = array<i32>} : memref<2x64x128xbf16, #tpu.memory_space<vmem>>, vector<2x64x32xbf16>,
    %c0_41 = arith.constant 0 : index
    %c0_42 = arith.constant 0 : index
    %c0_43 = arith.constant 0 : index
    %138 = vector.load %arg9[%c0_41, %c0_42, %c0_43] : memref<2x64x128xbf16, #tpu.memory_space<vmem>>, vector<2x64x128xbf16>
    %139 = vector.shape_cast %138 : vector<2x64x128xbf16> to vector<128x128xbf16>
    %c0_44 = arith.constant 0 : index
    %c0_45 = arith.constant 0 : index
    %c0_46 = arith.constant 0 : index
    %140 = vector.load %arg3[%c0_44, %c0_45, %c0_46] : memref<1x128x128xbf16, #tpu.memory_space<vmem>>, vector<1x128x128xbf16>
    %141 = vector.shape_cast %140 : vector<1x128x128xbf16> to vector<128x128xbf16>
    %cst_47 = arith.constant dense<0.000000e+00> : vector<128x128xf32>
    %142 = tpu.matmul %139, %141, %cst_47 {dimension_numbers = #tpu.dot_dimension_numbers<[1], [0], [0], [1], [0, 0, 1, 1], [], []>} : vector<128x128xbf16>, vector<128x128xbf16>, vector<128x128xf32> -> vector<128x128xf32>
    %143 = vector.broadcast %11 : vector<1x128xf32> to vector<128x128xf32>
    %144 = arith.addf %142, %143 : vector<128x128xf32>
    %145 = arith.addf %14, %144 : vector<128x128xf32>
    %cst_48 = arith.constant dense<0.000000e+00> : vector<128xf32>
    %146 = vector.multi_reduction <add>, %145, %cst_48 [1] : vector<128x128xf32> to vector<128xf32>
    %147 = vector.shape_cast %146 : vector<128xf32> to vector<128x1xf32>
    %cst_49 = arith.constant 1.280000e+02 : f32
    %148 = vector.broadcast %cst_49 : f32 to vector<128x1xf32>
    %149 = arith.divf %147, %148 : vector<128x1xf32>
    %150 = arith.mulf %145, %145 : vector<128x128xf32>
    %cst_50 = arith.constant dense<0.000000e+00> : vector<128xf32>
    %151 = vector.multi_reduction <add>, %150, %cst_50 [1] : vector<128x128xf32> to vector<128xf32>
    %152 = vector.shape_cast %151 : vector<128xf32> to vector<128x1xf32>
    %cst_51 = arith.constant 1.280000e+02 : f32
    %153 = vector.broadcast %cst_51 : f32 to vector<128x1xf32>
    %154 = arith.divf %152, %153 : vector<128x1xf32>
    %155 = arith.mulf %149, %149 : vector<128x1xf32>
    %156 = arith.subf %154, %155 : vector<128x1xf32>
    %cst_52 = arith.constant 0.000000e+00 : f32
    %157 = vector.broadcast %cst_52 : f32 to vector<128x1xf32>
    %158 = arith.maximumf %156, %157 : vector<128x1xf32>
    %159 = vector.broadcast %149 : vector<128x1xf32> to vector<128x128xf32>
    %160 = arith.subf %145, %159 : vector<128x128xf32>
    %cst_53 = arith.constant 9.99999997E-7 : f32
    %161 = vector.broadcast %cst_53 : f32 to vector<128x1xf32>
    %162 = arith.addf %158, %161 : vector<128x1xf32>
    %163 = math.rsqrt %162 : vector<128x1xf32>
    %164 = vector.broadcast %163 : vector<128x1xf32> to vector<128x128xf32>
    %165 = arith.mulf %160, %164 : vector<128x128xf32>
    %166 = vector.broadcast %7 : vector<1x128xf32> to vector<128x128xf32>
    %167 = arith.mulf %165, %166 : vector<128x128xf32>
    %168 = vector.broadcast %8 : vector<1x128xf32> to vector<128x128xf32>
    %169 = arith.addf %167, %168 : vector<128x128xf32>
    %170 = arith.truncf %169 : vector<128x128xf32> to vector<128x128xbf16>
    %c0_54 = arith.constant 0 : index
    %c0_55 = arith.constant 0 : index
    %c0_56 = arith.constant 0 : index
    %171 = vector.load %arg4[%c0_54, %c0_55, %c0_56] : memref<1x128x256xbf16, #tpu.memory_space<vmem>>, vector<1x128x256xbf16>
    %172 = vector.shape_cast %171 : vector<1x128x256xbf16> to vector<128x256xbf16>
    %cst_57 = arith.constant dense<0.000000e+00> : vector<128x256xf32>
    %173 = tpu.matmul %170, %172, %cst_57 {dimension_numbers = #tpu.dot_dimension_numbers<[1], [0], [0], [1], [0, 0, 1, 1], [], []>} : vector<128x128xbf16>, vector<128x256xbf16>, vector<128x256xf32> -> vector<128x256xf32>
    %c0_58 = arith.constant 0 : index
    %c0_59 = arith.constant 0 : index
    %c0_60 = arith.constant 0 : index
    %174 = vector.load %arg7[%c0_58, %c0_59, %c0_60] : memref<1x1x256xf32, #tpu.memory_space<vmem>>, vector<1x1x256xf32>
    %175 = vector.shape_cast %174 : vector<1x1x256xf32> to vector<1x256xf32>
    %176 = vector.broadcast %175 : vector<1x256xf32> to vector<128x256xf32>
    %177 = arith.addf %173, %176 : vector<128x256xf32>
    %178 = arith.mulf %177, %177 : vector<128x256xf32>
    %179 = arith.mulf %177, %178 : vector<128x256xf32>
    %cst_61 = arith.constant 4.471500e-02 : f32
    %180 = vector.broadcast %cst_61 : f32 to vector<128x256xf32>
    %181 = arith.mulf %180, %179 : vector<128x256xf32>
    %182 = arith.addf %177, %181 : vector<128x256xf32>
    %cst_62 = arith.constant 0.797884583 : f32
    %183 = vector.broadcast %cst_62 : f32 to vector<128x256xf32>
    %184 = arith.mulf %183, %182 : vector<128x256xf32>
    %185 = math.tanh %184 : vector<128x256xf32>
    %cst_63 = arith.constant 1.000000e+00 : f32
    %186 = vector.broadcast %cst_63 : f32 to vector<128x256xf32>
    %187 = arith.addf %186, %185 : vector<128x256xf32>
    %cst_64 = arith.constant 5.000000e-01 : f32
    %188 = vector.broadcast %cst_64 : f32 to vector<128x256xf32>
    %189 = arith.mulf %188, %187 : vector<128x256xf32>
    %190 = arith.mulf %177, %189 : vector<128x256xf32>
    %191 = arith.truncf %190 : vector<128x256xf32> to vector<128x256xbf16>
    %c0_65 = arith.constant 0 : index
    %c0_66 = arith.constant 0 : index
    %c0_67 = arith.constant 0 : index
    %192 = vector.load %arg5[%c0_65, %c0_66, %c0_67] : memref<1x256x128xbf16, #tpu.memory_space<vmem>>, vector<1x256x128xbf16>
    %193 = vector.shape_cast %192 : vector<1x256x128xbf16> to vector<256x128xbf16>
    %cst_68 = arith.constant dense<0.000000e+00> : vector<128x128xf32>
    %194 = tpu.matmul %191, %193, %cst_68 {dimension_numbers = #tpu.dot_dimension_numbers<[1], [0], [0], [1], [0, 0, 1, 1], [], []>} : vector<128x256xbf16>, vector<256x128xbf16>, vector<128x128xf32> -> vector<128x128xf32>
    %195 = vector.broadcast %12 : vector<1x128xf32> to vector<128x128xf32>
    %196 = arith.addf %194, %195 : vector<128x128xf32>
    %197 = arith.addf %145, %196 : vector<128x128xf32>
    %198 = vector.shape_cast %197 : vector<128x128xf32> to vector<2x64x128xf32>
    %c0_69 = arith.constant 0 : index
    %c0_70 = arith.constant 0 : index
    %c0_71 = arith.constant 0 : index
    %199 = vector.load %arg8[%c0_69, %c0_70, %c0_71] : memref<2x64x128xf32, #tpu.memory_space<vmem>>, vector<2x64x128xf32>
    tpu.vector_store %arg8[%c0_69, %c0_70, %c0_71], %198 {strides = array<i32>} : memref<2x64x128xf32, #tpu.memory_space<vmem>>, vector<2x64x128xf32>,
    return
  }
  func.func @transform_1(%arg0: i32) -> (i32, i32, i32) {
    %c0_i32 = arith.constant 0 : i32
    %c0_i32_0 = arith.constant 0 : i32
    %c0_i32_1 = arith.constant 0 : i32
    return %arg0, %c0_i32, %c0_i32_0 : i32, i32, i32
  }
  func.func @transform_2(%arg0: i32) -> (i32, i32, i32) {
    %c0_i32 = arith.constant 0 : i32
    %c0_i32_0 = arith.constant 0 : i32
    %c0_i32_1 = arith.constant 0 : i32
    return %arg0, %c0_i32, %c0_i32_0 : i32, i32, i32
  }
  func.func @transform_3(%arg0: i32) -> (i32, i32, i32) {
    %c0_i32 = arith.constant 0 : i32
    %c0_i32_0 = arith.constant 0 : i32
    %c0_i32_1 = arith.constant 0 : i32
    return %arg0, %c0_i32, %c0_i32_0 : i32, i32, i32
  }
  func.func @transform_4(%arg0: i32) -> (i32, i32, i32) {
    %c0_i32 = arith.constant 0 : i32
    %c0_i32_0 = arith.constant 0 : i32
    %c0_i32_1 = arith.constant 0 : i32
    return %arg0, %c0_i32, %c0_i32_0 : i32, i32, i32
  }
  func.func @transform_5(%arg0: i32) -> (i32, i32, i32) {
    %c0_i32 = arith.constant 0 : i32
    %c0_i32_0 = arith.constant 0 : i32
    %c0_i32_1 = arith.constant 0 : i32
    return %arg0, %c0_i32, %c0_i32_0 : i32, i32, i32
  }
  func.func @transform_6(%arg0: i32) -> (i32, i32, i32) {
    %c0_i32 = arith.constant 0 : i32
    %c0_i32_0 = arith.constant 0 : i32
    %c0_i32_1 = arith.constant 0 : i32
    return %arg0, %c0_i32, %c0_i32_0 : i32, i32, i32
  }
  func.func @transform_7(%arg0: i32) -> (i32, i32, i32) {
    %c0_i32 = arith.constant 0 : i32
    %c0_i32_0 = arith.constant 0 : i32
    %c0_i32_1 = arith.constant 0 : i32
    %c0_i32_2 = arith.constant 0 : i32
    return %c0_i32, %c0_i32_0, %c0_i32_1 : i32, i32, i32
  }
}

</mosaic_0001>

<bundles_post_ra>
// kernel: tpu_custom_call.1
= control target key start
LH: loop header
LB: loop body
LE: loop exit
PB: predicated region body
PF: predicated region fallthrough
CT: control target
= control target key end

     0   :  { %s8780_s0 = inlined_call_operand.hbm [shape: f32[2,64,128], index: 0, kind: input, shape index: {}]   ;;  %s8781_s1 = inlined_call_operand.hbm [shape: bf16[2,128,256], index: 1, kind: input, shape index: {}]   ;;  %s8782_s2 = inlined_call_operand.hbm [shape: bf16[2,128,128], index: 2, kind: input, shape index: {}]   ;;  %s8783_s3 = inlined_call_operand.hbm [shape: bf16[2,128,256], index: 3, kind: input, shape index: {}]   ;;  %s8784_s4 = inlined_call_operand.hbm [shape: bf16[2,256,128], index: 4, kind: input, shape index: {}]   ;;  %s8785_s5 = inlined_call_operand.vmem [shape: f32[2,8,128], index: 5, kind: input, shape index: {}]   ;;  %s8786_s6 = inlined_call_operand.vmem [shape: f32[2,1,256], index: 6, kind: input, shape index: {}]   ;;  %s8787_s7 = inlined_call_operand.hbm [shape: f32[2,64,128], index: 7, kind: output, shape index: {}]  }
   0x1   :  { %8800 = sst [smem:[#allocation25_spill]] %s8781_s1 }
   0x2   :  { %8801 = sst [smem:[#allocation26_spill]] %s8782_s2 }
   0x3   :  { %12 = vsyncpa [#allocation5], 0 }
   0x4   :  { %14 = vsyncpa [#allocation5 + $0x1], 0 }
   0x5   :  { %15 = vsyncpa [#allocation8], 0 }
   0x6   :  { %17 = vsyncpa [#allocation8 + $0x1], 0 }
   0x7   :  { %18 = vsyncpa [#allocation11], 0 }
   0x8   :  { %20 = vsyncpa [#allocation11 + $0x1], 0 }
   0x9   :  { %21 = vsyncpa [#allocation6], 0  ;;  %s6356_s24 = smov 0   ;;  %s6358_s25 = smov 0  }
   0xa   :  { %s6360_s26 = smov 0   ;;  %s6362_s27 = smov 0  }
   0xb LB: > { %s6375_s28 = sadd.s32 4294967295, %s6299_s27   ;;  %s6378_s29 = sadd.s32 1, %s6299_s27   ;;  %s6299_s27 = sphi %s6362_s27, %s8846_s27   ;;  %s6295_s26 = sphi %s6360_s26, %s8845_s26   ;;  %s6291_s25 = sphi %s6358_s25, %s8844_s25   ;;  %s6287_s24 = sphi %s6356_s24, %s8843_s24  }
   0xc   : > { %s31_s30 = ssub.s32 %s6299_s27, %s6378_s29  ;;  %s34_s8 = sadd.s32 1, %s6295_s26 }
   0xd   : > { %p32_p0 = scmp.eq.s32.totalorder %s31_s30, 0  ;;  %p41_p1 = scmp.ne.s32.totalorder %s6295_s26, %s6291_s25 }
   0xe   : > { %p42_p2 = scmp.eq.s32.totalorder %s6299_s27, 0  ;;  %p47_p3 = scmp.ne.s32.totalorder %s6291_s25, %s6287_s24 }
   0xf   : > { %s6388_s9 = scalar_select %p32_p0, %s6295_s26, %s34_s8  }
  0x10   : > { %p43_p4 = por %p42_p2, %p41_p1  ;;  %p8788_p5 = scmp.eq.s32.totalorder %s6375_s28, 0 }
  0x11   : > { %p5556_p6 = scmp.lt.s32.totalorder %s6299_s27, 2  ;;  %s6399_s11 = sand.u32 1, %s6295_s26  }
  0x12   : > { %p6394_p7 = por %p8788_p5, %p47_p3  ;;  %s243_s13 = sand.u32 1, %s6299_s27  }
  0x13   : > { %p6401_p8 = pnand %p5556_p6, %p43_p4  ;;  %s4838_s14 = sshll.u32 %s6399_s11, 6 }
  0x14   : > { %s8802_s10 = scalar_select %p6394_p7, 1, 0 }
  0x15   : > { %s4981_s15 = sshll.u32 %s6299_s27, 10  ;;  %s247_s16 = scalar_lea.vmem [#allocation7], %s4838_s14 }
  0x16   : > { %s254_s17 = sshll.u32 %s247_s16, 4  ;;  %s8804_s2 = sld [smem:[#allocation26_spill]]  ;;  %s6413_s17 = int_to_ptr.vmem [resolvable:$true] %s254_s17 }
  0x17   : > { %s6415_s21 = scalar_lea.sflag [#allocation8], %s243_s13  ;;  %p6421_p10 = pneg %p6401_p8 }
  0x1c   : > { %s6411_s20 = scalar_lea.hbm %s8804_s2, %s4981_s15  ;;  %s6082_s8 = scalar_lea.hbm %s8804_s2, 2048 }
  0x1d   : > { %s6077_s22 = scalar_lea.hbm %s6411_s20, 1024  ;;  %p6083_p13 = scmp.lt.u32.totalorder %s6411_s20, %s8804_s2 }
  0x1e   : > { %p6078_p9 = scmp.ne.s32.totalorder %s6411_s20, %s6077_s22  ;;  %p6084_p0 = scmp.lt.u32.totalorder %s6082_s8, %s6077_s22 }
  0x1f   : > { %p6086_p2 = scmp.lt.u32.totalorder %s6077_s22, %s6411_s20 }
  0x20   : > { %p6080_p11 = pnand %p6421_p10, %p6078_p9  ;;  %p6085_p1 = por %p6084_p0, %p6083_p13 }
  0x22   : > { %p6081_p12 = pneg %p6080_p11  ;;  %p6087_p3 = por %p6086_p2, %p6085_p1 }
  0x24   : > { %p6088_p4 = pnand %p6087_p3, %p6081_p12 }
  0x26   : > { %6091 = shalt.err (!%p6088_p4)
}
  0x27   : > { %s6092_s13 = scalar_lea.vmem %s6413_s17, 1024  ;;  %s6301_s16 = smov [#allocation7]  }
  0x28   : > { %p6093_p6 = scmp.ne.s32.totalorder %s6413_s17, %s6092_s13  ;;  %s6097_s18 = sshll.u32 %s6301_s16, 4  ;;  %s6098_s18 = int_to_ptr.vmem [resolvable:$false] %s6097_s18 }
  0x29   : > { %s6099_s19 = scalar_lea.vmem %s6098_s18, 2048  ;;  %p6100_p5 = scmp.lt.s32.totalorder %s6413_s17, %s6098_s18 }
  0x2a   : > { %p6095_p9 = pnand %p6093_p6, %p6421_p10  ;;  %p6101_p7 = scmp.lt.s32.totalorder %s6099_s19, %s6092_s13 }
  0x2c   : > { %p6096_p11 = pneg %p6095_p9  ;;  %p6102_p13 = por %p6101_p7, %p6100_p5 }
  0x2e   : > { %p6103_p0 = pnand %p6102_p13, %p6096_p11 }
  0x30   : > { %6106 = shalt.err (!%p6103_p0)
}
  0x31   : > { %s8790_s22 = smov 64   ;;  %s8791_s24 = smov 4  }
  0x32   : > { %5549 = dma.hbm_to_vmem [thread:$0]  (!%p6401_p8), %s6411_s20, 1024, %s6413_s17, %s6415_s21, %s8790_s22, %s8790_s22, %s8791_s24  }
  0x33   : > { %p4847_p5 = scmp.ge.s32.totalorder %s6299_s27, 1  ;;  %p318_p7 = scmp.lt.s32.totalorder %s6299_s27, 3 }
  0x34   : > { %s6451_s30 = sshll.u32 %s6399_s11, 7  ;;  %s6458_s14 = sshll.u32 %s6299_s27, 11 }
  0x35   : > { %p6453_p12 = pnand %p4847_p5, %p318_p7  ;;  %s226_s15 = scalar_lea.vmem [#allocation4], %s6451_s30 }
  0x36   : > { %s233_s13 = sshll.u32 %s226_s15, 4  ;;  %s8807_s1 = sld [smem:[#allocation25_spill]]  ;;  %s6467_s13 = int_to_ptr.vmem [resolvable:$true] %s233_s13 }
  0x37   : > { %s8806_s8 = scalar_select %p6453_p12, 1, 0 }
  0x38   : > { %s223_s17 = scalar_lea.sflag [#allocation5], %s6399_s11 }
  0x3c   : > { %s6465_s19 = scalar_lea.hbm %s8807_s1, %s6458_s14  ;;  %s6112_s15 = scalar_lea.hbm %s8807_s1, 4096 }
  0x3d   : > { %s6107_s20 = scalar_lea.hbm %s6465_s19, 2048  ;;  %p6113_p4 = scmp.lt.u32.totalorder %s6465_s19, %s8807_s1 }
  0x3e   : > { %p6108_p1 = scmp.ne.s32.totalorder %s6465_s19, %s6107_s20  ;;  %p6114_p6 = scmp.lt.u32.totalorder %s6112_s15, %s6107_s20 }
  0x3f   : > { %p6116_p11 = scmp.lt.u32.totalorder %s6107_s20, %s6465_s19 }
  0x40   : > { %p6110_p2 = pnand %p6108_p1, %p6421_p10  ;;  %p6115_p9 = por %p6114_p6, %p6113_p4 }
  0x42   : > { %p6111_p3 = pneg %p6110_p2  ;;  %p6117_p13 = por %p6116_p11, %p6115_p9 }
  0x44   : > { %p6118_p0 = pnand %p6117_p13, %p6111_p3 }
  0x46   : > { %6121 = shalt.err (!%p6118_p0)
}
  0x47   : > { %s6122_s18 = scalar_lea.vmem %s6467_s13, 2048  ;;  %s6304_s22 = smov [#allocation4]  }
  0x48   : > { %p6123_p5 = scmp.ne.s32.totalorder %s6467_s13, %s6122_s18  ;;  %s6127_s27 = sshll.u32 %s6304_s22, 4  ;;  %s6128_s27 = int_to_ptr.vmem [resolvable:$false] %s6127_s27 }
  0x49   : > { %s6129_s24 = scalar_lea.vmem %s6128_s27, 4096  ;;  %p6130_p2 = scmp.lt.s32.totalorder %s6467_s13, %s6128_s27 }
  0x4a   : > { %p6125_p7 = pnand %p6123_p5, %p6421_p10  ;;  %p6131_p12 = scmp.lt.s32.totalorder %s6129_s24, %s6122_s18 }
  0x4c   : > { %p6126_p1 = pneg %p6125_p7  ;;  %p6132_p4 = por %p6131_p12, %p6130_p2 }
  0x4e   : > { %p6133_p6 = pnand %p6132_p4, %p6126_p1 }
  0x50   : > { %6136 = shalt.err (!%p6133_p6)
}
  0x51   : > { %s6305_s20 = smov 128   ;;  %s6306_s15 = smov 8  }
  0x52   : > { %5546 = dma.hbm_to_vmem [thread:$0]  (!%p6401_p8), %s6465_s19, 2048, %s6467_s13, %s223_s17, %s6305_s20, %s6305_s20, %s6306_s15  }
  0x53   : > { %s6500_s22 = scalar_lea.hbm %s8783_s3, %s6458_s14  ;;  %s268_s27 = scalar_lea.vmem [#allocation9], %s6451_s30 }
  0x54   : > { %s275_s24 = sshll.u32 %s268_s27, 4  ;;  %s6137_s1 = scalar_lea.hbm %s6500_s22, 2048  ;;  %s6503_s24 = int_to_ptr.vmem [resolvable:$true] %s275_s24 }
  0x55   : > { %p6138_p12 = scmp.ne.s32.totalorder %s6500_s22, %s6137_s1  ;;  %s6142_s19 = scalar_lea.hbm %s8783_s3, 4096 }
  0x56   : > { %p6143_p11 = scmp.lt.u32.totalorder %s6500_s22, %s8783_s3  ;;  %p6144_p13 = scmp.lt.u32.totalorder %s6142_s19, %s6137_s1 }
  0x57   : > { %p6140_p3 = pnand %p6138_p12, %p6421_p10  ;;  %p6146_p5 = scmp.lt.u32.totalorder %s6137_s1, %s6500_s22 }
  0x58   : > { %p6145_p0 = por %p6144_p13, %p6143_p11 }
  0x59   : > { %p6141_p9 = pneg %p6140_p3 }
  0x5a   : > { %p6147_p7 = por %p6146_p5, %p6145_p0 }
  0x5c   : > { %p6148_p1 = pnand %p6147_p7, %p6141_p9 }
  0x5e   : > { %6151 = shalt.err (!%p6148_p1)
}
  0x5f   : > { %s6152_s18 = scalar_lea.vmem %s6503_s24, 2048  ;;  %s6307_s2 = smov [#allocation9]  }
  0x60   : > { %p6153_p2 = scmp.ne.s32.totalorder %s6503_s24, %s6152_s18  ;;  %s6157_s27 = sshll.u32 %s6307_s2, 4  ;;  %s6158_s27 = int_to_ptr.vmem [resolvable:$false] %s6157_s27 }
  0x61   : > { %s6159_s13 = scalar_lea.vmem %s6158_s27, 4096  ;;  %p6160_p12 = scmp.lt.s32.totalorder %s6503_s24, %s6158_s27 }
  0x62   : > { %p6155_p4 = pnand %p6153_p2, %p6421_p10  ;;  %p6161_p3 = scmp.lt.s32.totalorder %s6159_s13, %s6152_s18 }
  0x64   : > { %p6156_p6 = pneg %p6155_p4  ;;  %p6162_p11 = por %p6161_p3, %p6160_p12 }
  0x66   : > { %p6163_p13 = pnand %p6162_p11, %p6156_p6 }
  0x68   : > { %6166 = shalt.err (!%p6163_p13)
}
  0x69   : > { %5552 = dma.hbm_to_vmem [thread:$0]  (!%p6401_p8), %s6500_s22, 2048, %s6503_s24, %s6415_s21, %s6305_s20, %s6305_s20, %s6306_s15  }
  0x6a   : > { %s6534_s17 = scalar_lea.hbm %s8784_s4, %s6458_s14  ;;  %s289_s16 = scalar_lea.vmem [#allocation10], %s6451_s30 }
  0x6b   : > { %s296_s18 = sshll.u32 %s289_s16, 4  ;;  %s286_s2 = scalar_lea.sflag [#allocation11], %s6399_s11  ;;  %s6537_s18 = int_to_ptr.vmem [resolvable:$true] %s296_s18 }
  0x6c   : > { %s6167_s27 = scalar_lea.hbm %s6534_s17, 2048  ;;  %s6172_s15 = scalar_lea.hbm %s8784_s4, 4096 }
  0x6d   : > { %p6168_p9 = scmp.ne.s32.totalorder %s6534_s17, %s6167_s27  ;;  %p6173_p7 = scmp.lt.u32.totalorder %s6534_s17, %s8784_s4 }
  0x6e   : > { %p6174_p1 = scmp.lt.u32.totalorder %s6172_s15, %s6167_s27  ;;  %p6176_p4 = scmp.lt.u32.totalorder %s6167_s27, %s6534_s17 }
  0x6f   : > { %p6170_p0 = pnand %p6168_p9, %p6421_p10 }
  0x70   : > { %p6175_p2 = por %p6174_p1, %p6173_p7 }
  0x71   : > { %p6171_p5 = pneg %p6170_p0 }
  0x72   : > { %p6177_p6 = por %p6176_p4, %p6175_p2 }
  0x74   : > { %p6178_p12 = pnand %p6177_p6, %p6171_p5 }
  0x76   : > { %6181 = shalt.err (!%p6178_p12)
}
  0x77   : > { %s6182_s30 = scalar_lea.vmem %s6537_s18, 2048  ;;  %s6308_s24 = smov [#allocation10]  }
  0x78   : > { %p6183_p3 = scmp.ne.s32.totalorder %s6537_s18, %s6182_s30  ;;  %s6187_s13 = sshll.u32 %s6308_s24, 4  ;;  %s6188_s13 = int_to_ptr.vmem [resolvable:$false] %s6187_s13 }
  0x79   : > { %s6189_s1 = scalar_lea.vmem %s6188_s13, 4096  ;;  %p6190_p9 = scmp.lt.s32.totalorder %s6537_s18, %s6188_s13 }
  0x7a   : > { %p6185_p11 = pnand %p6183_p3, %p6421_p10  ;;  %p6191_p0 = scmp.lt.s32.totalorder %s6189_s1, %s6182_s30 }
  0x7c   : > { %p6186_p13 = pneg %p6185_p11  ;;  %p6192_p7 = por %p6191_p0, %p6190_p9 }
  0x7e   : > { %p6193_p1 = pnand %p6192_p7, %p6186_p13 }
  0x80   : > { %6196 = shalt.err (!%p6193_p1)
}
  0x81   : > { %s8808_s19 = smov 4   ;;  %s8809_s16 = smov 64  }
  0x82   : > { %5555 = dma.hbm_to_vmem [thread:$0]  (!%p6401_p8), %s6534_s17, 2048, %s6537_s18, %s286_s2, %s8809_s16, %s8809_s16, %s8808_s19  }
  0x83   : > { %p8810_p10 = scmp.ne.s32.totalorder %s8806_s8, 0 }
  0x85   : > { %322 = sbr.rel (%p8810_p10) target bundleno = 4278 (0x10b6), region = 44 }
  0x8c   : > { %s324_s23 = sand.u32 1, %s6291_s25   ;;  %p8811_p5 = scmp.ne.s32.totalorder %s8802_s10, 0 }
  0x8d   : > { %s4848_s27 = sshll.u32 %s324_s23, 7  ;;  %s325_s21 = scalar_lea.sflag [#allocation5], %s324_s23 }
  0x8e   : > { %s6569_s20 = scalar_lea.vmem [#allocation4], %s4848_s27 }
  0x8f   : > { %6266 = dma.done.wait (%p8811_p5), %s325_s21, 2048  }
  0x90   : > { %6268 = vsyncadd (%p8811_p5), %s325_s21, 4294965248  ;;  %s333_s11 = sand.u32 1, %s6375_s28   ;;  %s4849_s12 = sshll.u32 %s324_s23, 6 }
  0x91   : > { %s334_s17 = scalar_lea.sflag [#allocation8], %s333_s11  ;;  %s6576_s18 = scalar_lea.vmem [#allocation7], %s4849_s12 }
  0x92   : > { %6270 = dma.done.wait (%p8811_p5), %s334_s17, 3072  }
  0x93   : > { %6272 = vsyncadd (%p8811_p5), %s334_s17, 4294964224  ;;  %s6582_s8 = scalar_lea.vmem [#allocation9], %s4848_s27  ;;  %s352_s2 = scalar_lea.sflag [#allocation11], %s324_s23 }
  0x94   : > { %s6584_s15 = scalar_lea.vmem [#allocation10], %s4848_s27 }
  0x95   : > { %6274 = dma.done.wait (%p8811_p5), %s352_s2, 2048  }
  0x96   : > { %6276 = vsyncadd (%p8811_p5), %s352_s2, 4294965248  ;;  %p402_p8 = scmp.lt.s32.totalorder %s6375_s28, 1  ;;  %s6309_s22 = smov [#allocation12]  }
  0x97   : > { %s422_s30 = sshll.u32 %s6309_s22, 4  ;;  %s6197_s12 = scalar_lea.hbm %s8780_s0, 2048  ;;  %s6602_s30 = int_to_ptr.vmem [resolvable:$true] %s422_s30 }
  0x98   : > { %s403_s14 = scalar_select %p402_p8, %s6375_s28, 1 }
  0x99   : > { %p6198_p2 = scmp.ne.s32.totalorder %s8780_s0, %s6197_s12  ;;  %p8812_p4 = scmp.eq.s32.totalorder %s6375_s28, 0 }
  0x9a   : > { %s4852_s24 = sshll.u32 %s403_s14, 3  ;;  %s4853_s13 = sshll.u32 %s403_s14, 1 }
  0x9b   : > { %s6595_s16 = scalar_lea.vmem %s8785_s5, %s4852_s24  ;;  %s6600_s21 = scalar_lea.vmem %s8786_s6, %s4853_s13 }
  0x9c   : > { %p6199_p6 = pnand %p6198_p2, %p8812_p4  ;;  %p6203_p3 = scmp.lt.u32.totalorder %s6197_s12, %s8780_s0 }
  0x9e   : > { %p6200_p12 = pneg %p6199_p6 }
  0xa0   : > { %p6205_p11 = pnand %p6203_p3, %p6200_p12 }
  0xa2   : > { %6208 = shalt.err (!%p6205_p11)  }
  0xa3   : > { %s6616_s24 = scalar_lea.vmem %s6602_s30, 2048  ;;  %p8813_p9 = pmov %p8812_p4 }
  0xa4   : > { %p6210_p13 = scmp.ne.s32.totalorder %s6602_s30, %s6616_s24  ;;  %p6216_p1 = scmp.lt.s32.totalorder %s6602_s30, %s6602_s30 }
  0xa5   : > { %p6217_p10 = scmp.lt.s32.totalorder %s6616_s24, %s6616_s24 }
  0xa6   : > { %p6211_p0 = pnand %p6210_p13, %p8813_p9 }
  0xa7   : > { %p6629_p5 = por %p6217_p10, %p6216_p1 }
  0xa8   : > { %p6212_p7 = pneg %p6211_p0 }
  0xaa   : > { %p6219_p8 = pnand %p6629_p5, %p6212_p7 }
  0xac   : > { %6222 = shalt.err (!%p6219_p8)  }
  0xad   : > { %p8815_p2 = pmov %p8812_p4 }
  0xaf   : > { %5537 = dma.hbm_to_vmem [thread:$0]  (%p8815_p2), %s8780_s0, 2048, %s6602_s30, [#allocation3] }
  0xb0   : > { %p8816_p4 = pmov %p8815_p2 }
  0xb1   : > { %p8817_p6 = pmov %p8815_p2 }
  0xb2   : > { %6278 = dma.done.wait (%p8816_p4), [#allocation3], 2048 }
  0xb3   : > { %6280 = vsyncadd (%p8817_p6), [#allocation3], 4294965248  ;;  %v6645_v0 = vld [vmem:[#allocation12] sm:$0xff]  ;;  %v6647_v1 = vld [vmem:[#allocation12 + $0x8] sm:$0xff]  ;;  %v8794_v42 = vmov 0   ;;  %vm1009_vm0 = vcmask 261120  }
  0xb4   : > { %447 = vadd.xlane.f32.xlu0 %v6645_v0  ;;  %v496_v2 = vmul.f32 %v6645_v0, %v6645_v0  ;;  %v497_v3 = vmul.f32 %v6647_v1, %v6647_v1  ;;  %v6655_v4 = vld [vmem:[#allocation12 + $0x10] sm:$0xff]  ;;  %v6657_v5 = vld [vmem:[#allocation12 + $0x18] sm:$0xff]  ;;  %v6665_v8 = vld [vmem:[#allocation12 + $0x20] sm:$0xff]  ;;  %848 = vmatprep.mubr.bf16.mxu0 %v8794_v42  ;;  %vm1188_vm1 = vcmask 523264   ;;  %s6312_s23 = smov 64   ;;  %s6313_s27 = smov 32  }
  0xb5   : > { %v498_v6 = vmul.f32 %v6655_v4, %v6655_v4  ;;  %v499_v7 = vmul.f32 %v6657_v5, %v6657_v5  ;;  %v6667_v9 = vld [vmem:[#allocation12 + $0x28] sm:$0xff]  ;;  %v500_v12 = vmul.f32 %v6665_v8, %v6665_v8  ;;  %v5606_v13 = vld [vmem:[%s6569_s20 + $0x14] ss:$8 sps:$4 sm:$0xff]   ;;  %v5608_v15 = vld [vmem:[%s6569_s20 + $0x10] ss:$8 sps:$4 sm:$0xff]   ;;  %vm2179_vm2 = vcmask 523520  }
  0xb6   : > { %512 = vadd.xlane.f32.xlu1 %v496_v2  ;;  %v5603_v10 = vld [vmem:[%s6569_s20 + $0x4] ss:$8 sps:$4 sm:$0xff]   ;;  %v5605_v11 = vld [vmem:[%s6569_s20] ss:$8 sps:$4 sm:$0xff]   ;;  %v501_v14 = vmul.f32 %v6667_v9, %v6667_v9  ;;  %v6679_v16 = vld [vmem:[#allocation12 + $0x30] sm:$0xff]  ;;  %vm2800_vm3 = vcmask 785920  }
  0xb7   : > { %816 = vmatprep.subr.bf16.mxu0 %v5603_v10  ;;  %v6681_v17 = vld [vmem:[#allocation12 + $0x38] sm:$0xff]  ;;  %v5609_v18 = vld [vmem:[%s6569_s20 + $0x24] ss:$8 sps:$4 sm:$0xff]   ;;  %v5611_v19 = vld [vmem:[%s6569_s20 + $0x20] ss:$8 sps:$4 sm:$0xff]   ;;  %v502_v20 = vmul.f32 %v6679_v16, %v6679_v16  ;;  %vm3421_vm4 = vcmask 1048320  }
  0xb8   : > { %449 = vadd.xlane.f32.xlu0 %v6647_v1  ;;  %817 = vmatpush1.bf16.msra.mxu0 %v5605_v11  ;;  %v503_v21 = vmul.f32 %v6681_v17, %v6681_v17  ;;  %v5612_v22 = vld [vmem:[%s6569_s20 + $0x34] ss:$8 sps:$4 sm:$0xff]   ;;  %v6692_v23 = vld [vmem:[#allocation12 + $0x40] sm:$0xff]  ;;  %v5614_v24 = vld [vmem:[%s6569_s20 + $0x30] ss:$8 sps:$4 sm:$0xff]   ;;  %p5558_p12 = scmp.eq.s32.totalorder %s6375_s28, 1 }
  0xb9   : > { %818 = vmatprep.subr.bf16.mxu0 %v5606_v13  ;;  %v6695_v25 = vld [vmem:[#allocation12 + $0x48] sm:$0xff]  ;;  %v504_v28 = vmul.f32 %v6692_v23, %v6692_v23  ;;  %v5618_v30 = vld [vmem:[%s6569_s20 + $0x54] ss:$8 sps:$4 sm:$0xff]   ;;  %v5620_v31 = vld [vmem:[%s6569_s20 + $0x50] ss:$8 sps:$4 sm:$0xff]  }
  0xba   : > { %514 = vadd.xlane.f32.xlu1 %v497_v3  ;;  %v5615_v26 = vld [vmem:[%s6569_s20 + $0x44] ss:$8 sps:$4 sm:$0xff]   ;;  %v5617_v27 = vld [vmem:[%s6569_s20 + $0x40] ss:$8 sps:$4 sm:$0xff]   ;;  %v505_v29 = vmul.f32 %v6695_v25, %v6695_v25  ;;  %v6707_v32 = vld [vmem:[#allocation12 + $0x50] sm:$0xff]  ;;  %p6225_p3 = pnand %p6210_p13, %p5558_p12 }
  0xbb   : > { %v5621_v33 = vld [vmem:[%s6569_s20 + $0x64] ss:$8 sps:$4 sm:$0xff]   ;;  %v6710_v34 = vld [vmem:[#allocation12 + $0x58] sm:$0xff]  ;;  %v5623_v35 = vld [vmem:[%s6569_s20 + $0x60] ss:$8 sps:$4 sm:$0xff]   ;;  %v506_v36 = vmul.f32 %v6707_v32, %v6707_v32 }
  0xbc   : > { %451 = vadd.xlane.f32.xlu0 %v6655_v4  ;;  %819 = vmatpush1.bf16.msra.mxu0 %v5608_v15  ;;  %v507_v37 = vmul.f32 %v6710_v34, %v6710_v34  ;;  %v5624_v38 = vld [vmem:[%s6569_s20 + $0x74] ss:$8 sps:$4 sm:$0xff]   ;;  %v5626_v39 = vld [vmem:[%s6569_s20 + $0x70] ss:$8 sps:$4 sm:$0xff]   ;;  %v6721_v40 = vld [vmem:[#allocation12 + $0x60] sm:$0xff]  ;;  %s6311_s20 = smov 96   ;;  %p6226_p11 = pneg %p6225_p3 }
  0xbd   : > { %820 = vmatprep.subr.bf16.mxu0 %v5609_v18  ;;  %v6723_v41 = vld [vmem:[#allocation12 + $0x68] sm:$0xff]  ;;  %v508_v43 = vmul.f32 %v6721_v40, %v6721_v40  ;;  %v6732_v45 = vld [vmem:[#allocation12 + $0x70] sm:$0xff]  ;;  %v6734_v46 = vld [vmem:[#allocation12 + $0x78] sm:$0xff] }
  0xbe   : > { %453 = vadd.xlane.f32.xlu1 %v6657_v5  ;;  %v509_v44 = vmul.f32 %v6723_v41, %v6723_v41  ;;  %v510_v47 = vmul.f32 %v6732_v45, %v6732_v45  ;;  %v511_v48 = vmul.f32 %v6734_v46, %v6734_v46  ;;  %p6233_p9 = pnand %p6226_p11, %p6629_p5 }
  0xc0   : > { %516 = vadd.xlane.f32.xlu0 %v498_v6  ;;  %821 = vmatpush1.bf16.msra.mxu0 %v5611_v19  ;;  %v672_v6 = vlaneseq }
  0xc1   : > { %822 = vmatprep.subr.bf16.mxu0 %v5612_v22 }
  0xc2   : > { %518 = vadd.xlane.f32.xlu1 %v499_v7  ;;  %v6748_v18 = vshrl.u32 %v672_v6, 7 }
  0xc4   : > { %455 = vadd.xlane.f32.xlu0 %v6665_v8  ;;  %823 = vmatpush1.bf16.msra.mxu0 %v5614_v24  ;;  %8818 = vst [vmem:[#allocation22_spill] sm:$0xff] %v6748_v18 }
  0xc5   : > { %824 = vmatprep.subr.bf16.mxu0 %v5615_v26 }
  0xc6   : > { %457 = vadd.xlane.f32.xlu1 %v6667_v9 }
  0xc8   : > { %520 = vadd.xlane.f32.xlu0 %v500_v12  ;;  %825 = vmatpush1.bf16.msra.mxu0 %v5617_v27 }
  0xc9   : > { %826 = vmatprep.subr.bf16.mxu0 %v5618_v30 }
  0xca   : > { %522 = vadd.xlane.f32.xlu1 %v501_v14 }
  0xcc   : > { %459 = vadd.xlane.f32.xlu0 %v6679_v16  ;;  %827 = vmatpush1.bf16.msra.mxu0 %v5620_v31 }
  0xcd   : > { %828 = vmatprep.subr.bf16.mxu0 %v5621_v33 }
  0xce   : > { %461 = vadd.xlane.f32.xlu1 %v6681_v17 }
  0xd0   : > { %524 = vadd.xlane.f32.xlu0 %v502_v20  ;;  %829 = vmatpush1.bf16.msra.mxu0 %v5623_v35  ;;  %v6758_v35 = vld [vmem:[%s6595_s16] sm:$0xff] }
  0xd1   : > { %830 = vmatprep.subr.bf16.mxu0 %v5624_v38 }
  0xd2   : > { %526 = vadd.xlane.f32.xlu1 %v503_v21 }
  0xd4   : > { %463 = vadd.xlane.f32.xlu0 %v6692_v23  ;;  %831 = vmatpush1.bf16.msra.mxu0 %v5626_v39 }
  0xd6   : > { %465 = vadd.xlane.f32.xlu1 %v6695_v25 }
  0xd8   : > { %528 = vadd.xlane.f32.xlu0 %v504_v28 }
  0xda   : > { %530 = vadd.xlane.f32.xlu1 %v505_v29  ;;  %v8793_v29 = vsub.s32 0, %v6748_v18 }
  0xdc   : > { %467 = vadd.xlane.f32.xlu0 %v6707_v32 }
  0xde   : > { %469 = vadd.xlane.f32.xlu1 %v6710_v34 }
  0xe0   : > { %532 = vadd.xlane.f32.xlu0 %v506_v36 }
  0xe2   : > { %534 = vadd.xlane.f32.xlu1 %v507_v37 }
  0xe4   : > { %471 = vadd.xlane.f32.xlu0 %v6721_v40 }
  0xe6   : > { %473 = vadd.xlane.f32.xlu1 %v6723_v41 }
  0xe8   : > { %536 = vadd.xlane.f32.xlu0 %v508_v43 }
  0xea   : > { %538 = vadd.xlane.f32.xlu1 %v509_v44 }
  0xec   : > { %475 = vadd.xlane.f32.xlu0 %v6732_v45 }
  0xee   : > { %477 = vadd.xlane.f32.xlu1 %v6734_v46 }
  0xf0   : > { %540 = vadd.xlane.f32.xlu0 %v510_v47 }
  0xf2   : > { %542 = vadd.xlane.f32.xlu1 %v511_v48 }
 0x141   : > { %v448_v49 = vpop.xlane.xlu0 %447 }
 0x142   : > { %v480_v50 = vmul.f32 0.0078125, %v448_v49  ;;  %v6766_v49 = vrot.slane %v6758_v35, %v8793_v29 }
 0x143   : > { %v513_v51 = vpop.xlane.xlu1 %512 }
 0x144   : > { %v560_v52 = vmul.f32 %v480_v50, %v480_v50  ;;  %v544_v53 = vmul.f32 0.0078125, %v513_v51  ;;  %v608_v36 = vsub.f32 %v6645_v0, %v480_v50  ;;  %v8792_v51 = vsub.s32 1, %v6748_v18 }
 0x145   : > { %v450_v54 = vpop.xlane.xlu0 %449 }
 0x146   : > { %v576_v55 = vsub.f32 %v544_v53, %v560_v52  ;;  %v481_v56 = vmul.f32 0.0078125, %v450_v54 }
 0x147   : > { %v515_v57 = vpop.xlane.xlu1 %514 }
 0x148   : > { %v592_v58 = vmax.f32 %v576_v55, 0.0  ;;  %v561_v59 = vmul.f32 %v481_v56, %v481_v56  ;;  %v545_v60 = vmul.f32 0.0078125, %v515_v57  ;;  %v609_v53 = vsub.f32 %v6647_v1, %v481_v56 }
 0x149   : > { %v452_v61 = vpop.xlane.xlu0 %451 }
 0x14a   : > { %v624_v62 = vadd.f32 1e-06, %v592_v58  ;;  %v577_v63 = vsub.f32 %v545_v60, %v561_v59  ;;  %v6742_v2 = vmul.f32 0.0078125, %v452_v61 }
 0x14b   : > { %v454_v3 = vpop.xlane.xlu1 %453 }
 0x14c   : > { %5675 = vrsqrt.f32 %v624_v62  ;;  %v593_v7 = vmax.f32 %v577_v63, 0.0  ;;  %v562_v10 = vmul.f32 %v6742_v2, %v6742_v2  ;;  %v6746_v11 = vmul.f32 0.0078125, %v454_v3 }
 0x14d   : > { %v517_v12 = vpop.xlane.xlu0 %516  ;;  %v6778_v63 = vrot.slane %v6758_v35, %v8792_v51 }
 0x14e   : > { %v625_v13 = vadd.f32 1e-06, %v593_v7  ;;  %v546_v14 = vmul.f32 0.0078125, %v517_v12  ;;  %v563_v19 = vmul.f32 %v6746_v11, %v6746_v11 }
 0x14f   : > { %v519_v15 = vpop.xlane.xlu1 %518 }
 0x150   : > { %5677 = vrsqrt.f32 %v625_v13  ;;  %v578_v20 = vsub.f32 %v546_v14, %v562_v10  ;;  %v547_v21 = vmul.f32 0.0078125, %v519_v15  ;;  %v610_v14 = vsub.f32 %v6655_v4, %v6742_v2 }
 0x151   : > { %v456_v22 = vpop.xlane.xlu0 %455 }
 0x152   : > { %v594_v24 = vmax.f32 %v578_v20, 0.0  ;;  %v579_v26 = vsub.f32 %v547_v21, %v563_v19  ;;  %v6752_v27 = vmul.f32 0.0078125, %v456_v22 }
 0x153   : > { %v458_v28 = vpop.xlane.xlu1 %457 }
 0x154   : > { %v626_v30 = vadd.f32 1e-06, %v594_v24  ;;  %v595_v31 = vmax.f32 %v579_v26, 0.0  ;;  %v564_v33 = vmul.f32 %v6752_v27, %v6752_v27  ;;  %v6761_v37 = vmul.f32 0.0078125, %v458_v28 }
 0x155   : > { %v521_v38 = vpop.xlane.xlu0 %520  ;;  %v611_v28 = vsub.f32 %v6657_v5, %v6746_v11 }
 0x156   : > { %v5676_v39 = vpop.eup %5675  ;;  %5679 = vrsqrt.f32 %v626_v30  ;;  %v627_v43 = vadd.f32 1e-06, %v595_v31  ;;  %v548_v44 = vmul.f32 0.0078125, %v521_v38  ;;  %v565_v0 = vmul.f32 %v6761_v37, %v6761_v37 }
 0x157   : > { %v523_v47 = vpop.xlane.xlu1 %522  ;;  %v656_v48 = vmul.f32 %v5676_v39, %v608_v36 }
 0x158   : > { %5681 = vrsqrt.f32 %v627_v43  ;;  %v580_v50 = vsub.f32 %v548_v44, %v564_v33  ;;  %v549_v52 = vmul.f32 0.0078125, %v523_v47 }
 0x159   : > { %v460_v54 = vpop.xlane.xlu0 %459  ;;  %v676_v62 = vmul.f32 %v6766_v49, %v656_v48 }
 0x15a   : > { %v5678_v55 = vpop.eup %5677  ;;  %v596_v57 = vmax.f32 %v580_v50, 0.0  ;;  %v581_v58 = vsub.f32 %v549_v52, %v565_v0  ;;  %v6772_v59 = vmul.f32 0.0078125, %v460_v54  ;;  %v612_v54 = vsub.f32 %v6665_v8, %v6752_v27 }
 0x15b   : > { %v462_v60 = vpop.xlane.xlu1 %461  ;;  %v657_v61 = vmul.f32 %v5678_v55, %v609_v53  ;;  %v696_v19 = vadd.f32 %v6778_v63, %v676_v62 }
 0x15c   : > { %v628_v3 = vadd.f32 1e-06, %v596_v57  ;;  %v597_v6 = vmax.f32 %v581_v58, 0.0  ;;  %v566_v1 = vmul.f32 %v6772_v59, %v6772_v59  ;;  %v6782_v56 = vmul.f32 0.0078125, %v462_v60 }
 0x15d   : > { %v525_v7 = vpop.xlane.xlu0 %524  ;;  %v677_v10 = vmul.f32 %v6766_v49, %v657_v61 }
 0x15e   : > { %5683 = vrsqrt.f32 %v628_v3  ;;  %v629_v12 = vadd.f32 1e-06, %v597_v6  ;;  %v550_v13 = vmul.f32 0.0078125, %v525_v7  ;;  %v567_v22 = vmul.f32 %v6782_v56, %v6782_v56 }
 0x15f   : > { %v527_v15 = vpop.xlane.xlu1 %526  ;;  %v697_v20 = vadd.f32 %v6778_v63, %v677_v10  ;;  %v613_v6 = vsub.f32 %v6667_v9, %v6761_v37 }
 0x160   : > { %v5680_v21 = vpop.eup %5679  ;;  %5685 = vrsqrt.f32 %v629_v12  ;;  %v582_v24 = vsub.f32 %v550_v13, %v566_v1  ;;  %v551_v26 = vmul.f32 0.0078125, %v527_v15 }
 0x161   : > { %v464_v30 = vpop.xlane.xlu0 %463  ;;  %v712_v31 = vpack.c.bf16 %v697_v20, %v696_v19  ;;  %v658_v33 = vmul.f32 %v5680_v21, %v610_v14 }
 0x162   : > { %v5682_v36 = vpop.eup %5681  ;;  %v598_v4 = vmax.f32 %v582_v24, 0.0  ;;  %v583_v2 = vsub.f32 %v551_v26, %v567_v22  ;;  %v6793_v38 = vmul.f32 0.0078125, %v464_v30  ;;  %v614_v30 = vsub.f32 %v6679_v16, %v6772_v59 }
 0x163   : > { %v466_v39 = vpop.xlane.xlu1 %465  ;;  %849 = vmatmul.mubr.bf16.vlgmr.msra.gmra.mrb[0].mxu0 %v712_v31  ;;  %v659_v43 = vmul.f32 %v5682_v36, %v611_v28  ;;  %v678_v44 = vmul.f32 %v6766_v49, %v658_v33 }
 0x164   : > { %v630_v47 = vadd.f32 1e-06, %v598_v4  ;;  %v599_v48 = vmax.f32 %v583_v2, 0.0  ;;  %v568_v0 = vmul.f32 %v6793_v38, %v6793_v38  ;;  %858 = vmatprep.mubr.bf16.mxu0 %v8794_v42  ;;  %v6799_v5 = vmul.f32 0.0078125, %v466_v39 }
 0x165   : > { %v529_v11 = vpop.xlane.xlu0 %528  ;;  %v679_v50 = vmul.f32 %v6766_v49, %v659_v43  ;;  %v698_v57 = vadd.f32 %v6778_v63, %v678_v44  ;;  %v615_v44 = vsub.f32 %v6681_v17, %v6782_v56 }
 0x166   : > { %5687 = vrsqrt.f32 %v630_v47  ;;  %v631_v52 = vadd.f32 1e-06, %v599_v48  ;;  %v552_v53 = vmul.f32 0.0078125, %v529_v11  ;;  %v569_v61 = vmul.f32 %v6799_v5, %v6799_v5 }
 0x167   : > { %v531_v55 = vpop.xlane.xlu1 %530  ;;  %v699_v58 = vadd.f32 %v6778_v63, %v679_v50 }
 0x168   : > { %v5684_v60 = vpop.eup %5683  ;;  %5689 = vrsqrt.f32 %v631_v52  ;;  %v584_v62 = vsub.f32 %v552_v53, %v568_v0  ;;  %v553_v3 = vmul.f32 0.0078125, %v531_v55 }
 0x169   : > { %v468_v1 = vpop.xlane.xlu0 %467  ;;  %v713_v7 = vpack.c.bf16 %v699_v58, %v698_v57  ;;  %v660_v10 = vmul.f32 %v5684_v60, %v612_v54 }
 0x16a   : > { %v5686_v12 = vpop.eup %5685  ;;  %v600_v8 = vmax.f32 %v584_v62, 0.0  ;;  %v585_v27 = vsub.f32 %v553_v3, %v569_v61  ;;  %v6810_v13 = vmul.f32 0.0078125, %v468_v1  ;;  %v616_v3 = vsub.f32 %v6692_v23, %v6793_v38 }
 0x16b   : > { %v470_v14 = vpop.xlane.xlu1 %469  ;;  %859 = vmatmul.mubr.bf16.gmra.mrb[4].mxu0 %v713_v7  ;;  %v661_v15 = vmul.f32 %v5686_v12, %v613_v6  ;;  %v680_v19 = vmul.f32 %v6766_v49, %v660_v10 }
 0x16c   : > { %v632_v20 = vadd.f32 1e-06, %v600_v8  ;;  %v601_v21 = vmax.f32 %v585_v27, 0.0  ;;  %v570_v22 = vmul.f32 %v6810_v13, %v6810_v13  ;;  %868 = vmatprep.mubr.bf16.mxu0 %v8794_v42  ;;  %v6816_v9 = vmul.f32 0.0078125, %v470_v14 }
 0x16d   : > { %v533_v37 = vpop.xlane.xlu0 %532  ;;  %v681_v24 = vmul.f32 %v6766_v49, %v661_v15  ;;  %v700_v33 = vadd.f32 %v6778_v63, %v680_v19  ;;  %v617_v14 = vsub.f32 %v6695_v25, %v6799_v5 }
 0x16e   : > { %5691 = vrsqrt.f32 %v632_v20  ;;  %v633_v26 = vadd.f32 1e-06, %v601_v21  ;;  %v554_v28 = vmul.f32 0.0078125, %v533_v37  ;;  %v571_v2 = vmul.f32 %v6816_v9, %v6816_v9 }
 0x16f   : > { %v535_v31 = vpop.xlane.xlu1 %534  ;;  %v701_v36 = vadd.f32 %v6778_v63, %v681_v24 }
 0x170   : > { %v5688_v4 = vpop.eup %5687  ;;  %5693 = vrsqrt.f32 %v633_v26  ;;  %v586_v39 = vsub.f32 %v554_v28, %v570_v22  ;;  %v555_v43 = vmul.f32 0.0078125, %v535_v31 }
 0x171   : > { %v472_v47 = vpop.xlane.xlu0 %471  ;;  %v714_v48 = vpack.c.bf16 %v701_v36, %v700_v33  ;;  %v662_v0 = vmul.f32 %v5688_v4, %v614_v30 }
 0x172   : > { %v5690_v11 = vpop.eup %5689  ;;  %v602_v16 = vmax.f32 %v586_v39, 0.0  ;;  %v587_v59 = vsub.f32 %v555_v43, %v571_v2  ;;  %v6827_v50 = vmul.f32 0.0078125, %v472_v47  ;;  %v618_v2 = vsub.f32 %v6707_v32, %v6810_v13 }
 0x173   : > { %v474_v52 = vpop.xlane.xlu1 %473  ;;  %869 = vmatmul.mubr.bf16.gmra.mrb[8].mxu0 %v714_v48  ;;  %v663_v53 = vmul.f32 %v5690_v11, %v615_v44  ;;  %v682_v54 = vmul.f32 %v6766_v49, %v662_v0 }
 0x174   : > { %v634_v55 = vadd.f32 1e-06, %v602_v16  ;;  %v603_v57 = vmax.f32 %v587_v59, 0.0  ;;  %v572_v58 = vmul.f32 %v6827_v50, %v6827_v50  ;;  %878 = vmatprep.mubr.bf16.mxu0 %v8794_v42  ;;  %v6833_v17 = vmul.f32 0.0078125, %v474_v52 }
 0x175   : > { %v537_v56 = vpop.xlane.xlu0 %536  ;;  %v683_v60 = vmul.f32 %v6766_v49, %v663_v53  ;;  %v702_v1 = vadd.f32 %v6778_v63, %v682_v54  ;;  %v619_v16 = vsub.f32 %v6710_v34, %v6816_v9  ;;  %v620_v34 = vsub.f32 %v6721_v40, %v6827_v50 }
 0x176   : > { %5695 = vrsqrt.f32 %v634_v55  ;;  %v635_v61 = vadd.f32 1e-06, %v603_v57  ;;  %v556_v62 = vmul.f32 0.0078125, %v537_v56  ;;  %v573_v12 = vmul.f32 %v6833_v17, %v6833_v17 }
 0x177   : > { %v539_v6 = vpop.xlane.xlu1 %538  ;;  %v703_v7 = vadd.f32 %v6778_v63, %v683_v60 }
 0x178   : > { %v5692_v10 = vpop.eup %5691  ;;  %5697 = vrsqrt.f32 %v635_v61  ;;  %v588_v8 = vsub.f32 %v556_v62, %v572_v58  ;;  %v557_v27 = vmul.f32 0.0078125, %v539_v6 }
 0x179   : > { %v476_v15 = vpop.xlane.xlu0 %475  ;;  %v715_v19 = vpack.c.bf16 %v703_v7, %v702_v1  ;;  %v664_v20 = vmul.f32 %v5692_v10, %v616_v3  ;;  %v621_v3 = vsub.f32 %v6723_v41, %v6833_v17 }
 0x17a   : > { %v5694_v21 = vpop.eup %5693  ;;  %v604_v23 = vmax.f32 %v588_v8, 0.0  ;;  %v589_v38 = vsub.f32 %v557_v27, %v573_v12  ;;  %v494_v22 = vmul.f32 0.0078125, %v476_v15 }
 0x17b   : > { %v478_v37 = vpop.xlane.xlu1 %477  ;;  %879 = vmatmul.mubr.bf16.gmra.mrb[12].mxu0 %v715_v19  ;;  %v665_v24 = vmul.f32 %v5694_v21, %v617_v14  ;;  %v684_v26 = vmul.f32 %v6766_v49, %v664_v20 }
 0x17c   : > { %v636_v28 = vadd.f32 1e-06, %v604_v23  ;;  %v605_v30 = vmax.f32 %v589_v38, 0.0  ;;  %v574_v31 = vmul.f32 %v494_v22, %v494_v22  ;;  %888 = vmatprep.mubr.bf16.mxu0 %v8794_v42  ;;  %v495_v33 = vmul.f32 0.0078125, %v478_v37 }
 0x17d   : > { %v541_v36 = vpop.xlane.xlu0 %540  ;;  %v685_v25 = vmul.f32 %v6766_v49, %v665_v24  ;;  %v704_v43 = vadd.f32 %v6778_v63, %v684_v26  ;;  %v622_v50 = vsub.f32 %v6732_v45, %v494_v22  ;;  %v931_v37 = vsub.s32 4, %v6748_v18 }
 0x17e   : > { %5699 = vrsqrt.f32 %v636_v28  ;;  %v637_v5 = vadd.f32 1e-06, %v605_v30  ;;  %v558_v4 = vmul.f32 0.0078125, %v541_v36  ;;  %v575_v48 = vmul.f32 %v495_v33, %v495_v33 }
 0x17f   : > { %v543_v39 = vpop.xlane.xlu1 %542  ;;  %v705_v44 = vadd.f32 %v6778_v63, %v685_v25  ;;  %v623_v41 = vsub.f32 %v6734_v46, %v495_v33  ;;  %v951_v46 = vsub.s32 5, %v6748_v18  ;;  %v6877_v24 = vrot.slane %v6758_v35, %v931_v37 }
 0x180   : > { %v5696_v47 = vpop.eup %5695  ;;  %5701 = vrsqrt.f32 %v637_v5  ;;  %v590_v0 = vsub.f32 %v558_v4, %v574_v31  ;;  %v559_v11 = vmul.f32 0.0078125, %v543_v39 }
 0x181   : > { %v716_v59 = vpack.c.bf16 %v705_v44, %v704_v43  ;;  %v666_v52 = vmul.f32 %v5696_v47, %v618_v2  ;;  %v6880_v28 = vrot.slane %v6758_v35, %v951_v46 }
 0x182   : > { %v5698_v53 = vpop.eup %5697  ;;  %v606_v54 = vmax.f32 %v590_v0, 0.0  ;;  %v591_v55 = vsub.f32 %v559_v11, %v575_v48 }
 0x183   : > { %889 = vmatmul.mubr.bf16.gmra.mrb[16].mxu0 %v716_v59  ;;  %v667_v32 = vmul.f32 %v5698_v53, %v619_v16  ;;  %v686_v13 = vmul.f32 %v6766_v49, %v666_v52 }
 0x184   : > { %v638_v57 = vadd.f32 1e-06, %v606_v54  ;;  %v607_v58 = vmax.f32 %v591_v55, 0.0  ;;  %898 = vmatprep.mubr.bf16.mxu0 %v8794_v42 }
 0x185   : > { %v687_v56 = vmul.f32 %v6766_v49, %v667_v32  ;;  %v706_v9 = vadd.f32 %v6778_v63, %v686_v13 }
 0x186   : > { %5703 = vrsqrt.f32 %v638_v57  ;;  %v639_v60 = vadd.f32 1e-06, %v607_v58 }
 0x187   : > { %v707_v61 = vadd.f32 %v6778_v63, %v687_v56 }
 0x188   : > { %v5700_v62 = vpop.eup %5699  ;;  %5705 = vrsqrt.f32 %v639_v60 }
 0x189   : > { %v717_v6 = vpack.c.bf16 %v707_v61, %v706_v9  ;;  %v668_v1 = vmul.f32 %v5700_v62, %v620_v34 }
 0x18a   : > { %v5702_v7 = vpop.eup %5701 }
 0x18b   : > { %899 = vmatmul.mubr.bf16.gmra.mrb[20].mxu0 %v717_v6  ;;  %v669_v10 = vmul.f32 %v5702_v7, %v621_v3  ;;  %v688_v12 = vmul.f32 %v6766_v49, %v668_v1 }
 0x18c   : > { %908 = vmatprep.mubr.bf16.mxu0 %v8794_v42 }
 0x18d   : > { %v689_v40 = vmul.f32 %v6766_v49, %v669_v10  ;;  %v708_v8 = vadd.f32 %v6778_v63, %v688_v12 }
 0x18f   : > { %v709_v27 = vadd.f32 %v6778_v63, %v689_v40 }
 0x190   : > { %v5704_v14 = vpop.eup %5703 }
 0x191   : > { %v718_v17 = vpack.c.bf16 %v709_v27, %v708_v8  ;;  %v670_v15 = vmul.f32 %v5704_v14, %v622_v50 }
 0x192   : > { %v5706_v19 = vpop.eup %5705 }
 0x193   : > { %909 = vmatmul.mubr.bf16.gmra.mrb[24].mxu0 %v718_v17  ;;  %v671_v20 = vmul.f32 %v5706_v19, %v623_v41  ;;  %v690_v21 = vmul.f32 %v6766_v49, %v670_v15 }
 0x194   : > { %918 = vmatprep.mubr.bf16.mxu0 %v8794_v42 }
 0x195   : > { %v691_v23 = vmul.f32 %v6766_v49, %v671_v20  ;;  %v710_v45 = vadd.f32 %v6778_v63, %v690_v21 }
 0x197   : > { %v711_v38 = vadd.f32 %v6778_v63, %v691_v23 }
 0x199   : > { %v719_v22 = vpack.c.bf16 %v711_v38, %v710_v45 }
 0x19b   : > { %919 = vmatmul.mubr.bf16.gmra.mrb[28].mxu0 %v719_v22 }
 0x236   : > { %v850_v26 = vpop.f32.mrb[0].mxu0 }
 0x237   : > { %v933_v30 = vadd.f32 %v6877_v24, %v850_v26  ;;  %v852_v49 = vpop.f32.mrb[1].mxu0 }
 0x238   : > { %v854_v31 = vpop.f32.mrb[2].mxu0  ;;  %v953_v36 = vadd.f32 %v6880_v28, %v852_v49 }
 0x239   : > { %v934_v33 = vadd.f32 %v6877_v24, %v854_v31  ;;  %v856_v63 = vpop.f32.mrb[3].mxu0  ;;  %v969_v5 = vmul.f32 0.17677669, %v933_v30 }
 0x23a   : > { %v954_v25 = vadd.f32 %v6880_v28, %v856_v63 }
 0x23b   : > { %v970_v4 = vmul.f32 0.17677669, %v934_v33  ;;  %v6886_v2 = vpack.c.bf16 %v934_v33, %v933_v30 }
 0x23c   : > { %v6888_v39 = vpack.c.bf16 %v954_v25, %v953_v36 }
 0x23d   : > { %v6890_v35 = vpack.c.bf16 %v970_v4, %v969_v5  ;;  %1559 = vrot.lane.b32.xlu0 %v6886_v2, %s6311_s20  ;;  %5496 = vmatprep.subr.msk.bf16.mxu1 %vm1009_vm0, %v6886_v2  ;;  %v1023_v43 = vsel %vm1009_vm0, %v6886_v2, 0 }
 0x23e   : > { %v860_v44 = vpop.f32.mrb[4].mxu0  ;;  %5193 = vmatpush3.bf16.xpose.msra.mxu1 %v1023_v43 }
 0x23f   : > { %v935_v47 = vadd.f32 %v6877_v24, %v860_v44  ;;  %v862_v48 = vpop.f32.mrb[5].mxu0  ;;  %5200 = vmatprep.mubr.msk.bf16.mxu1 %vm1009_vm0, %v6890_v35 }
 0x240   : > { %v864_v0 = vpop.f32.mrb[6].mxu0  ;;  %v955_v59 = vadd.f32 %v6880_v28, %v862_v48 }
 0x241   : > { %v936_v11 = vadd.f32 %v6877_v24, %v864_v0  ;;  %v866_v16 = vpop.f32.mrb[7].mxu0  ;;  %v971_v53 = vmul.f32 0.17677669, %v935_v47 }
 0x242   : > { %v956_v52 = vadd.f32 %v6880_v28, %v866_v16 }
 0x243   : > { %v972_v54 = vmul.f32 0.17677669, %v936_v11  ;;  %v6904_v55 = vpack.c.bf16 %v936_v11, %v935_v47 }
 0x244   : > { %v6906_v32 = vpack.c.bf16 %v956_v52, %v955_v59 }
 0x245   : > { %v6908_v13 = vpack.c.bf16 %v972_v54, %v971_v53  ;;  %1561 = vrot.lane.b32.xlu1 %v6904_v55, %s6311_s20  ;;  %5497 = vmatprep.subr.msk.bf16.mxu1 %vm1009_vm0, %v6904_v55  ;;  %v1026_v57 = vsel %vm1009_vm0, %v6904_v55, 0 }
 0x246   : > { %v870_v58 = vpop.f32.mrb[8].mxu0  ;;  %5195 = vmatpush3.bf16.xpose.msra.mxu1 %v1026_v57 }
 0x247   : > { %v937_v56 = vadd.f32 %v6877_v24, %v870_v58  ;;  %v872_v60 = vpop.f32.mrb[9].mxu0 }
 0x248   : > { %v874_v34 = vpop.f32.mrb[10].mxu0  ;;  %v957_v62 = vadd.f32 %v6880_v28, %v872_v60 }
 0x249   : > { %v938_v9 = vadd.f32 %v6877_v24, %v874_v34  ;;  %v876_v61 = vpop.f32.mrb[11].mxu0  ;;  %v973_v6 = vmul.f32 0.17677669, %v937_v56 }
 0x24a   : > { %v958_v3 = vadd.f32 %v6880_v28, %v876_v61 }
 0x24b   : > { %v974_v1 = vmul.f32 0.17677669, %v938_v9  ;;  %v6920_v7 = vpack.c.bf16 %v938_v9, %v937_v56 }
 0x24c   : > { %v6922_v10 = vpack.c.bf16 %v958_v3, %v957_v62 }
 0x24d   : > { %v6924_v12 = vpack.c.bf16 %v974_v1, %v973_v6  ;;  %1563 = vrot.lane.b32.xlu0 %v6920_v7, %s6311_s20  ;;  %5498 = vmatprep.subr.msk.bf16.mxu1 %vm1009_vm0, %v6920_v7  ;;  %v1029_v40 = vsel %vm1009_vm0, %v6920_v7, 0 }
 0x24e   : > { %v880_v50 = vpop.f32.mrb[12].mxu0  ;;  %5197 = vmatpush3.bf16.xpose.msra.mxu1 %v1029_v40 }
 0x24f   : > { %v939_v8 = vadd.f32 %v6877_v24, %v880_v50  ;;  %v882_v27 = vpop.f32.mrb[13].mxu0 }
 0x250   : > { %v884_v14 = vpop.f32.mrb[14].mxu0  ;;  %v959_v15 = vadd.f32 %v6880_v28, %v882_v27 }
 0x251   : > { %v940_v41 = vadd.f32 %v6877_v24, %v884_v14  ;;  %v886_v17 = vpop.f32.mrb[15].mxu0  ;;  %v975_v20 = vmul.f32 0.17677669, %v939_v8 }
 0x252   : > { %v960_v19 = vadd.f32 %v6880_v28, %v886_v17 }
 0x253   : > { %v976_v21 = vmul.f32 0.17677669, %v940_v41  ;;  %v6936_v23 = vpack.c.bf16 %v940_v41, %v939_v8 }
 0x254   : > { %v6938_v45 = vpack.c.bf16 %v960_v19, %v959_v15 }
 0x255   : > { %v6940_v38 = vpack.c.bf16 %v976_v21, %v975_v20  ;;  %1565 = vrot.lane.b32.xlu0 %v6936_v23, %s6311_s20  ;;  %5499 = vmatprep.subr.msk.bf16.mxu1 %vm1009_vm0, %v6936_v23  ;;  %v1032_v22 = vsel %vm1009_vm0, %v6936_v23, 0 }
 0x256   : > { %v890_v37 = vpop.f32.mrb[16].mxu0  ;;  %5199 = vmatpush3.bf16.xpose.msra.mxu1 %v1032_v22 }
 0x257   : > { %v941_v46 = vadd.f32 %v6877_v24, %v890_v37  ;;  %v892_v26 = vpop.f32.mrb[17].mxu0 }
 0x258   : > { %v894_v30 = vpop.f32.mrb[18].mxu0  ;;  %v961_v33 = vadd.f32 %v6880_v28, %v892_v26 }
 0x259   : > { %v942_v49 = vadd.f32 %v6877_v24, %v894_v30  ;;  %v896_v31 = vpop.f32.mrb[19].mxu0  ;;  %v977_v36 = vmul.f32 0.17677669, %v941_v46 }
 0x25a   : > { %v962_v63 = vadd.f32 %v6880_v28, %v896_v31 }
 0x25b   : > { %v978_v25 = vmul.f32 0.17677669, %v942_v49  ;;  %v6952_v5 = vpack.c.bf16 %v942_v49, %v941_v46 }
 0x25c   : > { %v6954_v4 = vpack.c.bf16 %v962_v63, %v961_v33 }
 0x25d   : > { %v6956_v43 = vpack.c.bf16 %v978_v25, %v977_v36  ;;  %5201 = vmatmul.mubr.msk.bf16.vlgmr.msra.gmra.mrb[0].mxu1 %vm1009_vm0, %v6908_v13  ;;  %5500 = vmatprep.subr.msk.bf16.mxu1 %vm1009_vm0, %v6952_v5  ;;  %v1112_v44 = vsel %vm1009_vm0, %v6952_v5, 0 }
 0x25e   : > { %v900_v47 = vpop.f32.mrb[20].mxu0  ;;  %5204 = vmatprep.mubr.msk.bf16.mxu1 %vm1009_vm0, %v6924_v12  ;;  %5209 = vmatpush3.bf16.xpose.msra.mxu1 %v1112_v44 }
 0x25f   : > { %v943_v48 = vadd.f32 %v6877_v24, %v900_v47  ;;  %5240 = vmatprep.subr.bf16.mxu0 %v6954_v4  ;;  %v902_v0 = vpop.f32.mrb[21].mxu0 }
 0x260   : > { %5241 = vmatpush3.bf16.msra.mxu0 %v6954_v4  ;;  %v904_v11 = vpop.f32.mrb[22].mxu0  ;;  %v963_v52 = vadd.f32 %v6880_v28, %v902_v0 }
 0x261   : > { %v944_v16 = vadd.f32 %v6877_v24, %v904_v11  ;;  %v906_v59 = vpop.f32.mrb[23].mxu0  ;;  %v979_v54 = vmul.f32 0.17677669, %v943_v48 }
 0x262   : > { %v964_v53 = vadd.f32 %v6880_v28, %v906_v59 }
 0x263   : > { %v980_v57 = vmul.f32 0.17677669, %v944_v16  ;;  %v6972_v58 = vpack.c.bf16 %v944_v16, %v943_v48 }
 0x264   : > { %v6974_v56 = vpack.c.bf16 %v964_v53, %v963_v52 }
 0x265   : > { %v6976_v60 = vpack.c.bf16 %v980_v57, %v979_v54  ;;  %5205 = vmatmul.mubr.msk.bf16.gmra.mrb[4].mxu1 %vm1009_vm0, %v6940_v38  ;;  %5501 = vmatprep.subr.msk.bf16.mxu1 %vm1009_vm0, %v6972_v58  ;;  %v1115_v34 = vsel %vm1009_vm0, %v6972_v58, 0 }
 0x266   : > { %v910_v9 = vpop.f32.mrb[24].mxu0  ;;  %5211 = vmatpush3.bf16.xpose.msra.mxu1 %v1115_v34  ;;  %5216 = vmatprep.mubr.msk.bf16.mxu1 %vm1009_vm0, %v6956_v43 }
 0x267   : > { %v945_v61 = vadd.f32 %v6877_v24, %v910_v9  ;;  %5242 = vmatprep.subr.bf16.mxu0 %v6974_v56  ;;  %v912_v62 = vpop.f32.mrb[25].mxu0 }
 0x268   : > { %5243 = vmatpush3.bf16.msra.mxu0 %v6974_v56  ;;  %v914_v3 = vpop.f32.mrb[26].mxu0  ;;  %v965_v40 = vadd.f32 %v6880_v28, %v912_v62 }
 0x269   : > { %v946_v6 = vadd.f32 %v6877_v24, %v914_v3  ;;  %v916_v1 = vpop.f32.mrb[27].mxu0  ;;  %v981_v8 = vmul.f32 0.17677669, %v945_v61 }
 0x26a   : > { %v966_v50 = vadd.f32 %v6880_v28, %v916_v1 }
 0x26b   : > { %v982_v27 = vmul.f32 0.17677669, %v946_v6  ;;  %v6992_v14 = vpack.c.bf16 %v946_v6, %v945_v61 }
 0x26c   : > { %v6994_v41 = vpack.c.bf16 %v966_v50, %v965_v40 }
 0x26d   : > { %v6996_v17 = vpack.c.bf16 %v982_v27, %v981_v8  ;;  %5502 = vmatprep.subr.msk.bf16.mxu1 %vm1009_vm0, %v6992_v14  ;;  %v1118_v15 = vsel %vm1009_vm0, %v6992_v14, 0 }
 0x26e   : > { %v920_v19 = vpop.f32.mrb[28].mxu0  ;;  %5213 = vmatpush3.bf16.xpose.msra.mxu1 %v1118_v15  ;;  %5244 = vmatprep.subr.bf16.mxu0 %v6994_v41 }
 0x26f   : > { %v947_v20 = vadd.f32 %v6877_v24, %v920_v19  ;;  %v922_v21 = vpop.f32.mrb[29].mxu0  ;;  %5245 = vmatpush3.bf16.msra.mxu0 %v6994_v41 }
 0x270   : > { %v924_v22 = vpop.f32.mrb[30].mxu0  ;;  %v967_v26 = vadd.f32 %v6880_v28, %v922_v21 }
 0x271   : > { %v948_v37 = vadd.f32 %v6877_v24, %v924_v22  ;;  %v926_v46 = vpop.f32.mrb[31].mxu0  ;;  %v983_v49 = vmul.f32 0.17677669, %v947_v20 }
 0x272   : > { %v968_v30 = vadd.f32 %v6880_v28, %v926_v46 }
 0x273   : > { %v984_v31 = vmul.f32 0.17677669, %v948_v37  ;;  %v7008_v33 = vpack.c.bf16 %v948_v37, %v947_v20 }
 0x274   : > { %v7010_v63 = vpack.c.bf16 %v968_v30, %v967_v26 }
 0x275   : > { %v7012_v36 = vpack.c.bf16 %v984_v31, %v983_v49  ;;  %5503 = vmatprep.subr.msk.bf16.mxu1 %vm1009_vm0, %v7008_v33  ;;  %v1121_v25 = vsel %vm1009_vm0, %v7008_v33, 0 }
 0x276   : > { %5215 = vmatpush3.bf16.xpose.msra.mxu1 %v1121_v25  ;;  %5246 = vmatprep.subr.bf16.mxu0 %v7010_v63 }
 0x277   : > { %5224 = vmatprep.subr.bf16.mxu1 %v6888_v39  ;;  %5247 = vmatpush3.bf16.msra.mxu0 %v7010_v63 }
 0x27d   : > { %5217 = vmatmul.mubr.msk.bf16.vlgmr.msra.gmra.mrb[8].mxu1 %vm1009_vm0, %v6976_v60 }
 0x27e   : > { %5220 = vmatprep.mubr.msk.bf16.mxu1 %vm1009_vm0, %v6996_v17  ;;  %5225 = vmatpush3.bf16.msra.mxu1 %v6888_v39 }
 0x27f   : > { %5226 = vmatprep.subr.bf16.mxu1 %v6906_v32 }
 0x282   : > { %5227 = vmatpush3.bf16.msra.mxu1 %v6906_v32 }
 0x283   : > { %5228 = vmatprep.subr.bf16.mxu1 %v6922_v10 }
 0x285   : > { %5221 = vmatmul.mubr.msk.bf16.gmra.mrb[12].mxu1 %vm1009_vm0, %v7012_v36 }
 0x286   : > { %5229 = vmatpush3.bf16.msra.mxu1 %v6922_v10 }
 0x287   : > { %5230 = vmatprep.subr.bf16.mxu1 %v6938_v45 }
 0x28a   : > { %5231 = vmatpush3.bf16.msra.mxu1 %v6938_v45 }
 0x2af   : > { %v7034_v24 = vpop.permute.xlu0 %1559 }
 0x2b0   : > { %5504 = vmatprep.subr.msk.bf16.mxu1 %vm1009_vm0, %v7034_v24 }
 0x2b7   : > { %v7102_v25 = vpop.permute.xlu1 %1561 }
 0x2bf   : > { %v7098_v49 = vpop.permute.xlu0 %1563 }
 0x2c7   : > { %v7100_v31 = vpop.permute.xlu0 %1565 }
 0x330   : > { %v5202_v28 = vpop.f32.mrb[0].mxu1 }
 0x331   : > { %v7038_v44 = vpop.f32.mrb[1].mxu1  ;;  %v1195_v47 = vsel %vm1188_vm1, %v5202_v28, -inf }
 0x332   : > { %1196 = vmax.xlane.f32.xlu0 %v1195_v47  ;;  %v5203_v48 = vpop.f32.mrb[2].mxu1  ;;  %v1189_v16 = vsel %vm1188_vm1, %v7038_v44, -inf }
 0x333   : > { %v7041_v0 = vpop.f32.mrb[3].mxu1  ;;  %v1198_v11 = vsel %vm1188_vm1, %v5203_v48, -inf }
 0x334   : > { %1199 = vmax.xlane.f32.xlu1 %v1198_v11  ;;  %v1192_v59 = vsel %vm1188_vm1, %v7041_v0, -inf }
 0x336   : > { %1190 = vmax.xlane.f32.xlu0 %v1189_v16 }
 0x338   : > { %1193 = vmax.xlane.f32.xlu1 %v1192_v59  ;;  %v5206_v52 = vpop.f32.mrb[4].mxu1 }
 0x339   : > { %v7048_v53 = vpop.f32.mrb[5].mxu1  ;;  %v1207_v54 = vsel %vm1188_vm1, %v5206_v52, -inf }
 0x33a   : > { %1208 = vmax.xlane.f32.xlu0 %v1207_v54  ;;  %v5207_v57 = vpop.f32.mrb[6].mxu1  ;;  %v1201_v61 = vsel %vm1188_vm1, %v7048_v53, -inf }
 0x33b   : > { %v7051_v34 = vpop.f32.mrb[7].mxu1  ;;  %v1210_v9 = vsel %vm1188_vm1, %v5207_v57, -inf }
 0x33c   : > { %1211 = vmax.xlane.f32.xlu1 %v1210_v9  ;;  %v1204_v62 = vsel %vm1188_vm1, %v7051_v34, -inf }
 0x33e   : > { %1202 = vmax.xlane.f32.xlu0 %v1201_v61 }
 0x340   : > { %1205 = vmax.xlane.f32.xlu1 %v1204_v62 }
 0x350   : > { %v7058_v3 = vpop.f32.mrb[8].mxu1 }
 0x351   : > { %v7060_v6 = vpop.f32.mrb[9].mxu1  ;;  %v1219_v1 = vsel %vm1188_vm1, %v7058_v3, -inf }
 0x352   : > { %1220 = vmax.xlane.f32.xlu0 %v1219_v1  ;;  %v7064_v40 = vpop.f32.mrb[10].mxu1  ;;  %v1213_v27 = vsel %vm1188_vm1, %v7060_v6, -inf }
 0x353   : > { %v7066_v50 = vpop.f32.mrb[11].mxu1  ;;  %v1222_v8 = vsel %vm1188_vm1, %v7064_v40, -inf }
 0x354   : > { %1223 = vmax.xlane.f32.xlu1 %v1222_v8  ;;  %v1216_v15 = vsel %vm1188_vm1, %v7066_v50, -inf }
 0x356   : > { %1214 = vmax.xlane.f32.xlu0 %v1213_v27 }
 0x358   : > { %1217 = vmax.xlane.f32.xlu1 %v1216_v15  ;;  %v7074_v19 = vpop.f32.mrb[12].mxu1 }
 0x359   : > { %v7076_v20 = vpop.f32.mrb[13].mxu1  ;;  %v1231_v21 = vsel %vm1188_vm1, %v7074_v19, -inf }
 0x35a   : > { %1232 = vmax.xlane.f32.xlu0 %v1231_v21  ;;  %v7080_v22 = vpop.f32.mrb[14].mxu1  ;;  %v1225_v46 = vsel %vm1188_vm1, %v7076_v20, -inf }
 0x35b   : > { %v7082_v37 = vpop.f32.mrb[15].mxu1  ;;  %v1234_v26 = vsel %vm1188_vm1, %v7080_v22, -inf }
 0x35c   : > { %v1228_v30 = vsel %vm1188_vm1, %v7082_v37, -inf }
 0x35e   : > { %1226 = vmax.xlane.f32.xlu0 %v1225_v46 }
 0x369   : > { %1549 = vrot.lane.b32.xlu1 %v6908_v13, %s6311_s20 }
 0x36d   : > { %1672 = vrot.lane.b32.xlu1 %v6952_v5, %s6311_s20 }
 0x371   : > { %1674 = vrot.lane.b32.xlu1 %v6972_v58, %s6311_s20 }
 0x374   : > { %1547 = vrot.lane.b32.xlu0 %v6890_v35, %s6311_s20 }
 0x395   : > { %1235 = vmax.xlane.f32.xlu1 %v1234_v26 }
 0x399   : > { %1229 = vmax.xlane.f32.xlu1 %v1228_v30 }
 0x3bf   : > { %v1197_v47 = vpop.xlane.xlu0 %1196 }
 0x3c0   : > { %v1239_v11 = vsub.f32 %v5202_v28, %v1197_v47 }
 0x3c1   : > { %v1200_v16 = vpop.xlane.xlu1 %1199 }
 0x3c2   : > { %v1257_v59 = vmul.f32 1.442695, %v1239_v11  ;;  %v1240_v54 = vsub.f32 %v5203_v48, %v1200_v16 }
 0x3c3   : > { %v1191_v9 = vpop.xlane.xlu0 %1190 }
 0x3c4   : > { %5707 = vpow2.f32 %v1257_v59  ;;  %v1259_v61 = vmul.f32 1.442695, %v1240_v54  ;;  %v1237_v62 = vsub.f32 %v7038_v44, %v1191_v9 }
 0x3c5   : > { %v1194_v1 = vpop.xlane.xlu1 %1193 }
 0x3c6   : > { %5709 = vpow2.f32 %v1259_v61  ;;  %v1253_v8 = vmul.f32 1.442695, %v1237_v62  ;;  %v1238_v27 = vsub.f32 %v7041_v0, %v1194_v1 }
 0x3c7   : > { %v1209_v15 = vpop.xlane.xlu0 %1208 }
 0x3c8   : > { %5711 = vpow2.f32 %v1253_v8  ;;  %v1255_v21 = vmul.f32 1.442695, %v1238_v27  ;;  %v1243_v46 = vsub.f32 %v5206_v52, %v1209_v15 }
 0x3c9   : > { %v1212_v26 = vpop.xlane.xlu1 %1211 }
 0x3ca   : > { %5713 = vpow2.f32 %v1255_v21  ;;  %v1265_v28 = vmul.f32 1.442695, %v1243_v46  ;;  %v1244_v30 = vsub.f32 %v5207_v57, %v1212_v26 }
 0x3cb   : > { %v1203_v47 = vpop.xlane.xlu0 %1202 }
 0x3cc   : > { %5715 = vpow2.f32 %v1265_v28  ;;  %v1267_v48 = vmul.f32 1.442695, %v1244_v30  ;;  %v1241_v11 = vsub.f32 %v7048_v53, %v1203_v47 }
 0x3cd   : > { %v1206_v16 = vpop.xlane.xlu1 %1205 }
 0x3ce   : > { %v7107_v44 = vpop.eup %5707  ;;  %5717 = vpow2.f32 %v1267_v48  ;;  %v1261_v59 = vmul.f32 1.442695, %v1241_v11  ;;  %v1242_v0 = vsub.f32 %v7051_v34, %v1206_v16 }
 0x3cf   : > { %v1291_v54 = vsel %vm1188_vm1, %v7107_v44, 0.0 }
 0x3d0   : > { %v7112_v52 = vpop.eup %5709  ;;  %5719 = vpow2.f32 %v1261_v59  ;;  %v1263_v9 = vmul.f32 1.442695, %v1242_v0  ;;  %1292 = vadd.xlane.f32.xlu0 %v1291_v54 }
 0x3d1   : > { %v1294_v57 = vsel %vm1188_vm1, %v7112_v52, 0.0 }
 0x3d2   : > { %v7116_v61 = vpop.eup %5711  ;;  %5721 = vpow2.f32 %v1263_v9  ;;  %1295 = vadd.xlane.f32.xlu1 %v1294_v57 }
 0x3d3   : > { %v1285_v53 = vsel %vm1188_vm1, %v7116_v61, 0.0 }
 0x3d4   : > { %v7120_v62 = vpop.eup %5713  ;;  %1286 = vadd.xlane.f32.xlu0 %v1285_v53 }
 0x3d5   : > { %v1288_v34 = vsel %vm1188_vm1, %v7120_v62, 0.0 }
 0x3d6   : > { %v7124_v1 = vpop.eup %5715  ;;  %1289 = vadd.xlane.f32.xlu1 %v1288_v34 }
 0x3d7   : > { %v1303_v8 = vsel %vm1188_vm1, %v7124_v1, 0.0 }
 0x3d8   : > { %v7128_v27 = vpop.eup %5717  ;;  %1304 = vadd.xlane.f32.xlu0 %v1303_v8 }
 0x3d9   : > { %v1306_v15 = vsel %vm1188_vm1, %v7128_v27, 0.0 }
 0x3da   : > { %v7132_v21 = vpop.eup %5719  ;;  %1307 = vadd.xlane.f32.xlu1 %v1306_v15 }
 0x3db   : > { %v1297_v46 = vsel %vm1188_vm1, %v7132_v21, 0.0 }
 0x3dc   : > { %v7136_v26 = vpop.eup %5721  ;;  %1298 = vadd.xlane.f32.xlu0 %v1297_v46 }
 0x3dd   : > { %v1300_v28 = vsel %vm1188_vm1, %v7136_v26, 0.0 }
 0x3de   : > { %1301 = vadd.xlane.f32.xlu1 %v1300_v28 }
 0x3df   : > { %v1221_v30 = vpop.xlane.xlu0 %1220 }
 0x3e0   : > { %v1247_v47 = vsub.f32 %v7058_v3, %v1221_v30 }
 0x3e1   : > { %v1224_v48 = vpop.xlane.xlu1 %1223 }
 0x3e2   : > { %v1273_v11 = vmul.f32 1.442695, %v1247_v47  ;;  %v1248_v16 = vsub.f32 %v7064_v40, %v1224_v48 }
 0x3e3   : > { %v1215_v59 = vpop.xlane.xlu0 %1214 }
 0x3e4   : > { %5723 = vpow2.f32 %v1273_v11  ;;  %v1245_v0 = vsub.f32 %v7060_v6, %v1215_v59  ;;  %v1275_v9 = vmul.f32 1.442695, %v1248_v16 }
 0x3e5   : > { %v1218_v54 = vpop.xlane.xlu1 %1217 }
 0x3e6   : > { %v1269_v57 = vmul.f32 1.442695, %v1245_v0  ;;  %v1246_v53 = vsub.f32 %v7066_v50, %v1218_v54 }
 0x3e7   : > { %v1233_v28 = vpop.xlane.xlu0 %1232 }
 0x3e8   : > { %5725 = vpow2.f32 %v1269_v57  ;;  %v1271_v8 = vmul.f32 1.442695, %v1246_v53  ;;  %v1251_v48 = vsub.f32 %v7074_v19, %v1233_v28 }
 0x3e9   : > { %v7144_v34 = vpop.permute.xlu1 %1549  ;;  %5727 = vpow2.f32 %v1275_v9 }
 0x3ea   : > { %5729 = vpow2.f32 %v1271_v8  ;;  %v1281_v59 = vmul.f32 1.442695, %v1251_v48 }
 0x3eb   : > { %v1227_v16 = vpop.xlane.xlu0 %1226 }
 0x3ec   : > { %v1249_v0 = vsub.f32 %v7076_v20, %v1227_v16  ;;  %5731 = vpow2.f32 %v1281_v59 }
 0x3ed   : > { %v7146_v15 = vpop.permute.xlu1 %1672 }
 0x3ee   : > { %v7148_v3 = vpop.eup %5723  ;;  %5508 = vmatprep.subr.msk.bf16.mxu0 %vm1009_vm0, %v7146_v15  ;;  %v1277_v54 = vmul.f32 1.442695, %v1249_v0 }
 0x3ef   : > { %v1315_v6 = vsel %vm1188_vm1, %v7148_v3, 0.0 }
 0x3f0   : > { %1316 = vadd.xlane.f32.xlu1 %v1315_v6  ;;  %5733 = vpow2.f32 %v1277_v54 }
 0x3f1   : > { %v7180_v8 = vpop.permute.xlu1 %1674 }
 0x3f2   : > { %v7154_v40 = vpop.eup %5725  ;;  %1676 = vrot.lane.b32.xlu0 %v6992_v14, %s6311_s20 }
 0x3f3   : > { %v1309_v50 = vsel %vm1188_vm1, %v7154_v40, 0.0  ;;  %v7160_v46 = vpop.eup %5727 }
 0x3f4   : > { %1310 = vadd.xlane.f32.xlu1 %v1309_v50  ;;  %v1318_v30 = vsel %vm1188_vm1, %v7160_v46, 0.0  ;;  %v7164_v47 = vpop.eup %5729 }
 0x3f5   : > { %v1312_v11 = vsel %vm1188_vm1, %v7164_v47, 0.0 }
 0x3f6   : > { %v7170_v9 = vpop.eup %5731 }
 0x3f7   : > { %v1327_v57 = vsel %vm1188_vm1, %v7170_v9, 0.0 }
 0x3f8   : > { %1319 = vadd.xlane.f32.xlu1 %v1318_v30 }
 0x3fa   : > { %v7176_v19 = vpop.eup %5733 }
 0x3fb   : > { %v1321_v53 = vsel %vm1188_vm1, %v7176_v19, 0.0 }
 0x3fc   : > { %1313 = vadd.xlane.f32.xlu1 %v1312_v11 }
 0x40d   : > { %1551 = vrot.lane.b32.xlu1 %v6924_v12, %s6311_s20 }
 0x411   : > { %1328 = vadd.xlane.f32.xlu0 %v1327_v57 }
 0x415   : > { %1322 = vadd.xlane.f32.xlu0 %v1321_v53 }
 0x422   : > { %v1236_v20 = vpop.xlane.xlu1 %1235 }
 0x423   : > { %v1252_v6 = vsub.f32 %v7080_v22, %v1236_v20  ;;  %v1548_v22 = vpop.permute.xlu0 %1547 }
 0x425   : > { %v1283_v50 = vmul.f32 1.442695, %v1252_v6 }
 0x426   : > { %v1230_v28 = vpop.xlane.xlu1 %1229 }
 0x427   : > { %5735 = vpow2.f32 %v1283_v50  ;;  %v1250_v30 = vsub.f32 %v7082_v37, %v1230_v28 }
 0x429   : > { %v1279_v48 = vmul.f32 1.442695, %v1250_v30 }
 0x42b   : > { %5737 = vpow2.f32 %v1279_v48 }
 0x431   : > { %v7184_v11 = vpop.eup %5735 }
 0x432   : > { %v1330_v16 = vsel %vm1188_vm1, %v7184_v11, 0.0 }
 0x433   : > { %1331 = vadd.xlane.f32.xlu0 %v1330_v16 }
 0x435   : > { %v7188_v59 = vpop.eup %5737 }
 0x436   : > { %v1324_v0 = vsel %vm1188_vm1, %v7188_v59, 0.0 }
 0x437   : > { %1325 = vadd.xlane.f32.xlu1 %v1324_v0 }
 0x448   : > { %1678 = vrot.lane.b32.xlu1 %v7008_v33, %s6311_s20 }
 0x449   : > { %1553 = vrot.lane.b32.xlu0 %v6940_v38, %s6311_s20 }
 0x44c   : > { %1662 = vrot.lane.b32.xlu1 %v6976_v60, %s6311_s20 }
 0x44d   : > { %1660 = vrot.lane.b32.xlu0 %v6956_v43, %s6311_s20 }
 0x450   : > { %1666 = vrot.lane.b32.xlu1 %v7012_v36, %s6311_s20 }
 0x451   : > { %1664 = vrot.lane.b32.xlu0 %v6996_v17, %s6311_s20 }
 0x454   : > { %1959 = vrot.lane.b32.xlu1 %v6906_v32, %s6311_s20 }
 0x455   : > { %1957 = vrot.lane.b32.xlu0 %v6888_v39, %s6311_s20 }
 0x458   : > { %1961 = vrot.lane.b32.xlu1 %v6922_v10, %s6311_s20 }
 0x459   : > { %2196 = vrot.lane.b32.xlu0 %v6886_v2, %s6312_s23 }
 0x45c   : > { %1963 = vrot.lane.b32.xlu1 %v6938_v45, %s6311_s20 }
 0x45d   : > { %v1293_v37 = vpop.xlane.xlu0 %1292  ;;  %2050 = vrot.lane.b32.xlu0 %v6954_v4, %s6311_s20 }
 0x45f   : > { %v1296_v54 = vpop.xlane.xlu1 %1295 }
 0x460   : > { %2198 = vrot.lane.b32.xlu1 %v6904_v55, %s6312_s23  ;;  %5739 = vrcp.f32 %v1296_v54 }
 0x461   : > { %v1287_v57 = vpop.xlane.xlu0 %1286  ;;  %2052 = vrot.lane.b32.xlu0 %v6974_v56, %s6311_s20 }
 0x462   : > { %5741 = vrcp.f32 %v1287_v57 }
 0x463   : > { %5743 = vrcp.f32 %v1293_v37  ;;  %v1290_v53 = vpop.xlane.xlu1 %1289 }
 0x464   : > { %5745 = vrcp.f32 %v1290_v53  ;;  %2054 = vrot.lane.b32.xlu1 %v6994_v41, %s6311_s20 }
 0x465   : > { %v1305_v20 = vpop.xlane.xlu0 %1304  ;;  %2200 = vrot.lane.b32.xlu0 %v6920_v7, %s6312_s23 }
 0x467   : > { %v1308_v6 = vpop.xlane.xlu1 %1307 }
 0x468   : > { %2202 = vrot.lane.b32.xlu1 %v6936_v23, %s6312_s23  ;;  %5747 = vrcp.f32 %v1308_v6 }
 0x469   : > { %v1299_v50 = vpop.xlane.xlu0 %1298  ;;  %2056 = vrot.lane.b32.xlu0 %v7010_v63, %s6311_s20 }
 0x46a   : > { %5749 = vrcp.f32 %v1299_v50  ;;  %v5740_v28 = vpop.eup %5739 }
 0x46b   : > { %5751 = vrcp.f32 %v1305_v20  ;;  %v1302_v30 = vpop.xlane.xlu1 %1301  ;;  %v1352_v37 = vmul.f32 %v5740_v28, %v7112_v52  ;;  %v1580_v20 = vsel %vm1009_vm0, %v7034_v24, 0 }
 0x46c   : > { %v5742_v48 = vpop.eup %5741  ;;  %5753 = vrcp.f32 %v1302_v30 }
 0x46d   : > { %v5744_v16 = vpop.eup %5743  ;;  %v1349_v54 = vmul.f32 %v5742_v48, %v7116_v61 }
 0x46e   : > { %v5746_v0 = vpop.eup %5745  ;;  %v1351_v53 = vmul.f32 %v5744_v16, %v7107_v44 }
 0x46f   : > { %v1350_v57 = vmul.f32 %v5746_v0, %v7120_v62 }
 0x470   : > { %v1366_v51 = vpack.c.bf16 %v1352_v37, %v1351_v53 }
 0x471   : > { %v1365_v6 = vpack.c.bf16 %v1350_v57, %v1349_v54 }
 0x472   : > { %v5748_v29 = vpop.eup %5747 }
 0x473   : > { %5232 = vmatprep.mubr.msk.bf16.mxu1 %vm1188_vm1, %v1365_v6  ;;  %v1356_v61 = vmul.f32 %v5748_v29, %v7128_v27 }
 0x474   : > { %v5750_v50 = vpop.eup %5749  ;;  %5233 = vmatmul.mubr.msk.bf16.vlgmr.msra.gmra.mrb[16].mxu1 %vm1188_vm1, %v1366_v51  ;;  %v1583_v51 = vsel %vm1009_vm0, %v7102_v25, 0 }
 0x475   : > { %v5752_v30 = vpop.eup %5751  ;;  %5257 = vmatpush3.bf16.xpose.msra.mxu1 %v1580_v20  ;;  %v1353_v44 = vmul.f32 %v5750_v50, %v7132_v21  ;;  %v1589_v21 = vsel %vm1009_vm0, %v7100_v31, 0 }
 0x476   : > { %v5754_v52 = vpop.eup %5753  ;;  %5505 = vmatprep.subr.msk.bf16.mxu1 %vm1009_vm0, %v7102_v25  ;;  %v1355_v28 = vmul.f32 %v5752_v30, %v7124_v1  ;;  %v1586_v1 = vsel %vm1009_vm0, %v7098_v49, 0 }
 0x477   : > { %v1354_v62 = vmul.f32 %v5754_v52, %v7136_v26 }
 0x478   : > { %v1368_v16 = vpack.c.bf16 %v1356_v61, %v1355_v28 }
 0x479   : > { %v1367_v48 = vpack.c.bf16 %v1354_v62, %v1353_v44 }
 0x47b   : > { %5236 = vmatprep.mubr.msk.bf16.mxu1 %vm1188_vm1, %v1367_v48 }
 0x47c   : > { %5237 = vmatmul.mubr.msk.bf16.gmra.mrb[20].mxu1 %vm1188_vm1, %v1368_v16 }
 0x47d   : > { %5259 = vmatpush3.bf16.xpose.msra.mxu1 %v1583_v51  ;;  %5264 = vmatprep.mubr.msk.bf16.mxu1 %vm1009_vm0, %v1548_v22  ;;  %v1317_v24 = vpop.xlane.xlu1 %1316 }
 0x47e   : > { %5506 = vmatprep.subr.msk.bf16.mxu1 %vm1009_vm0, %v7098_v49 }
 0x481   : > { %v1311_v29 = vpop.xlane.xlu1 %1310 }
 0x485   : > { %5261 = vmatpush3.bf16.xpose.msra.mxu1 %v1586_v1  ;;  %v1320_v27 = vpop.xlane.xlu1 %1319 }
 0x486   : > { %5507 = vmatprep.subr.msk.bf16.mxu1 %vm1009_vm0, %v7100_v31  ;;  %5755 = vrcp.f32 %v1320_v27 }
 0x487   : > { %5757 = vrcp.f32 %v1311_v29 }
 0x488   : > { %5759 = vrcp.f32 %v1317_v24 }
 0x489   : > { %v1314_v25 = vpop.xlane.xlu1 %1313 }
 0x48a   : > { %5761 = vrcp.f32 %v1314_v25 }
 0x48d   : > { %5263 = vmatpush3.bf16.xpose.msra.mxu1 %v1589_v21  ;;  %v1552_v54 = vpop.permute.xlu1 %1551 }
 0x490   : > { %v5756_v26 = vpop.eup %5755 }
 0x491   : > { %v5758_v22 = vpop.eup %5757  ;;  %v1360_v49 = vmul.f32 %v5756_v26, %v7160_v46  ;;  %v1693_v46 = vsel %vm1009_vm0, %v7146_v15, 0 }
 0x492   : > { %v5760_v0 = vpop.eup %5759  ;;  %v1357_v57 = vmul.f32 %v5758_v22, %v7154_v40  ;;  %v1677_v40 = vpop.permute.xlu0 %1676 }
 0x493   : > { %v1359_v6 = vmul.f32 %v5760_v0, %v7148_v3  ;;  %v1699_v3 = vsel %vm1009_vm0, %v1677_v40, 0 }
 0x494   : > { %v5762_v37 = vpop.eup %5761  ;;  %5265 = vmatmul.mubr.msk.bf16.vlgmr.msra.gmra.mrb[24].mxu1 %vm1009_vm0, %v7144_v34  ;;  %v1696_v34 = vsel %vm1009_vm0, %v7180_v8, 0 }
 0x495   : > { %5268 = vmatprep.mubr.msk.bf16.mxu1 %vm1009_vm0, %v1552_v54  ;;  %v1358_v53 = vmul.f32 %v5762_v37, %v7164_v47  ;;  %v1370_v50 = vpack.c.bf16 %v1360_v49, %v1359_v6 }
 0x497   : > { %v1369_v31 = vpack.c.bf16 %v1358_v53, %v1357_v57 }
 0x499   : > { %5248 = vmatprep.mubr.msk.bf16.mxu0 %vm1188_vm1, %v1369_v31 }
 0x49a   : > { %5249 = vmatmul.mubr.msk.bf16.vlgmr.msra.gmra.mrb[32].mxu0 %vm1188_vm1, %v1370_v50 }
 0x49b   : > { %5273 = vmatpush3.bf16.xpose.msra.mxu0 %v1693_v46 }
 0x49c   : > { %5509 = vmatprep.subr.msk.bf16.mxu0 %vm1009_vm0, %v7180_v8 }
 0x49e   : > { %v1329_v47 = vpop.xlane.xlu0 %1328 }
 0x4a2   : > { %v1323_v20 = vpop.xlane.xlu0 %1322 }
 0x4a3   : > { %5275 = vmatpush3.bf16.xpose.msra.mxu0 %v1696_v34 }
 0x4a4   : > { %5510 = vmatprep.subr.msk.bf16.mxu0 %vm1009_vm0, %v1677_v40 }
 0x4ab   : > { %5277 = vmatpush3.bf16.xpose.msra.mxu0 %v1699_v3 }
 0x4c0   : > { %v1332_v30 = vpop.xlane.xlu0 %1331 }
 0x4c1   : > { %5763 = vrcp.f32 %v1332_v30 }
 0x4c2   : > { %5765 = vrcp.f32 %v1323_v20 }
 0x4c3   : > { %5767 = vrcp.f32 %v1329_v47 }
 0x4c4   : > { %v1554_v15 = vpop.permute.xlu0 %1553  ;;  %v1326_v52 = vpop.xlane.xlu1 %1325 }
 0x4c5   : > { %5769 = vrcp.f32 %v1326_v52  ;;  %5269 = vmatmul.mubr.msk.bf16.gmra.mrb[28].mxu1 %vm1009_vm0, %v1554_v15 }
 0x4c8   : > { %v1661_v61 = vpop.permute.xlu0 %1660  ;;  %v1679_v8 = vpop.permute.xlu1 %1678 }
 0x4c9   : > { %5511 = vmatprep.subr.msk.bf16.mxu0 %vm1009_vm0, %v1679_v8  ;;  %v1702_v44 = vsel %vm1009_vm0, %v1679_v8, 0 }
 0x4ca   : > { %5279 = vmatpush3.bf16.xpose.msra.mxu0 %v1702_v44 }
 0x4cb   : > { %v5764_v62 = vpop.eup %5763 }
 0x4cc   : > { %v1665_v28 = vpop.permute.xlu0 %1664  ;;  %v1663_v48 = vpop.permute.xlu1 %1662  ;;  %v1364_v29 = vmul.f32 %v5764_v62, %v7184_v11 }
 0x4cd   : > { %v5766_v16 = vpop.eup %5765 }
 0x4ce   : > { %v5768_v51 = vpop.eup %5767  ;;  %v1361_v25 = vmul.f32 %v5766_v16, %v7176_v19 }
 0x4cf   : > { %v5770_v24 = vpop.eup %5769  ;;  %v1363_v26 = vmul.f32 %v5768_v51, %v7170_v9 }
 0x4d0   : > { %v1958_v1 = vpop.permute.xlu0 %1957  ;;  %v1667_v27 = vpop.permute.xlu1 %1666  ;;  %v1362_v21 = vmul.f32 %v5770_v24, %v7188_v59 }
 0x4d1   : > { %5288 = vmatprep.subr.bf16.mxu1 %v1958_v1  ;;  %v1372_v0 = vpack.c.bf16 %v1364_v29, %v1363_v26 }
 0x4d2   : > { %5289 = vmatpush3.bf16.msra.mxu1 %v1958_v1  ;;  %v1371_v22 = vpack.c.bf16 %v1362_v21, %v1361_v25 }
 0x4d4   : > { %v7279_v37 = vpop.permute.xlu0 %2196  ;;  %v1960_v49 = vpop.permute.xlu1 %1959  ;;  %5252 = vmatprep.mubr.msk.bf16.mxu0 %vm1188_vm1, %v1371_v22 }
 0x4d5   : > { %5253 = vmatmul.mubr.msk.bf16.gmra.mrb[36].mxu0 %vm1188_vm1, %v1372_v0  ;;  %5290 = vmatprep.subr.bf16.mxu1 %v1960_v49 }
 0x4d6   : > { %5280 = vmatprep.mubr.msk.bf16.mxu0 %vm1009_vm0, %v1661_v61  ;;  %5291 = vmatpush3.bf16.msra.mxu1 %v1960_v49 }
 0x4d8   : > { %v2051_v19 = vpop.permute.xlu0 %2050  ;;  %v1962_v11 = vpop.permute.xlu1 %1961 }
 0x4d9   : > { %5292 = vmatprep.subr.bf16.mxu1 %v1962_v11  ;;  %5304 = vmatprep.subr.bf16.mxu0 %v2051_v19 }
 0x4da   : > { %5293 = vmatpush3.bf16.msra.mxu1 %v1962_v11 }
 0x4dc   : > { %v2053_v9 = vpop.permute.xlu0 %2052  ;;  %v1964_v59 = vpop.permute.xlu1 %1963 }
 0x4dd   : > { %5281 = vmatmul.mubr.msk.bf16.vlgmr.msra.gmra.mrb[40].mxu0 %vm1009_vm0, %v1663_v48  ;;  %5294 = vmatprep.subr.bf16.mxu1 %v1964_v59 }
 0x4de   : > { %5305 = vmatpush3.bf16.msra.mxu0 %v2051_v19  ;;  %5284 = vmatprep.mubr.msk.bf16.mxu0 %vm1009_vm0, %v1665_v28 }
 0x4df   : > { %5295 = vmatpush3.bf16.msra.mxu1 %v1964_v59  ;;  %5306 = vmatprep.subr.bf16.mxu0 %v2053_v9 }
 0x4e0   : > { %5512 = vmatprep.subr.msk.bf16.mxu1 %vm1009_vm0, %v7279_v37  ;;  %v7288_v54 = vpop.permute.xlu0 %2200  ;;  %v7290_v57 = vpop.permute.xlu1 %2198 }
 0x4e2   : > { %5307 = vmatpush3.bf16.msra.mxu0 %v2053_v9 }
 0x4e4   : > { %v2055_v53 = vpop.permute.xlu1 %2054  ;;  %v2057_v6 = vpop.permute.xlu0 %2056 }
 0x4e5   : > { %5285 = vmatmul.mubr.msk.bf16.gmra.mrb[44].mxu0 %vm1009_vm0, %v1667_v27  ;;  %5308 = vmatprep.subr.bf16.mxu0 %v2055_v53 }
 0x4e6   : > { %5309 = vmatpush3.bf16.msra.mxu0 %v2055_v53 }
 0x4e7   : > { %5310 = vmatprep.subr.bf16.mxu0 %v2057_v6 }
 0x4ea   : > { %5311 = vmatpush3.bf16.msra.mxu0 %v2057_v6 }
 0x547   : > { %v5234_v31 = vpop.f32.mrb[16].mxu1 }
 0x548   : > { %v1419_v50 = vpop.f32.mrb[17].mxu1 }
 0x549   : > { %v5235_v46 = vpop.f32.mrb[18].mxu1 }
 0x54a   : > { %v1528_v34 = vpack.c.bf16 %v5235_v46, %v5234_v31  ;;  %v1422_v40 = vpop.f32.mrb[19].mxu1 }
 0x54b   : > { %v1527_v3 = vpack.c.bf16 %v1422_v40, %v1419_v50 }
 0x54c   : > { %1536 = vst.msk [vmem:[#allocation2 + $0x8] sm:$0xff] %vm1009_vm0, %v1528_v34 }
 0x54d   : > { %1535 = vst.msk [vmem:[#allocation2] sm:$0xff] %vm1009_vm0, %v1527_v3 }
 0x54f   : > { %v5238_v47 = vpop.f32.mrb[20].mxu1 }
 0x550   : > { %v1435_v20 = vpop.f32.mrb[21].mxu1 }
 0x551   : > { %v5239_v30 = vpop.f32.mrb[22].mxu1 }
 0x552   : > { %v1530_v15 = vpack.c.bf16 %v5239_v30, %v5238_v47  ;;  %v1438_v52 = vpop.f32.mrb[23].mxu1 }
 0x553   : > { %v1529_v61 = vpack.c.bf16 %v1438_v52, %v1435_v20 }
 0x554   : > { %1538 = vst.msk [vmem:[#allocation2 + $0x18] sm:$0xff] %vm1009_vm0, %v1530_v15 }
 0x555   : > { %1537 = vst.msk [vmem:[#allocation2 + $0x10] sm:$0xff] %vm1009_vm0, %v1529_v61 }
 0x567   : > { %v7297_v8 = vpop.f32.mrb[24].mxu1 }
 0x568   : > { %v7299_v44 = vpop.f32.mrb[25].mxu1  ;;  %v1775_v62 = vsel %vm1188_vm1, %v7297_v8, -inf }
 0x569   : > { %v7303_v28 = vpop.f32.mrb[26].mxu1  ;;  %1776 = vmax.xlane.f32.xlu0 %v1775_v62  ;;  %v1769_v51 = vsel %vm1188_vm1, %v7299_v44, -inf }
 0x56a   : > { %v7305_v48 = vpop.f32.mrb[27].mxu1  ;;  %v1778_v25 = vsel %vm1188_vm1, %v7303_v28, -inf }
 0x56b   : > { %v1772_v16 = vsel %vm1188_vm1, %v7305_v48, -inf }
 0x56c   : > { %1773 = vmax.xlane.f32.xlu1 %v1772_v16 }
 0x56d   : > { %1770 = vmax.xlane.f32.xlu0 %v1769_v51  ;;  %v5250_v24 = vpop.f32.mrb[32].mxu0 }
 0x56e   : > { %v1496_v29 = vpop.f32.mrb[33].mxu0 }
 0x56f   : > { %v5251_v1 = vpop.f32.mrb[34].mxu0 }
 0x570   : > { %v1532_v27 = vpack.c.bf16 %v5251_v1, %v5250_v24  ;;  %v1499_v21 = vpop.f32.mrb[35].mxu0 }
 0x571   : > { %1779 = vmax.xlane.f32.xlu0 %v1778_v25  ;;  %v1531_v26 = vpack.c.bf16 %v1499_v21, %v1496_v29 }
 0x572   : > { %1540 = vst.msk [vmem:[#allocation2 + $0x28] sm:$0xff] %vm1009_vm0, %v1532_v27 }
 0x573   : > { %1539 = vst.msk [vmem:[#allocation2 + $0x20] sm:$0xff] %vm1009_vm0, %v1531_v26 }
 0x598   : > { %v7315_v22 = vpop.f32.mrb[28].mxu1 }
 0x599   : > { %v7317_v0 = vpop.f32.mrb[29].mxu1  ;;  %v1787_v49 = vsel %vm1188_vm1, %v7315_v22, -inf }
 0x59a   : > { %v7321_v19 = vpop.f32.mrb[30].mxu1  ;;  %1788 = vmax.xlane.f32.xlu0 %v1787_v49  ;;  %v1781_v59 = vsel %vm1188_vm1, %v7317_v0, -inf }
 0x59b   : > { %v7323_v11 = vpop.f32.mrb[31].mxu1  ;;  %v1790_v9 = vsel %vm1188_vm1, %v7321_v19, -inf }
 0x59c   : > { %1791 = vmax.xlane.f32.xlu1 %v1790_v9  ;;  %v1784_v53 = vsel %vm1188_vm1, %v7323_v11, -inf }
 0x59e   : > { %1782 = vmax.xlane.f32.xlu0 %v1781_v59 }
 0x5a0   : > { %1785 = vmax.xlane.f32.xlu1 %v1784_v53 }
 0x5a8   : > { %v5254_v6 = vpop.f32.mrb[36].mxu0 }
 0x5a9   : > { %v1512_v31 = vpop.f32.mrb[37].mxu0 }
 0x5aa   : > { %v5255_v50 = vpop.f32.mrb[38].mxu0 }
 0x5ab   : > { %v1534_v46 = vpack.c.bf16 %v5255_v50, %v5254_v6  ;;  %v1515_v34 = vpop.f32.mrb[39].mxu0 }
 0x5ac   : > { %v1533_v40 = vpack.c.bf16 %v1515_v34, %v1512_v31  ;;  %v7383_v34 = vpop.permute.xlu1 %2202 }
 0x5ad   : > { %1542 = vst.msk [vmem:[#allocation2 + $0x38] sm:$0xff] %vm1009_vm0, %v1534_v46 }
 0x5ae   : > { %1541 = vst.msk [vmem:[#allocation2 + $0x30] sm:$0xff] %vm1009_vm0, %v1533_v40 }
 0x5b0   : > { %v7333_v3 = vpop.f32.mrb[40].mxu0 }
 0x5b1   : > { %v7335_v47 = vpop.f32.mrb[41].mxu0  ;;  %v1799_v20 = vsel %vm1188_vm1, %v7333_v3, -inf }
 0x5b2   : > { %1800 = vmax.xlane.f32.xlu0 %v1799_v20  ;;  %v7339_v30 = vpop.f32.mrb[42].mxu0  ;;  %v1793_v61 = vsel %vm1188_vm1, %v7335_v47, -inf }
 0x5b3   : > { %v7341_v15 = vpop.f32.mrb[43].mxu0  ;;  %v1802_v52 = vsel %vm1188_vm1, %v7339_v30, -inf }
 0x5b4   : > { %1803 = vmax.xlane.f32.xlu1 %v1802_v52  ;;  %v1796_v62 = vsel %vm1188_vm1, %v7341_v15, -inf }
 0x5b6   : > { %1794 = vmax.xlane.f32.xlu0 %v1793_v61 }
 0x5b8   : > { %1797 = vmax.xlane.f32.xlu1 %v1796_v62  ;;  %v7349_v16 = vpop.f32.mrb[44].mxu0 }
 0x5b9   : > { %v7351_v51 = vpop.f32.mrb[45].mxu0  ;;  %v1811_v24 = vsel %vm1188_vm1, %v7349_v16, -inf }
 0x5ba   : > { %1812 = vmax.xlane.f32.xlu0 %v1811_v24  ;;  %v7355_v29 = vpop.f32.mrb[46].mxu0  ;;  %v1805_v27 = vsel %vm1188_vm1, %v7351_v51, -inf }
 0x5bb   : > { %v7357_v1 = vpop.f32.mrb[47].mxu0  ;;  %v1814_v25 = vsel %vm1188_vm1, %v7355_v29, -inf }
 0x5bc   : > { %v1808_v21 = vsel %vm1188_vm1, %v7357_v1, -inf }
 0x5be   : > { %1806 = vmax.xlane.f32.xlu0 %v1805_v27 }
 0x5c9   : > { %2190 = vrot.lane.b32.xlu1 %v6908_v13, %s6312_s23 }
 0x5cd   : > { %2301 = vrot.lane.b32.xlu1 %v6952_v5, %s6312_s23 }
 0x5d4   : > { %2188 = vrot.lane.b32.xlu0 %v6890_v35, %s6312_s23 }
 0x5f1   : > { %1815 = vmax.xlane.f32.xlu1 %v1814_v25 }
 0x5f5   : > { %1809 = vmax.xlane.f32.xlu1 %v1808_v21 }
 0x5f6   : > { %v1777_v26 = vpop.xlane.xlu0 %1776 }
 0x5f7   : > { %v1819_v49 = vsub.f32 %v7297_v8, %v1777_v26 }
 0x5f9   : > { %v1837_v9 = vmul.f32 1.442695, %v1819_v49  ;;  %v1774_v20 = vpop.xlane.xlu1 %1773 }
 0x5fa   : > { %v1771_v59 = vpop.xlane.xlu0 %1770  ;;  %v1818_v52 = vsub.f32 %v7305_v48, %v1774_v20 }
 0x5fb   : > { %5771 = vpow2.f32 %v1837_v9  ;;  %v1817_v53 = vsub.f32 %v7299_v44, %v1771_v59 }
 0x5fc   : > { %v1835_v62 = vmul.f32 1.442695, %v1818_v52 }
 0x5fd   : > { %v1833_v6 = vmul.f32 1.442695, %v1817_v53 }
 0x5fe   : > { %v1780_v44 = vpop.xlane.xlu0 %1779 }
 0x5ff   : > { %5773 = vpow2.f32 %v1833_v6  ;;  %v1820_v40 = vsub.f32 %v7303_v28, %v1780_v44 }
 0x601   : > { %v1839_v61 = vmul.f32 1.442695, %v1820_v40 }
 0x603   : > { %5775 = vpow2.f32 %v1839_v61 }
 0x604   : > { %5777 = vpow2.f32 %v1835_v62 }
 0x605   : > { %v7373_v31 = vpop.eup %5771 }
 0x606   : > { %v1871_v50 = vsel %vm1188_vm1, %v7373_v31, 0.0  ;;  %2303 = vrot.lane.b32.xlu1 %v6972_v58, %s6312_s23 }
 0x607   : > { %1872 = vadd.xlane.f32.xlu0 %v1871_v50 }
 0x609   : > { %v7379_v46 = vpop.eup %5773 }
 0x60a   : > { %v1865_v8 = vsel %vm1188_vm1, %v7379_v46, 0.0 }
 0x60b   : > { %1866 = vadd.xlane.f32.xlu0 %v1865_v8 }
 0x60d   : > { %v7387_v24 = vpop.eup %5775 }
 0x60e   : > { %v1874_v26 = vsel %vm1188_vm1, %v7387_v24, 0.0  ;;  %v7392_v49 = vpop.eup %5777 }
 0x60f   : > { %v1868_v50 = vsel %vm1188_vm1, %v7392_v49, 0.0 }
 0x627   : > { %v1789_v27 = vpop.xlane.xlu0 %1788 }
 0x628   : > { %v1823_v25 = vsub.f32 %v7315_v22, %v1789_v27 }
 0x629   : > { %v1792_v21 = vpop.xlane.xlu1 %1791 }
 0x62a   : > { %v1845_v9 = vmul.f32 1.442695, %v1823_v25  ;;  %v1824_v28 = vsub.f32 %v7321_v19, %v1792_v21  ;;  %1875 = vadd.xlane.f32.xlu1 %v1874_v26 }
 0x62b   : > { %v1783_v48 = vpop.xlane.xlu0 %1782 }
 0x62c   : > { %5779 = vpow2.f32 %v1845_v9  ;;  %v1821_v59 = vsub.f32 %v7317_v0, %v1783_v48  ;;  %v1847_v53 = vmul.f32 1.442695, %v1824_v28 }
 0x62d   : > { %v1786_v6 = vpop.xlane.xlu1 %1785 }
 0x62e   : > { %v1841_v22 = vmul.f32 1.442695, %v1821_v59  ;;  %v1822_v8 = vsub.f32 %v7323_v11, %v1786_v6  ;;  %1869 = vadd.xlane.f32.xlu1 %v1868_v50 }
 0x630   : > { %5781 = vpow2.f32 %v1841_v22  ;;  %v1843_v44 = vmul.f32 1.442695, %v1822_v8 }
 0x631   : > { %5783 = vpow2.f32 %v1847_v53 }
 0x632   : > { %5785 = vpow2.f32 %v1843_v44 }
 0x636   : > { %v7399_v40 = vpop.eup %5779 }
 0x637   : > { %v1883_v19 = vsel %vm1188_vm1, %v7399_v40, 0.0 }
 0x638   : > { %1884 = vadd.xlane.f32.xlu0 %v1883_v19 }
 0x63a   : > { %v7403_v0 = vpop.eup %5781 }
 0x63b   : > { %v7405_v20 = vpop.eup %5783  ;;  %v1877_v52 = vsel %vm1188_vm1, %v7403_v0, 0.0 }
 0x63c   : > { %v7409_v61 = vpop.eup %5785  ;;  %1878 = vadd.xlane.f32.xlu0 %v1877_v52  ;;  %v1886_v27 = vsel %vm1188_vm1, %v7405_v20, 0.0 }
 0x63d   : > { %v1880_v11 = vsel %vm1188_vm1, %v7409_v61, 0.0 }
 0x63e   : > { %1881 = vadd.xlane.f32.xlu1 %v1880_v11 }
 0x63f   : > { %v1801_v62 = vpop.xlane.xlu0 %1800 }
 0x640   : > { %v1827_v25 = vsub.f32 %v7333_v3, %v1801_v62  ;;  %1887 = vadd.xlane.f32.xlu0 %v1886_v27 }
 0x641   : > { %v1804_v21 = vpop.xlane.xlu1 %1803 }
 0x642   : > { %v1853_v26 = vmul.f32 1.442695, %v1827_v25  ;;  %v1828_v9 = vsub.f32 %v7339_v30, %v1804_v21 }
 0x643   : > { %v1795_v28 = vpop.xlane.xlu0 %1794 }
 0x644   : > { %5787 = vpow2.f32 %v1853_v26  ;;  %v1825_v48 = vsub.f32 %v7335_v47, %v1795_v28  ;;  %v1855_v53 = vmul.f32 1.442695, %v1828_v9 }
 0x645   : > { %v1798_v59 = vpop.xlane.xlu1 %1797 }
 0x646   : > { %v1849_v6 = vmul.f32 1.442695, %v1825_v48  ;;  %v1826_v50 = vsub.f32 %v7341_v15, %v1798_v59 }
 0x647   : > { %v1813_v62 = vpop.xlane.xlu0 %1812 }
 0x648   : > { %5789 = vpow2.f32 %v1849_v6  ;;  %v1851_v8 = vmul.f32 1.442695, %v1826_v50  ;;  %v1831_v25 = vsub.f32 %v7349_v16, %v1813_v62 }
 0x649   : > { %v7419_v22 = vpop.permute.xlu1 %2190  ;;  %5791 = vpow2.f32 %v1855_v53 }
 0x64a   : > { %5793 = vpow2.f32 %v1851_v8  ;;  %v1861_v26 = vmul.f32 1.442695, %v1831_v25 }
 0x64b   : > { %v1807_v21 = vpop.xlane.xlu0 %1806 }
 0x64c   : > { %v1829_v9 = vsub.f32 %v7351_v51, %v1807_v21  ;;  %5795 = vpow2.f32 %v1861_v26 }
 0x64d   : > { %v7421_v3 = vpop.permute.xlu1 %2301 }
 0x64e   : > { %v7423_v44 = vpop.eup %5787  ;;  %5516 = vmatprep.subr.msk.bf16.mxu0 %vm1009_vm0, %v7421_v3  ;;  %v1857_v28 = vmul.f32 1.442695, %v1829_v9 }
 0x64f   : > { %v1895_v47 = vsel %vm1188_vm1, %v7423_v44, 0.0 }
 0x650   : > { %1896 = vadd.xlane.f32.xlu1 %v1895_v47  ;;  %5797 = vpow2.f32 %v1857_v28 }
 0x652   : > { %v7429_v30 = vpop.eup %5789 }
 0x653   : > { %v1889_v15 = vsel %vm1188_vm1, %v7429_v30, 0.0  ;;  %v7433_v19 = vpop.eup %5791 }
 0x654   : > { %1890 = vadd.xlane.f32.xlu1 %v1889_v15  ;;  %v1898_v52 = vsel %vm1188_vm1, %v7433_v19, 0.0  ;;  %v7439_v11 = vpop.eup %5793 }
 0x655   : > { %v1892_v27 = vsel %vm1188_vm1, %v7439_v11, 0.0 }
 0x656   : > { %2305 = vrot.lane.b32.xlu0 %v6992_v14, %s6312_s23  ;;  %v7447_v48 = vpop.eup %5795 }
 0x657   : > { %v1907_v59 = vsel %vm1188_vm1, %v7447_v48, 0.0 }
 0x658   : > { %1899 = vadd.xlane.f32.xlu1 %v1898_v52 }
 0x65a   : > { %v7451_v53 = vpop.eup %5797 }
 0x65b   : > { %v1901_v16 = vsel %vm1188_vm1, %v7451_v53, 0.0 }
 0x65c   : > { %1893 = vadd.xlane.f32.xlu1 %v1892_v27 }
 0x66d   : > { %2192 = vrot.lane.b32.xlu1 %v6924_v12, %s6312_s23 }
 0x675   : > { %1908 = vadd.xlane.f32.xlu0 %v1907_v59 }
 0x679   : > { %1902 = vadd.xlane.f32.xlu0 %v1901_v16 }
 0x67e   : > { %v1816_v6 = vpop.xlane.xlu1 %1815 }
 0x67f   : > { %v1832_v51 = vsub.f32 %v7355_v29, %v1816_v6  ;;  %v7475_v29 = vpop.permute.xlu0 %2188 }
 0x681   : > { %v1863_v50 = vmul.f32 1.442695, %v1832_v51 }
 0x682   : > { %v1810_v8 = vpop.xlane.xlu1 %1809 }
 0x683   : > { %5799 = vpow2.f32 %v1863_v50  ;;  %v1830_v47 = vsub.f32 %v7357_v1, %v1810_v8 }
 0x685   : > { %v1859_v15 = vmul.f32 1.442695, %v1830_v47 }
 0x686   : > { %v7483_v21 = vpop.permute.xlu1 %2303 }
 0x687   : > { %5801 = vpow2.f32 %v1859_v15 }
 0x68d   : > { %v7457_v52 = vpop.eup %5799 }
 0x68e   : > { %v1910_v62 = vsel %vm1188_vm1, %v7457_v52, 0.0 }
 0x68f   : > { %1911 = vadd.xlane.f32.xlu0 %v1910_v62 }
 0x691   : > { %v7461_v27 = vpop.eup %5801 }
 0x692   : > { %v1904_v25 = vsel %vm1188_vm1, %v7461_v27, 0.0 }
 0x693   : > { %1905 = vadd.xlane.f32.xlu1 %v1904_v25 }
 0x694   : > { %v1873_v1 = vpop.xlane.xlu0 %1872 }
 0x698   : > { %v1867_v26 = vpop.xlane.xlu0 %1866 }
 0x6a4   : > { %2307 = vrot.lane.b32.xlu1 %v7008_v33, %s6312_s23 }
 0x6a5   : > { %2194 = vrot.lane.b32.xlu0 %v6940_v38, %s6312_s23 }
 0x6a8   : > { %2295 = vrot.lane.b32.xlu1 %v6976_v60, %s6312_s23 }
 0x6a9   : > { %2293 = vrot.lane.b32.xlu0 %v6956_v43, %s6312_s23 }
 0x6ac   : > { %2299 = vrot.lane.b32.xlu1 %v7012_v36, %s6312_s23 }
 0x6ad   : > { %2297 = vrot.lane.b32.xlu0 %v6996_v17, %s6312_s23 }
 0x6b0   : > { %2584 = vrot.lane.b32.xlu1 %v6906_v32, %s6312_s23 }
 0x6b1   : > { %2582 = vrot.lane.b32.xlu0 %v6888_v39, %s6312_s23 }
 0x6b4   : > { %2586 = vrot.lane.b32.xlu1 %v6922_v10, %s6312_s23 }
 0x6b5   : > { %2817 = vrot.lane.b32.xlu0 %v6886_v2, %s6313_s27 }
 0x6b7   : > { %v1876_v9 = vpop.xlane.xlu1 %1875 }
 0x6b8   : > { %2588 = vrot.lane.b32.xlu1 %v6938_v45, %s6312_s23  ;;  %5803 = vrcp.f32 %v1876_v9 }
 0x6b9   : > { %2671 = vrot.lane.b32.xlu0 %v6954_v4, %s6312_s23  ;;  %5805 = vrcp.f32 %v1867_v26 }
 0x6ba   : > { %5807 = vrcp.f32 %v1873_v1 }
 0x6bb   : > { %v1870_v28 = vpop.xlane.xlu1 %1869 }
 0x6bc   : > { %5809 = vrcp.f32 %v1870_v28  ;;  %2819 = vrot.lane.b32.xlu1 %v6904_v55, %s6313_s27 }
 0x6bd   : > { %2673 = vrot.lane.b32.xlu0 %v6974_v56, %s6312_s23 }
 0x6c0   : > { %2675 = vrot.lane.b32.xlu1 %v6994_v41, %s6312_s23 }
 0x6c1   : > { %2821 = vrot.lane.b32.xlu0 %v6920_v7, %s6313_s27 }
 0x6c2   : > { %v5804_v2 = vpop.eup %5803 }
 0x6c3   : > { %v5806_v59 = vpop.eup %5805  ;;  %v1932_v51 = vmul.f32 %v5804_v2, %v7387_v24  ;;  %v2217_v24 = vsel %vm1009_vm0, %v7279_v37, 0 }
 0x6c4   : > { %2823 = vrot.lane.b32.xlu1 %v6936_v23, %s6313_s27  ;;  %v5808_v16 = vpop.eup %5807  ;;  %v1929_v50 = vmul.f32 %v5806_v59, %v7379_v46 }
 0x6c5   : > { %v1885_v6 = vpop.xlane.xlu0 %1884  ;;  %2677 = vrot.lane.b32.xlu0 %v7010_v63, %s6312_s23  ;;  %v1931_v47 = vmul.f32 %v5808_v16, %v7373_v31 }
 0x6c6   : > { %v5810_v55 = vpop.eup %5809 }
 0x6c7   : > { %v1930_v8 = vmul.f32 %v5810_v55, %v7392_v49  ;;  %v1946_v62 = vpack.c.bf16 %v1932_v51, %v1931_v47  ;;  %v2220_v49 = vsel %vm1009_vm0, %v7290_v57, 0 }
 0x6c9   : > { %v1879_v7 = vpop.xlane.xlu0 %1878  ;;  %v1945_v15 = vpack.c.bf16 %v1930_v8, %v1929_v50 }
 0x6ca   : > { %5811 = vrcp.f32 %v1879_v7 }
 0x6cb   : > { %5813 = vrcp.f32 %v1885_v6  ;;  %5296 = vmatprep.mubr.msk.bf16.mxu1 %vm1188_vm1, %v1945_v15  ;;  %v1882_v23 = vpop.xlane.xlu1 %1881 }
 0x6cc   : > { %5815 = vrcp.f32 %v1882_v23  ;;  %5297 = vmatmul.mubr.msk.bf16.vlgmr.msra.gmra.mrb[32].mxu1 %vm1188_vm1, %v1946_v62 }
 0x6cd   : > { %5321 = vmatpush3.bf16.xpose.msra.mxu1 %v2217_v24  ;;  %v1888_v46 = vpop.xlane.xlu0 %1887 }
 0x6ce   : > { %5817 = vrcp.f32 %v1888_v46  ;;  %5513 = vmatprep.subr.msk.bf16.mxu1 %vm1009_vm0, %v7290_v57  ;;  %v2223_v57 = vsel %vm1009_vm0, %v7288_v54, 0 }
 0x6d4   : > { %v5812_v31 = vpop.eup %5811 }
 0x6d5   : > { %v5814_v25 = vpop.eup %5813  ;;  %5323 = vmatpush3.bf16.xpose.msra.mxu1 %v2220_v49  ;;  %v1933_v26 = vmul.f32 %v5812_v31, %v7403_v0 }
 0x6d6   : > { %v5816_v1 = vpop.eup %5815  ;;  %5514 = vmatprep.subr.msk.bf16.mxu1 %vm1009_vm0, %v7288_v54  ;;  %v1935_v2 = vmul.f32 %v5814_v25, %v7399_v40  ;;  %v2226_v40 = vsel %vm1009_vm0, %v7383_v34, 0 }
 0x6d7   : > { %v1934_v37 = vmul.f32 %v5816_v1, %v7409_v61 }
 0x6d8   : > { %v5818_v9 = vpop.eup %5817 }
 0x6d9   : > { %v1947_v28 = vpack.c.bf16 %v1934_v37, %v1933_v26  ;;  %v1936_v59 = vmul.f32 %v5818_v9, %v7405_v20 }
 0x6db   : > { %5300 = vmatprep.mubr.msk.bf16.mxu1 %vm1188_vm1, %v1947_v28  ;;  %v1948_v16 = vpack.c.bf16 %v1936_v59, %v1935_v2 }
 0x6dd   : > { %5325 = vmatpush3.bf16.xpose.msra.mxu1 %v2223_v57  ;;  %v1897_v6 = vpop.xlane.xlu1 %1896 }
 0x6de   : > { %5301 = vmatmul.mubr.msk.bf16.gmra.mrb[36].mxu1 %vm1188_vm1, %v1948_v16  ;;  %5515 = vmatprep.subr.msk.bf16.mxu1 %vm1009_vm0, %v7383_v34 }
 0x6df   : > { %5328 = vmatprep.mubr.msk.bf16.mxu1 %vm1009_vm0, %v7475_v29 }
 0x6e1   : > { %v1891_v0 = vpop.xlane.xlu1 %1890 }
 0x6e5   : > { %5327 = vmatpush3.bf16.xpose.msra.mxu1 %v2226_v40  ;;  %v1900_v20 = vpop.xlane.xlu1 %1899 }
 0x6e6   : > { %5819 = vrcp.f32 %v1900_v20 }
 0x6e7   : > { %5821 = vrcp.f32 %v1891_v0 }
 0x6e8   : > { %5823 = vrcp.f32 %v1897_v6 }
 0x6e9   : > { %v1894_v54 = vpop.xlane.xlu1 %1893 }
 0x6ea   : > { %5825 = vrcp.f32 %v1894_v54 }
 0x6ec   : > { %5329 = vmatmul.mubr.msk.bf16.vlgmr.msra.gmra.mrb[40].mxu1 %vm1009_vm0, %v7419_v22  ;;  %v2322_v22 = vsel %vm1009_vm0, %v7421_v3, 0 }
 0x6ed   : > { %v2193_v61 = vpop.permute.xlu1 %2192 }
 0x6ee   : > { %5332 = vmatprep.mubr.msk.bf16.mxu1 %vm1009_vm0, %v2193_v61 }
 0x6f0   : > { %v5820_v55 = vpop.eup %5819 }
 0x6f1   : > { %v5822_v51 = vpop.eup %5821  ;;  %v1940_v8 = vmul.f32 %v5820_v55, %v7433_v19  ;;  %v2306_v19 = vpop.permute.xlu0 %2305 }
 0x6f2   : > { %v5824_v29 = vpop.eup %5823  ;;  %v1937_v34 = vmul.f32 %v5822_v51, %v7429_v30  ;;  %v2325_v30 = vsel %vm1009_vm0, %v7483_v21, 0 }
 0x6f3   : > { %v1939_v7 = vmul.f32 %v5824_v29, %v7423_v44  ;;  %v2328_v44 = vsel %vm1009_vm0, %v2306_v19, 0 }
 0x6f4   : > { %v5826_v50 = vpop.eup %5825 }
 0x6f5   : > { %v1938_v47 = vmul.f32 %v5826_v50, %v7439_v11  ;;  %v1950_v62 = vpack.c.bf16 %v1940_v8, %v1939_v7 }
 0x6f7   : > { %v1949_v15 = vpack.c.bf16 %v1938_v47, %v1937_v34 }
 0x6f9   : > { %5312 = vmatprep.mubr.msk.bf16.mxu0 %vm1188_vm1, %v1949_v15 }
 0x6fa   : > { %5313 = vmatmul.mubr.msk.bf16.vlgmr.msra.gmra.mrb[48].mxu0 %vm1188_vm1, %v1950_v62 }
 0x6fb   : > { %5337 = vmatpush3.bf16.xpose.msra.mxu0 %v2322_v22 }
 0x6fc   : > { %5517 = vmatprep.subr.msk.bf16.mxu0 %vm1009_vm0, %v7483_v21 }
 0x702   : > { %v1909_v11 = vpop.xlane.xlu0 %1908 }
 0x703   : > { %5339 = vmatpush3.bf16.xpose.msra.mxu0 %v2325_v30 }
 0x704   : > { %5518 = vmatprep.subr.msk.bf16.mxu0 %vm1009_vm0, %v2306_v19 }
 0x706   : > { %v1903_v23 = vpop.xlane.xlu0 %1902 }
 0x70b   : > { %5341 = vmatpush3.bf16.xpose.msra.mxu0 %v2328_v44 }
 0x71c   : > { %v1912_v24 = vpop.xlane.xlu0 %1911 }
 0x71d   : > { %5827 = vrcp.f32 %v1912_v24 }
 0x71e   : > { %5829 = vrcp.f32 %v1903_v23 }
 0x71f   : > { %5831 = vrcp.f32 %v1909_v11 }
 0x720   : > { %v2195_v3 = vpop.permute.xlu0 %2194  ;;  %v1906_v46 = vpop.xlane.xlu1 %1905 }
 0x721   : > { %5833 = vrcp.f32 %v1906_v46  ;;  %5333 = vmatmul.mubr.msk.bf16.gmra.mrb[44].mxu1 %vm1009_vm0, %v2195_v3 }
 0x724   : > { %v2294_v31 = vpop.permute.xlu0 %2293  ;;  %v2308_v21 = vpop.permute.xlu1 %2307 }
 0x725   : > { %5519 = vmatprep.subr.msk.bf16.mxu0 %vm1009_vm0, %v2308_v21  ;;  %v2331_v49 = vsel %vm1009_vm0, %v2308_v21, 0 }
 0x726   : > { %5343 = vmatpush3.bf16.xpose.msra.mxu0 %v2331_v49 }
 0x727   : > { %v5828_v25 = vpop.eup %5827 }
 0x728   : > { %v2298_v1 = vpop.permute.xlu0 %2297  ;;  %v2296_v26 = vpop.permute.xlu1 %2295  ;;  %v1944_v2 = vmul.f32 %v5828_v25, %v7457_v52 }
 0x729   : > { %v5830_v37 = vpop.eup %5829 }
 0x72a   : > { %v5832_v9 = vpop.eup %5831  ;;  %v1941_v57 = vmul.f32 %v5830_v37, %v7451_v53 }
 0x72b   : > { %v5834_v28 = vpop.eup %5833  ;;  %v1943_v0 = vmul.f32 %v5832_v9, %v7447_v48 }
 0x72c   : > { %v2583_v59 = vpop.permute.xlu0 %2582  ;;  %v2300_v16 = vpop.permute.xlu1 %2299  ;;  %v1942_v6 = vmul.f32 %v5834_v28, %v7461_v27 }
 0x72d   : > { %5352 = vmatprep.subr.bf16.mxu1 %v2583_v59  ;;  %v1952_v20 = vpack.c.bf16 %v1944_v2, %v1943_v0 }
 0x72e   : > { %5353 = vmatpush3.bf16.msra.mxu1 %v2583_v59  ;;  %v1951_v40 = vpack.c.bf16 %v1942_v6, %v1941_v57 }
 0x730   : > { %v7557_v54 = vpop.permute.xlu0 %2817  ;;  %5316 = vmatprep.mubr.msk.bf16.mxu0 %vm1188_vm1, %v1951_v40  ;;  %v2585_v61 = vpop.permute.xlu1 %2584 }
 0x731   : > { %5317 = vmatmul.mubr.msk.bf16.gmra.mrb[52].mxu0 %vm1188_vm1, %v1952_v20  ;;  %5354 = vmatprep.subr.bf16.mxu1 %v2585_v61 }
 0x732   : > { %5344 = vmatprep.mubr.msk.bf16.mxu0 %vm1009_vm0, %v2294_v31  ;;  %5355 = vmatpush3.bf16.msra.mxu1 %v2585_v61 }
 0x734   : > { %v2672_v53 = vpop.permute.xlu0 %2671  ;;  %v2587_v52 = vpop.permute.xlu1 %2586 }
 0x735   : > { %5356 = vmatprep.subr.bf16.mxu1 %v2587_v52  ;;  %5368 = vmatprep.subr.bf16.mxu0 %v2672_v53 }
 0x736   : > { %5357 = vmatpush3.bf16.msra.mxu1 %v2587_v52 }
 0x738   : > { %v2674_v48 = vpop.permute.xlu0 %2673  ;;  %v2589_v27 = vpop.permute.xlu1 %2588 }
 0x739   : > { %5345 = vmatmul.mubr.msk.bf16.vlgmr.msra.gmra.mrb[56].mxu0 %vm1009_vm0, %v2296_v26  ;;  %5358 = vmatprep.subr.bf16.mxu1 %v2589_v27 }
 0x73a   : > { %5369 = vmatpush3.bf16.msra.mxu0 %v2672_v53  ;;  %5348 = vmatprep.mubr.msk.bf16.mxu0 %vm1009_vm0, %v2298_v1 }
 0x73b   : > { %5359 = vmatpush3.bf16.msra.mxu1 %v2589_v27  ;;  %5370 = vmatprep.subr.bf16.mxu0 %v2674_v48 }
 0x73c   : > { %5520 = vmatprep.subr.msk.bf16.mxu1 %vm1009_vm0, %v7557_v54  ;;  %v7566_v55 = vpop.permute.xlu0 %2821  ;;  %v7568_v51 = vpop.permute.xlu1 %2819 }
 0x73e   : > { %5371 = vmatpush3.bf16.msra.mxu0 %v2674_v48 }
 0x740   : > { %v2676_v29 = vpop.permute.xlu1 %2675  ;;  %v2678_v50 = vpop.permute.xlu0 %2677 }
 0x741   : > { %5349 = vmatmul.mubr.msk.bf16.gmra.mrb[60].mxu0 %vm1009_vm0, %v2300_v16  ;;  %5372 = vmatprep.subr.bf16.mxu0 %v2676_v29 }
 0x742   : > { %5373 = vmatpush3.bf16.msra.mxu0 %v2676_v29 }
 0x743   : > { %5374 = vmatprep.subr.bf16.mxu0 %v2678_v50 }
 0x746   : > { %5375 = vmatpush3.bf16.msra.mxu0 %v2678_v50 }
 0x79f   : > { %v7571_v8 = vpop.f32.mrb[32].mxu1 }
 0x7a0   : > { %v7573_v34 = vpop.f32.mrb[33].mxu1 }
 0x7a1   : > { %v7575_v47 = vpop.f32.mrb[34].mxu1 }
 0x7a2   : > { %v7579_v15 = vpop.f32.mrb[35].mxu1 }
 0x7b1   : > { %v7583_v22 = vpop.f32.mrb[36].mxu1 }
 0x7b2   : > { %v7585_v30 = vpop.f32.mrb[37].mxu1 }
 0x7b3   : > { %v7587_v19 = vpop.f32.mrb[38].mxu1 }
 0x7b4   : > { %v7591_v11 = vpop.f32.mrb[39].mxu1 }
 0x7bf   : > { %v7595_v24 = vpop.f32.mrb[40].mxu1 }
 0x7c0   : > { %v7597_v3 = vpop.f32.mrb[41].mxu1  ;;  %v2404_v46 = vsel %vm1188_vm1, %v7595_v24, -inf }
 0x7c1   : > { %2405 = vmax.xlane.f32.xlu0 %v2404_v46  ;;  %v7601_v31 = vpop.f32.mrb[42].mxu1  ;;  %v2398_v25 = vsel %vm1188_vm1, %v7597_v3, -inf }
 0x7c2   : > { %v7603_v21 = vpop.f32.mrb[43].mxu1  ;;  %v2407_v1 = vsel %vm1188_vm1, %v7601_v31, -inf }
 0x7c3   : > { %v2401_v49 = vsel %vm1188_vm1, %v7603_v21, -inf }
 0x7c4   : > { %2402 = vmax.xlane.f32.xlu1 %v2401_v49 }
 0x7c5   : > { %2399 = vmax.xlane.f32.xlu0 %v2398_v25 }
 0x7c9   : > { %2408 = vmax.xlane.f32.xlu0 %v2407_v1 }
 0x7cd   : > { %v7611_v26 = vpop.f32.mrb[48].mxu0 }
 0x7ce   : > { %v7613_v37 = vpop.f32.mrb[49].mxu0 }
 0x7cf   : > { %v7615_v9 = vpop.f32.mrb[50].mxu0 }
 0x7d0   : > { %v7619_v2 = vpop.f32.mrb[51].mxu0 }
 0x7f4   : > { %v7623_v16 = vpop.f32.mrb[44].mxu1 }
 0x7f5   : > { %v7625_v57 = vpop.f32.mrb[45].mxu1  ;;  %v2416_v6 = vsel %vm1188_vm1, %v7623_v16, -inf }
 0x7f6   : > { %2417 = vmax.xlane.f32.xlu0 %v2416_v6  ;;  %v7629_v0 = vpop.f32.mrb[46].mxu1  ;;  %v2410_v61 = vsel %vm1188_vm1, %v7625_v57, -inf }
 0x7f7   : > { %v7631_v40 = vpop.f32.mrb[47].mxu1  ;;  %v2419_v20 = vsel %vm1188_vm1, %v7629_v0, -inf }
 0x7f8   : > { %2420 = vmax.xlane.f32.xlu1 %v2419_v20  ;;  %v2413_v53 = vsel %vm1188_vm1, %v7631_v40, -inf }
 0x7fa   : > { %2411 = vmax.xlane.f32.xlu0 %v2410_v61 }
 0x7fc   : > { %2414 = vmax.xlane.f32.xlu1 %v2413_v53 }
 0x804   : > { %v7639_v52 = vpop.f32.mrb[52].mxu0 }
 0x805   : > { %v7641_v48 = vpop.f32.mrb[53].mxu0 }
 0x806   : > { %8819 = vst [vmem:[#allocation23_spill] sm:$0xff] %v7641_v48  ;;  %v7643_v27 = vpop.f32.mrb[54].mxu0 }
 0x807   : > { %v7647_v50 = vpop.f32.mrb[55].mxu0 }
 0x80c   : > { %v7651_v49 = vpop.f32.mrb[56].mxu0 }
 0x80d   : > { %2811 = vrot.lane.b32.xlu1 %v6908_v13, %s6313_s27  ;;  %v7655_v25 = vpop.f32.mrb[57].mxu0  ;;  %v2428_v1 = vsel %vm1188_vm1, %v7651_v49, -inf }
 0x80e   : > { %2429 = vmax.xlane.f32.xlu0 %v2428_v1  ;;  %v7659_v6 = vpop.f32.mrb[58].mxu0  ;;  %v2422_v61 = vsel %vm1188_vm1, %v7655_v25, -inf }
 0x80f   : > { %v7661_v20 = vpop.f32.mrb[59].mxu0  ;;  %v2431_v1 = vsel %vm1188_vm1, %v7659_v6, -inf }
 0x811   : > { %2922 = vrot.lane.b32.xlu1 %v6952_v5, %s6313_s27  ;;  %v2425_v5 = vsel %vm1188_vm1, %v7661_v20, -inf }
 0x812   : > { %2423 = vmax.xlane.f32.xlu0 %v2422_v61 }
 0x814   : > { %v7667_v53 = vpop.f32.mrb[60].mxu0 }
 0x815   : > { %v7669_v13 = vpop.f32.mrb[61].mxu0  ;;  %v2440_v28 = vsel %vm1188_vm1, %v7667_v53, -inf }
 0x816   : > { %v7671_v46 = vpop.f32.mrb[62].mxu0 }
 0x817   : > { %v7673_v29 = vpop.f32.mrb[63].mxu0  ;;  %v2443_v61 = vsel %vm1188_vm1, %v7671_v46, -inf }
 0x818   : > { %v2437_v59 = vsel %vm1188_vm1, %v7673_v29, -inf }
 0x828   : > { %2809 = vrot.lane.b32.xlu0 %v6890_v35, %s6313_s27  ;;  %v2434_v35 = vsel %vm1188_vm1, %v7669_v13, -inf }
 0x835   : > { %2432 = vmax.xlane.f32.xlu1 %v2431_v1 }
 0x839   : > { %2426 = vmax.xlane.f32.xlu1 %v2425_v5 }
 0x83d   : > { %2444 = vmax.xlane.f32.xlu1 %v2443_v61 }
 0x841   : > { %2438 = vmax.xlane.f32.xlu1 %v2437_v59 }
 0x847   : > { %2441 = vmax.xlane.f32.xlu0 %v2440_v28  ;;  %v7695_v28 = vpop.permute.xlu1 %2823 }
 0x84b   : > { %2435 = vmax.xlane.f32.xlu0 %v2434_v35 }
 0x84e   : > { %v2406_v1 = vpop.xlane.xlu0 %2405 }
 0x84f   : > { %v2448_v23 = vsub.f32 %v7595_v24, %v2406_v1 }
 0x851   : > { %v2466_v5 = vmul.f32 1.442695, %v2448_v23  ;;  %v2403_v1 = vpop.xlane.xlu1 %2402 }
 0x852   : > { %v2400_v44 = vpop.xlane.xlu0 %2399  ;;  %2924 = vrot.lane.b32.xlu1 %v6972_v58, %s6313_s27 }
 0x853   : > { %5835 = vpow2.f32 %v2466_v5  ;;  %v2446_v61 = vsub.f32 %v7597_v3, %v2400_v44  ;;  %v2447_v44 = vsub.f32 %v7603_v21, %v2403_v1 }
 0x855   : > { %v2462_v59 = vmul.f32 1.442695, %v2446_v61  ;;  %v2464_v5 = vmul.f32 1.442695, %v2447_v44 }
 0x856   : > { %v2409_v7 = vpop.xlane.xlu0 %2408 }
 0x857   : > { %5837 = vpow2.f32 %v2462_v59  ;;  %v2449_v23 = vsub.f32 %v7601_v31, %v2409_v7 }
 0x859   : > { %v2468_v3 = vmul.f32 1.442695, %v2449_v23 }
 0x85b   : > { %5839 = vpow2.f32 %v2468_v3 }
 0x85c   : > { %5841 = vpow2.f32 %v2464_v5 }
 0x85d   : > { %v7693_v42 = vpop.eup %5835 }
 0x85e   : > { %v2500_v35 = vsel %vm1188_vm1, %v7693_v42, 0.0 }
 0x85f   : > { %2501 = vadd.xlane.f32.xlu0 %v2500_v35 }
 0x861   : > { %v7700_v24 = vpop.eup %5837 }
 0x862   : > { %v2494_v58 = vsel %vm1188_vm1, %v7700_v24, 0.0 }
 0x863   : > { %2495 = vadd.xlane.f32.xlu0 %v2494_v58 }
 0x865   : > { %v7705_v61 = vpop.eup %5839 }
 0x866   : > { %v2503_v59 = vsel %vm1188_vm1, %v7705_v61, 0.0  ;;  %v7709_v35 = vpop.eup %5841 }
 0x867   : > { %v2497_v7 = vsel %vm1188_vm1, %v7709_v35, 0.0 }
 0x876   : > { %2504 = vadd.xlane.f32.xlu1 %v2503_v59 }
 0x87a   : > { %2498 = vadd.xlane.f32.xlu1 %v2497_v7 }
 0x883   : > { %v2418_v31 = vpop.xlane.xlu0 %2417 }
 0x884   : > { %v2452_v58 = vsub.f32 %v7623_v16, %v2418_v31 }
 0x885   : > { %v2421_v21 = vpop.xlane.xlu1 %2420 }
 0x886   : > { %v2474_v23 = vmul.f32 1.442695, %v2452_v58  ;;  %v2453_v1 = vsub.f32 %v7629_v0, %v2421_v21 }
 0x887   : > { %v2412_v44 = vpop.xlane.xlu0 %2411 }
 0x888   : > { %5843 = vpow2.f32 %v2474_v23  ;;  %v2450_v3 = vsub.f32 %v7625_v57, %v2412_v44  ;;  %v2476_v5 = vmul.f32 1.442695, %v2453_v1 }
 0x889   : > { %v2415_v62 = vpop.xlane.xlu1 %2414 }
 0x88a   : > { %v2470_v18 = vmul.f32 1.442695, %v2450_v3  ;;  %v2451_v59 = vsub.f32 %v7631_v40, %v2415_v62 }
 0x88c   : > { %5845 = vpow2.f32 %v2470_v18  ;;  %v2472_v48 = vmul.f32 1.442695, %v2451_v59 }
 0x88d   : > { %5847 = vpow2.f32 %v2476_v5  ;;  %v7717_v7 = vpop.permute.xlu1 %2811 }
 0x88e   : > { %5849 = vpow2.f32 %v2472_v48 }
 0x891   : > { %v7719_v16 = vpop.permute.xlu1 %2922 }
 0x892   : > { %v7721_v31 = vpop.eup %5843  ;;  %5524 = vmatprep.subr.msk.bf16.mxu0 %vm1009_vm0, %v7719_v16 }
 0x893   : > { %v2512_v57 = vsel %vm1188_vm1, %v7721_v31, 0.0 }
 0x894   : > { %2513 = vadd.xlane.f32.xlu0 %v2512_v57 }
 0x896   : > { %v7727_v0 = vpop.eup %5845 }
 0x897   : > { %v7729_v62 = vpop.eup %5847  ;;  %v2506_v18 = vsel %vm1188_vm1, %v7727_v0, 0.0 }
 0x898   : > { %v7733_v40 = vpop.eup %5849  ;;  %2507 = vadd.xlane.f32.xlu0 %v2506_v18  ;;  %v2515_v21 = vsel %vm1188_vm1, %v7729_v62, 0.0 }
 0x899   : > { %v2509_v48 = vsel %vm1188_vm1, %v7733_v40, 0.0 }
 0x89a   : > { %2510 = vadd.xlane.f32.xlu1 %v2509_v48 }
 0x89b   : > { %v2430_v58 = vpop.xlane.xlu0 %2429 }
 0x89c   : > { %v2456_v23 = vsub.f32 %v7651_v49, %v2430_v58  ;;  %2516 = vadd.xlane.f32.xlu0 %v2515_v21 }
 0x89e   : > { %v2482_v1 = vmul.f32 1.442695, %v2456_v23 }
 0x89f   : > { %v2424_v44 = vpop.xlane.xlu0 %2423 }
 0x8a0   : > { %5851 = vpow2.f32 %v2482_v1  ;;  %v2454_v3 = vsub.f32 %v7655_v25, %v2424_v44 }
 0x8a2   : > { %v2478_v5 = vmul.f32 1.442695, %v2454_v3 }
 0x8a3   : > { %v7753_v44 = vpop.permute.xlu0 %2809 }
 0x8a4   : > { %5853 = vpow2.f32 %v2478_v5 }
 0x8aa   : > { %v7741_v59 = vpop.eup %5851 }
 0x8ab   : > { %v2524_v57 = vsel %vm1188_vm1, %v7741_v59, 0.0 }
 0x8ac   : > { %2525 = vadd.xlane.f32.xlu1 %v2524_v57 }
 0x8ae   : > { %v7745_v18 = vpop.eup %5853 }
 0x8af   : > { %v2518_v48 = vsel %vm1188_vm1, %v7745_v18, 0.0 }
 0x8b0   : > { %2519 = vadd.xlane.f32.xlu1 %v2518_v48 }
 0x8b2   : > { %2813 = vrot.lane.b32.xlu0 %v6924_v12, %s6313_s27 }
 0x8c2   : > { %v2433_v49 = vpop.xlane.xlu1 %2432 }
 0x8c3   : > { %v2457_v25 = vsub.f32 %v7659_v6, %v2433_v49 }
 0x8c5   : > { %v2484_v58 = vmul.f32 1.442695, %v2457_v25 }
 0x8c6   : > { %v2427_v21 = vpop.xlane.xlu1 %2426 }
 0x8c7   : > { %5855 = vpow2.f32 %v2484_v58  ;;  %v2455_v23 = vsub.f32 %v7661_v20, %v2427_v21 }
 0x8c9   : > { %v2480_v1 = vmul.f32 1.442695, %v2455_v23 }
 0x8ca   : > { %v2445_v57 = vpop.xlane.xlu1 %2444 }
 0x8cb   : > { %5857 = vpow2.f32 %v2480_v1  ;;  %v2461_v20 = vsub.f32 %v7671_v46, %v2445_v57 }
 0x8cd   : > { %v2492_v23 = vmul.f32 1.442695, %v2461_v20 }
 0x8d1   : > { %v7755_v3 = vpop.eup %5855 }
 0x8d2   : > { %v2527_v5 = vsel %vm1188_vm1, %v7755_v3, 0.0 }
 0x8d3   : > { %2528 = vadd.xlane.f32.xlu1 %v2527_v5 }
 0x8d4   : > { %v2442_v12 = vpop.xlane.xlu0 %2441 }
 0x8d5   : > { %v7759_v48 = vpop.eup %5857  ;;  %v2460_v6 = vsub.f32 %v7667_v53, %v2442_v12 }
 0x8d6   : > { %v2521_v49 = vsel %vm1188_vm1, %v7759_v48, 0.0 }
 0x8d7   : > { %v2490_v25 = vmul.f32 1.442695, %v2460_v6  ;;  %2522 = vadd.xlane.f32.xlu1 %v2521_v49  ;;  %v2439_v6 = vpop.xlane.xlu1 %2438 }
 0x8d8   : > { %v2436_v58 = vpop.xlane.xlu0 %2435  ;;  %v2459_v49 = vsub.f32 %v7673_v29, %v2439_v6 }
 0x8d9   : > { %5859 = vpow2.f32 %v2490_v25  ;;  %v2458_v21 = vsub.f32 %v7669_v13, %v2436_v58 }
 0x8da   : > { %v2488_v20 = vmul.f32 1.442695, %v2459_v49 }
 0x8db   : > { %v2486_v1 = vmul.f32 1.442695, %v2458_v21  ;;  %v7781_v58 = vpop.permute.xlu1 %2924 }
 0x8dd   : > { %5861 = vpow2.f32 %v2486_v1 }
 0x8de   : > { %5863 = vpow2.f32 %v2492_v23 }
 0x8df   : > { %5865 = vpow2.f32 %v2488_v20 }
 0x8e3   : > { %v7766_v5 = vpop.eup %5859 }
 0x8e4   : > { %v2536_v53 = vsel %vm1188_vm1, %v7766_v5, 0.0 }
 0x8e5   : > { %2537 = vadd.xlane.f32.xlu0 %v2536_v53 }
 0x8e7   : > { %v7770_v12 = vpop.eup %5861 }
 0x8e8   : > { %2815 = vrot.lane.b32.xlu1 %v6940_v38, %s6313_s27  ;;  %v2530_v46 = vsel %vm1188_vm1, %v7770_v12, 0.0  ;;  %v7776_v57 = vpop.eup %5863 }
 0x8e9   : > { %2531 = vadd.xlane.f32.xlu0 %v2530_v46  ;;  %v2539_v13 = vsel %vm1188_vm1, %v7776_v57, 0.0  ;;  %v7787_v1 = vpop.eup %5865 }
 0x8ea   : > { %v2533_v29 = vsel %vm1188_vm1, %v7787_v1, 0.0 }
 0x8ec   : > { %v2502_v25 = vpop.xlane.xlu0 %2501 }
 0x8ed   : > { %2540 = vadd.xlane.f32.xlu0 %v2539_v13 }
 0x8f0   : > { %v2496_v21 = vpop.xlane.xlu0 %2495 }
 0x903   : > { %2926 = vrot.lane.b32.xlu0 %v6992_v14, %s6313_s27  ;;  %v2505_v38 = vpop.xlane.xlu1 %2504 }
 0x904   : > { %5867 = vrcp.f32 %v2505_v38 }
 0x905   : > { %5869 = vrcp.f32 %v2496_v21 }
 0x906   : > { %5871 = vrcp.f32 %v2502_v25 }
 0x907   : > { %2914 = vrot.lane.b32.xlu0 %v6956_v43, %s6313_s27  ;;  %v2499_v23 = vpop.xlane.xlu1 %2498 }
 0x908   : > { %5873 = vrcp.f32 %v2499_v23 }
 0x90b   : > { %2918 = vrot.lane.b32.xlu0 %v6996_v17, %s6313_s27 }
 0x90c   : > { %2534 = vadd.xlane.f32.xlu1 %v2533_v29 }
 0x90e   : > { %v5868_v53 = vpop.eup %5867 }
 0x90f   : > { %3203 = vrot.lane.b32.xlu0 %v6888_v39, %s6313_s27  ;;  %v5870_v14 = vpop.eup %5869  ;;  %v2561_v43 = vmul.f32 %v5868_v53, %v7705_v61  ;;  %v2838_v39 = vsel %vm1009_vm0, %v7557_v54, 0 }
 0x910   : > { %v5872_v46 = vpop.eup %5871  ;;  %v2558_v6 = vmul.f32 %v5870_v14, %v7700_v24  ;;  %v2841_v24 = vsel %vm1009_vm0, %v7568_v51, 0 }
 0x911   : > { %v2560_v20 = vmul.f32 %v5872_v46, %v7693_v42 }
 0x912   : > { %v5874_v13 = vpop.eup %5873 }
 0x913   : > { %v2559_v49 = vmul.f32 %v5874_v13, %v7709_v35  ;;  %v2575_v25 = vpack.c.bf16 %v2561_v43, %v2560_v20  ;;  %v2847_v35 = vsel %vm1009_vm0, %v7695_v28, 0 }
 0x915   : > { %v2574_v17 = vpack.c.bf16 %v2559_v49, %v2558_v6 }
 0x917   : > { %5360 = vmatprep.mubr.msk.bf16.mxu1 %vm1188_vm1, %v2574_v17 }
 0x918   : > { %5361 = vmatmul.mubr.msk.bf16.vlgmr.msra.gmra.mrb[48].mxu1 %vm1188_vm1, %v2575_v25 }
 0x919   : > { %5385 = vmatpush3.bf16.xpose.msra.mxu1 %v2838_v39 }
 0x91a   : > { %5521 = vmatprep.subr.msk.bf16.mxu1 %vm1009_vm0, %v7568_v51 }
 0x91d   : > { %2928 = vrot.lane.b32.xlu1 %v7008_v33, %s6313_s27  ;;  %v2844_v33 = vsel %vm1009_vm0, %v7566_v55, 0 }
 0x921   : > { %5387 = vmatpush3.bf16.xpose.msra.mxu1 %v2841_v24  ;;  %v2514_v42 = vpop.xlane.xlu0 %2513  ;;  %2916 = vrot.lane.b32.xlu1 %v6976_v60, %s6313_s27 }
 0x922   : > { %5522 = vmatprep.subr.msk.bf16.mxu1 %vm1009_vm0, %v7566_v55 }
 0x925   : > { %v2508_v61 = vpop.xlane.xlu0 %2507  ;;  %2920 = vrot.lane.b32.xlu1 %v7012_v36, %s6313_s27 }
 0x926   : > { %5875 = vrcp.f32 %v2508_v61  ;;  %v2943_v61 = vsel %vm1009_vm0, %v7719_v16, 0 }
 0x927   : > { %5877 = vrcp.f32 %v2514_v42  ;;  %v2511_v54 = vpop.xlane.xlu1 %2510 }
 0x928   : > { %5879 = vrcp.f32 %v2511_v54 }
 0x929   : > { %5389 = vmatpush3.bf16.xpose.msra.mxu1 %v2844_v33  ;;  %v2517_v51 = vpop.xlane.xlu0 %2516 }
 0x92a   : > { %5881 = vrcp.f32 %v2517_v51  ;;  %5523 = vmatprep.subr.msk.bf16.mxu1 %vm1009_vm0, %v7695_v28 }
 0x92d   : > { %v2814_v28 = vpop.permute.xlu0 %2813 }
 0x930   : > { %v5876_v60 = vpop.eup %5875 }
 0x931   : > { %v5878_v21 = vpop.eup %5877  ;;  %5391 = vmatpush3.bf16.xpose.msra.mxu1 %v2847_v35  ;;  %v2562_v38 = vmul.f32 %v5876_v60, %v7727_v0 }
 0x932   : > { %v5880_v36 = vpop.eup %5879  ;;  %v2564_v55 = vmul.f32 %v5878_v21, %v7721_v31 }
 0x933   : > { %v2563_v23 = vmul.f32 %v5880_v36, %v7733_v40 }
 0x934   : > { %v5882_v29 = vpop.eup %5881 }
 0x935   : > { %v2576_v53 = vpack.c.bf16 %v2563_v23, %v2562_v38  ;;  %v2565_v14 = vmul.f32 %v5882_v29, %v7729_v62 }
 0x937   : > { %5364 = vmatprep.mubr.msk.bf16.mxu1 %vm1188_vm1, %v2576_v53  ;;  %v2577_v46 = vpack.c.bf16 %v2565_v14, %v2564_v55 }
 0x939   : > { %5365 = vmatmul.mubr.msk.bf16.gmra.mrb[52].mxu1 %vm1188_vm1, %v2577_v46  ;;  %v2526_v0 = vpop.xlane.xlu1 %2525 }
 0x93a   : > { %5392 = vmatprep.mubr.msk.bf16.mxu1 %vm1009_vm0, %v7753_v44 }
 0x93d   : > { %v2520_v40 = vpop.xlane.xlu1 %2519 }
 0x941   : > { %5393 = vmatmul.mubr.msk.bf16.vlgmr.msra.gmra.mrb[56].mxu1 %vm1009_vm0, %v7717_v7 }
 0x942   : > { %5396 = vmatprep.mubr.msk.bf16.mxu1 %vm1009_vm0, %v2814_v28 }
 0x960   : > { %v2529_v13 = vpop.xlane.xlu1 %2528 }
 0x961   : > { %5883 = vrcp.f32 %v2529_v13 }
 0x962   : > { %5885 = vrcp.f32 %v2520_v40 }
 0x963   : > { %5887 = vrcp.f32 %v2526_v0 }
 0x964   : > { %v2523_v31 = vpop.xlane.xlu1 %2522 }
 0x965   : > { %5889 = vrcp.f32 %v2523_v31 }
 0x968   : > { %v2816_v62 = vpop.permute.xlu1 %2815 }
 0x969   : > { %5397 = vmatmul.mubr.msk.bf16.gmra.mrb[60].mxu1 %vm1009_vm0, %v2816_v62 }
 0x96b   : > { %v5884_v43 = vpop.eup %5883 }
 0x96c   : > { %v5886_v6 = vpop.eup %5885  ;;  %v2569_v20 = vmul.f32 %v5884_v43, %v7755_v3  ;;  %v2946_v3 = vsel %vm1009_vm0, %v7781_v58, 0 }
 0x96d   : > { %v5888_v44 = vpop.eup %5887  ;;  %v2566_v7 = vmul.f32 %v5886_v6, %v7745_v18 }
 0x96e   : > { %v2568_v25 = vmul.f32 %v5888_v44, %v7741_v59 }
 0x96f   : > { %v5890_v49 = vpop.eup %5889 }
 0x970   : > { %v2567_v17 = vmul.f32 %v5890_v49, %v7759_v48  ;;  %v2579_v42 = vpack.c.bf16 %v2569_v20, %v2568_v25 }
 0x972   : > { %v2538_v39 = vpop.xlane.xlu0 %2537  ;;  %v2578_v24 = vpack.c.bf16 %v2567_v17, %v2566_v7 }
 0x974   : > { %5376 = vmatprep.mubr.msk.bf16.mxu0 %vm1188_vm1, %v2578_v24 }
 0x975   : > { %5377 = vmatmul.mubr.msk.bf16.vlgmr.msra.gmra.mrb[64].mxu0 %vm1188_vm1, %v2579_v42 }
 0x976   : > { %5401 = vmatpush3.bf16.xpose.msra.mxu0 %v2943_v61  ;;  %v2532_v54 = vpop.xlane.xlu0 %2531 }
 0x977   : > { %5525 = vmatprep.subr.msk.bf16.mxu0 %vm1009_vm0, %v7781_v58 }
 0x97a   : > { %v2541_v18 = vpop.xlane.xlu0 %2540 }
 0x97b   : > { %5891 = vrcp.f32 %v2541_v18 }
 0x97c   : > { %5893 = vrcp.f32 %v2532_v54 }
 0x97d   : > { %5895 = vrcp.f32 %v2538_v39 }
 0x97e   : > { %5403 = vmatpush3.bf16.xpose.msra.mxu0 %v2946_v3  ;;  %v2927_v59 = vpop.permute.xlu0 %2926 }
 0x97f   : > { %5526 = vmatprep.subr.msk.bf16.mxu0 %vm1009_vm0, %v2927_v59  ;;  %v2949_v33 = vsel %vm1009_vm0, %v2927_v59, 0 }
 0x982   : > { %v2915_v48 = vpop.permute.xlu0 %2914 }
 0x985   : > { %v5892_v21 = vpop.eup %5891 }
 0x986   : > { %5405 = vmatpush3.bf16.xpose.msra.mxu0 %v2949_v33  ;;  %v2919_v51 = vpop.permute.xlu0 %2918  ;;  %v5894_v36 = vpop.eup %5893  ;;  %v2573_v29 = vmul.f32 %v5892_v21, %v7776_v57 }
 0x987   : > { %v5896_v38 = vpop.eup %5895  ;;  %v2570_v53 = vmul.f32 %v5894_v36, %v7770_v12 }
 0x988   : > { %v2572_v14 = vmul.f32 %v5896_v38, %v7766_v5 }
 0x98a   : > { %v3204_v60 = vpop.permute.xlu0 %3203  ;;  %v2581_v28 = vpack.c.bf16 %v2573_v29, %v2572_v14 }
 0x98b   : > { %5416 = vmatprep.subr.bf16.mxu1 %v3204_v60 }
 0x98c   : > { %5417 = vmatpush3.bf16.msra.mxu1 %v3204_v60 }
 0x999   : > { %v2535_v16 = vpop.xlane.xlu1 %2534 }
 0x99a   : > { %5897 = vrcp.f32 %v2535_v16 }
 0x99d   : > { %v2929_v35 = vpop.permute.xlu1 %2928 }
 0x99e   : > { %5527 = vmatprep.subr.msk.bf16.mxu0 %vm1009_vm0, %v2929_v35  ;;  %v2952_v58 = vsel %vm1009_vm0, %v2929_v35, 0 }
 0x99f   : > { %5407 = vmatpush3.bf16.xpose.msra.mxu0 %v2952_v58 }
 0x9a1   : > { %v2917_v0 = vpop.permute.xlu1 %2916 }
 0x9a4   : > { %v5898_v23 = vpop.eup %5897 }
 0x9a5   : > { %v2571_v55 = vmul.f32 %v5898_v23, %v7787_v1  ;;  %v2921_v57 = vpop.permute.xlu1 %2920 }
 0x9a7   : > { %v2580_v46 = vpack.c.bf16 %v2571_v55, %v2570_v53 }
 0x9a9   : > { %5380 = vmatprep.mubr.msk.bf16.mxu0 %vm1188_vm1, %v2580_v46 }
 0x9aa   : > { %5381 = vmatmul.mubr.msk.bf16.gmra.mrb[68].mxu0 %vm1188_vm1, %v2581_v28 }
 0x9ab   : > { %5408 = vmatprep.mubr.msk.bf16.mxu0 %vm1009_vm0, %v2915_v48 }
 0x9b2   : > { %5409 = vmatmul.mubr.msk.bf16.vlgmr.msra.gmra.mrb[72].mxu0 %vm1009_vm0, %v2917_v0 }
 0x9b3   : > { %5412 = vmatprep.mubr.msk.bf16.mxu0 %vm1009_vm0, %v2919_v51 }
 0x9ba   : > { %5413 = vmatmul.mubr.msk.bf16.gmra.mrb[76].mxu0 %vm1009_vm0, %v2921_v57 }
 0x9eb   : > { %v7859_v12 = vpop.f32.mrb[48].mxu1 }
 0x9ec   : > { %v7861_v1 = vpop.f32.mrb[49].mxu1 }
 0x9ed   : > { %v7863_v5 = vpop.f32.mrb[50].mxu1 }
 0x9ee   : > { %v7867_v13 = vpop.f32.mrb[51].mxu1 }
 0xa0c   : > { %v7871_v62 = vpop.f32.mrb[52].mxu1 }
 0xa0d   : > { %v7873_v43 = vpop.f32.mrb[53].mxu1 }
 0xa0e   : > { %v7875_v6 = vpop.f32.mrb[54].mxu1 }
 0xa0f   : > { %v7879_v49 = vpop.f32.mrb[55].mxu1 }
 0xa14   : > { %v7883_v7 = vpop.f32.mrb[56].mxu1 }
 0xa15   : > { %v7885_v17 = vpop.f32.mrb[57].mxu1  ;;  %v3025_v25 = vsel %vm1188_vm1, %v7883_v7, -inf }
 0xa16   : > { %3026 = vmax.xlane.f32.xlu0 %v3025_v25  ;;  %v7889_v39 = vpop.f32.mrb[58].mxu1  ;;  %v3019_v61 = vsel %vm1188_vm1, %v7885_v17, -inf }
 0xa17   : > { %v7891_v24 = vpop.f32.mrb[59].mxu1  ;;  %v3028_v54 = vsel %vm1188_vm1, %v7889_v39, -inf }
 0xa18   : > { %v3022_v42 = vsel %vm1188_vm1, %v7891_v24, -inf }
 0xa19   : > { %3023 = vmax.xlane.f32.xlu1 %v3022_v42 }
 0xa1a   : > { %3020 = vmax.xlane.f32.xlu0 %v3019_v61 }
 0xa1e   : > { %3029 = vmax.xlane.f32.xlu0 %v3028_v54 }
 0xa3c   : > { %v7899_v18 = vpop.f32.mrb[60].mxu1 }
 0xa3d   : > { %v7901_v3 = vpop.f32.mrb[61].mxu1  ;;  %v3037_v59 = vsel %vm1188_vm1, %v7899_v18, -inf }
 0xa3e   : > { %3038 = vmax.xlane.f32.xlu0 %v3037_v59  ;;  %v7905_v48 = vpop.f32.mrb[62].mxu1  ;;  %v3031_v60 = vsel %vm1188_vm1, %v7901_v3, -inf }
 0xa3f   : > { %v7907_v33 = vpop.f32.mrb[63].mxu1  ;;  %v3040_v51 = vsel %vm1188_vm1, %v7905_v48, -inf }
 0xa40   : > { %3041 = vmax.xlane.f32.xlu1 %v3040_v51  ;;  %v3034_v16 = vsel %vm1188_vm1, %v7907_v33, -inf }
 0xa42   : > { %3032 = vmax.xlane.f32.xlu0 %v3031_v60 }
 0xa44   : > { %3035 = vmax.xlane.f32.xlu1 %v3034_v16 }
 0xa48   : > { %v7915_v35 = vpop.f32.mrb[64].mxu0 }
 0xa49   : > { %v7917_v58 = vpop.f32.mrb[65].mxu0 }
 0xa4a   : > { %v7919_v21 = vpop.f32.mrb[66].mxu0 }
 0xa4b   : > { %v7923_v38 = vpop.f32.mrb[67].mxu0 }
 0xa7d   : > { %v7927_v29 = vpop.f32.mrb[68].mxu0 }
 0xa7e   : > { %v7929_v53 = vpop.f32.mrb[69].mxu0 }
 0xa7f   : > { %8820 = vst [vmem:[#allocation24_spill] sm:$0xff] %v7929_v53  ;;  %v7931_v55 = vpop.f32.mrb[70].mxu0 }
 0xa80   : > { %v7935_v46 = vpop.f32.mrb[71].mxu0 }
 0xa85   : > { %v7939_v0 = vpop.f32.mrb[72].mxu0 }
 0xa86   : > { %v7941_v57 = vpop.f32.mrb[73].mxu0  ;;  %v3049_v25 = vsel %vm1188_vm1, %v7939_v0, -inf }
 0xa87   : > { %3050 = vmax.xlane.f32.xlu0 %v3049_v25  ;;  %v7945_v42 = vpop.f32.mrb[74].mxu0  ;;  %v3043_v59 = vsel %vm1188_vm1, %v7941_v57, -inf }
 0xa88   : > { %v7947_v61 = vpop.f32.mrb[75].mxu0  ;;  %v3052_v54 = vsel %vm1188_vm1, %v7945_v42, -inf }
 0xa89   : > { %3053 = vmax.xlane.f32.xlu1 %v3052_v54  ;;  %v3046_v51 = vsel %vm1188_vm1, %v7947_v61, -inf }
 0xa8b   : > { %3044 = vmax.xlane.f32.xlu0 %v3043_v59 }
 0xa8d   : > { %3047 = vmax.xlane.f32.xlu1 %v3046_v51  ;;  %v7955_v60 = vpop.f32.mrb[76].mxu0 }
 0xa8e   : > { %v7957_v16 = vpop.f32.mrb[77].mxu0  ;;  %v3061_v25 = vsel %vm1188_vm1, %v7955_v60, -inf }
 0xa8f   : > { %3062 = vmax.xlane.f32.xlu0 %v3061_v25  ;;  %v7961_v28 = vpop.f32.mrb[78].mxu0  ;;  %v3055_v59 = vsel %vm1188_vm1, %v7957_v16, -inf }
 0xa90   : > { %v7963_v14 = vpop.f32.mrb[79].mxu0  ;;  %v3064_v54 = vsel %vm1188_vm1, %v7961_v28, -inf }
 0xa91   : > { %3065 = vmax.xlane.f32.xlu1 %v3064_v54  ;;  %v3058_v51 = vsel %vm1188_vm1, %v7963_v14, -inf }
 0xa93   : > { %3056 = vmax.xlane.f32.xlu0 %v3055_v59 }
 0xa95   : > { %3059 = vmax.xlane.f32.xlu1 %v3058_v51 }
 0xaa3   : > { %v3027_v23 = vpop.xlane.xlu0 %3026 }
 0xaa4   : > { %v3069_v59 = vsub.f32 %v7883_v7, %v3027_v23 }
 0xaa6   : > { %3205 = vrot.lane.b32.xlu1 %v6906_v32, %s6313_s27  ;;  %v3024_v20 = vpop.xlane.xlu1 %3023  ;;  %v3087_v40 = vmul.f32 1.442695, %v3069_v59 }
 0xaa7   : > { %v3021_v25 = vpop.xlane.xlu0 %3020  ;;  %v3068_v44 = vsub.f32 %v7891_v24, %v3024_v20 }
 0xaa8   : > { %v3067_v31 = vsub.f32 %v7885_v17, %v3021_v25 }
 0xaa9   : > { %3207 = vrot.lane.b32.xlu0 %v6922_v10, %s6313_s27  ;;  %v3085_v32 = vmul.f32 1.442695, %v3068_v44 }
 0xaaa   : > { %v3083_v10 = vmul.f32 1.442695, %v3067_v31 }
 0xaab   : > { %v3030_v54 = vpop.xlane.xlu0 %3029 }
 0xaac   : > { %v3070_v36 = vsub.f32 %v7889_v39, %v3030_v54 }
 0xaad   : > { %3209 = vrot.lane.b32.xlu0 %v6938_v45, %s6313_s27 }
 0xaae   : > { %v3089_v51 = vmul.f32 1.442695, %v3070_v36 }
 0xab0   : > { %5899 = vpow2.f32 %v3089_v51 }
 0xab1   : > { %5901 = vpow2.f32 %v3087_v40 }
 0xab2   : > { %5903 = vpow2.f32 %v3085_v32 }
 0xab3   : > { %5905 = vpow2.f32 %v3083_v10 }
 0xaba   : > { %v7981_v53 = vpop.eup %5899 }
 0xabb   : > { %v7983_v45 = vpop.eup %5901  ;;  %v3124_v39 = vsel %vm1188_vm1, %v7981_v53, 0.0 }
 0xabc   : > { %v7987_v7 = vpop.eup %5903  ;;  %v3121_v17 = vsel %vm1188_vm1, %v7983_v45, 0.0 }
 0xabd   : > { %v7991_v44 = vpop.eup %5905  ;;  %v3118_v24 = vsel %vm1188_vm1, %v7987_v7, 0.0 }
 0xabe   : > { %v3115_v54 = vsel %vm1188_vm1, %v7991_v44, 0.0 }
 0xaca   : > { %3125 = vadd.xlane.f32.xlu1 %v3124_v39 }
 0xacb   : > { %v3039_v20 = vpop.xlane.xlu0 %3038 }
 0xacc   : > { %v3073_v40 = vsub.f32 %v7899_v18, %v3039_v20  ;;  %3122 = vadd.xlane.f32.xlu0 %v3121_v17 }
 0xacd   : > { %v3042_v31 = vpop.xlane.xlu1 %3041 }
 0xace   : > { %v3095_v36 = vmul.f32 1.442695, %v3073_v40  ;;  %v3074_v23 = vsub.f32 %v7905_v48, %v3042_v31  ;;  %3119 = vadd.xlane.f32.xlu1 %v3118_v24 }
 0xacf   : > { %v3033_v25 = vpop.xlane.xlu0 %3032 }
 0xad0   : > { %5907 = vpow2.f32 %v3095_v36  ;;  %v3071_v59 = vsub.f32 %v7901_v3, %v3033_v25  ;;  %3116 = vadd.xlane.f32.xlu0 %v3115_v54  ;;  %v3097_v32 = vmul.f32 1.442695, %v3074_v23 }
 0xad1   : > { %v3036_v51 = vpop.xlane.xlu1 %3035 }
 0xad2   : > { %v3091_v18 = vmul.f32 1.442695, %v3071_v59  ;;  %v3072_v10 = vsub.f32 %v7907_v33, %v3036_v51 }
 0xad4   : > { %5909 = vpow2.f32 %v3091_v18  ;;  %v3093_v39 = vmul.f32 1.442695, %v3072_v10 }
 0xad5   : > { %5911 = vpow2.f32 %v3097_v32 }
 0xad6   : > { %5913 = vpow2.f32 %v3093_v39 }
 0xada   : > { %v8001_v20 = vpop.eup %5907 }
 0xadb   : > { %v3133_v48 = vsel %vm1188_vm1, %v8001_v20, 0.0 }
 0xadc   : > { %3134 = vadd.xlane.f32.xlu1 %v3133_v48 }
 0xade   : > { %v8005_v17 = vpop.eup %5909 }
 0xadf   : > { %v3127_v3 = vsel %vm1188_vm1, %v8005_v17, 0.0  ;;  %v8009_v40 = vpop.eup %5911 }
 0xae0   : > { %3128 = vadd.xlane.f32.xlu1 %v3127_v3  ;;  %v3136_v33 = vsel %vm1188_vm1, %v8009_v40, 0.0  ;;  %v8013_v31 = vpop.eup %5913 }
 0xae1   : > { %v3130_v24 = vsel %vm1188_vm1, %v8013_v31, 0.0 }
 0xae4   : > { %3137 = vadd.xlane.f32.xlu1 %v3136_v33 }
 0xae6   : > { %3292 = vrot.lane.b32.xlu0 %v6954_v4, %s6313_s27 }
 0xae8   : > { %3131 = vadd.xlane.f32.xlu1 %v3130_v24 }
 0xb14   : > { %v3051_v36 = vpop.xlane.xlu0 %3050 }
 0xb15   : > { %v3077_v23 = vsub.f32 %v7939_v0, %v3051_v36 }
 0xb16   : > { %v3054_v25 = vpop.xlane.xlu1 %3053 }
 0xb17   : > { %v3103_v54 = vmul.f32 1.442695, %v3077_v23  ;;  %v3078_v59 = vsub.f32 %v7945_v42, %v3054_v25 }
 0xb18   : > { %v3045_v51 = vpop.xlane.xlu0 %3044 }
 0xb19   : > { %5915 = vpow2.f32 %v3103_v54  ;;  %v3075_v32 = vsub.f32 %v7941_v57, %v3045_v51  ;;  %v3105_v18 = vmul.f32 1.442695, %v3078_v59 }
 0xb1a   : > { %v3048_v10 = vpop.xlane.xlu1 %3047 }
 0xb1b   : > { %v3099_v39 = vmul.f32 1.442695, %v3075_v32  ;;  %v3076_v4 = vsub.f32 %v7947_v61, %v3048_v10 }
 0xb1c   : > { %v3063_v48 = vpop.xlane.xlu0 %3062 }
 0xb1d   : > { %5917 = vpow2.f32 %v3099_v39  ;;  %v3101_v3 = vmul.f32 1.442695, %v3076_v4  ;;  %v3081_v33 = vsub.f32 %v7955_v60, %v3063_v48 }
 0xb1e   : > { %5919 = vpow2.f32 %v3105_v18  ;;  %v3066_v0 = vpop.xlane.xlu1 %3065 }
 0xb1f   : > { %5921 = vpow2.f32 %v3101_v3  ;;  %v3111_v24 = vmul.f32 1.442695, %v3081_v33  ;;  %v3082_v42 = vsub.f32 %v7961_v28, %v3066_v0 }
 0xb20   : > { %v3057_v36 = vpop.xlane.xlu0 %3056 }
 0xb21   : > { %5923 = vpow2.f32 %v3111_v24  ;;  %v3079_v57 = vsub.f32 %v7957_v16, %v3057_v36  ;;  %v3113_v59 = vmul.f32 1.442695, %v3082_v42 }
 0xb22   : > { %v3060_v23 = vpop.xlane.xlu1 %3059 }
 0xb23   : > { %v8026_v25 = vpop.eup %5915  ;;  %v3107_v54 = vmul.f32 1.442695, %v3079_v57  ;;  %v3080_v60 = vsub.f32 %v7963_v14, %v3060_v23 }
 0xb24   : > { %v3145_v61 = vsel %vm1188_vm1, %v8026_v25, 0.0  ;;  %v3208_v51 = vpop.permute.xlu0 %3207 }
 0xb25   : > { %5925 = vpow2.f32 %v3107_v54  ;;  %3146 = vadd.xlane.f32.xlu0 %v3145_v61  ;;  %v3109_v39 = vmul.f32 1.442695, %v3080_v60  ;;  %v8821_v54 = vpack.c.bf16 %v7579_v15, %v7573_v34  ;;  %v8822_v61 = vpack.c.bf16 %v7867_v13, %v7861_v1 }
 0xb26   : > { %v3206_v32 = vpop.permute.xlu1 %3205  ;;  %5927 = vpow2.f32 %v3113_v59 }
 0xb27   : > { %v8031_v18 = vpop.eup %5917  ;;  %5418 = vmatprep.subr.bf16.mxu1 %v3206_v32  ;;  %5929 = vpow2.f32 %v3109_v39 }
 0xb28   : > { %v8033_v28 = vpop.eup %5919  ;;  %5419 = vmatpush3.bf16.msra.mxu1 %v3206_v32  ;;  %v3139_v16 = vsel %vm1188_vm1, %v8031_v18, 0.0  ;;  %v3210_v48 = vpop.permute.xlu0 %3209 }
 0xb29   : > { %v8037_v10 = vpop.eup %5921  ;;  %3140 = vadd.xlane.f32.xlu0 %v3139_v16  ;;  %5420 = vmatprep.subr.bf16.mxu1 %v3208_v51  ;;  %v3148_v3 = vsel %vm1188_vm1, %v8033_v28, 0.0 }
 0xb2a   : > { %v3142_v14 = vsel %vm1188_vm1, %v8037_v10, 0.0 }
 0xb2b   : > { %v8041_v4 = vpop.eup %5923  ;;  %3143 = vadd.xlane.f32.xlu1 %v3142_v14 }
 0xb2c   : > { %5421 = vmatpush3.bf16.msra.mxu1 %v3208_v51  ;;  %v3157_v33 = vsel %vm1188_vm1, %v8041_v4, 0.0 }
 0xb2d   : > { %3149 = vadd.xlane.f32.xlu0 %v3148_v3  ;;  %5422 = vmatprep.subr.bf16.mxu1 %v3210_v48 }
 0xb2f   : > { %v8047_v0 = vpop.eup %5925  ;;  %3158 = vadd.xlane.f32.xlu1 %v3157_v33 }
 0xb30   : > { %5423 = vmatpush3.bf16.msra.mxu1 %v3210_v48  ;;  %v3151_v24 = vsel %vm1188_vm1, %v8047_v0, 0.0  ;;  %v8051_v36 = vpop.eup %5927 }
 0xb31   : > { %v3160_v42 = vsel %vm1188_vm1, %v8051_v36, 0.0  ;;  %v8055_v57 = vpop.eup %5929 }
 0xb32   : > { %v3154_v23 = vsel %vm1188_vm1, %v8055_v57, 0.0 }
 0xb33   : > { %3152 = vadd.xlane.f32.xlu1 %v3151_v24 }
 0xb37   : > { %3161 = vadd.xlane.f32.xlu1 %v3160_v42 }
 0xb3b   : > { %3155 = vadd.xlane.f32.xlu1 %v3154_v23 }
 0xb43   : > { %3296 = vrot.lane.b32.xlu0 %v6994_v41, %s6313_s27  ;;  %v8823_v41 = vpack.c.bf16 %v7575_v47, %v7571_v8 }
 0xb47   : > { %3298 = vrot.lane.b32.xlu0 %v7010_v63, %s6313_s27  ;;  %v8824_v63 = vpack.c.bf16 %v7863_v5, %v7859_v12 }
 0xb4b   : > { %2155 = vrot.lane.b32.xlu0 %v8821_v54, %s6313_s27 }
 0xb4c   : > { %3294 = vrot.lane.b32.xlu1 %v6974_v56, %s6313_s27 }
 0xb4f   : > { %2776 = vrot.lane.b32.xlu0 %v8822_v61, %s6312_s23 }
 0xb50   : > { %2157 = vrot.lane.b32.xlu1 %v8823_v41, %s6313_s27 }
 0xb54   : > { %2778 = vrot.lane.b32.xlu1 %v8824_v63, %s6312_s23 }
 0xb57   : > { %v3126_v34 = vpop.xlane.xlu1 %3125 }
 0xb59   : > { %v3123_v15 = vpop.xlane.xlu0 %3122 }
 0xb5a   : > { %5931 = vrcp.f32 %v3123_v15 }
 0xb5b   : > { %v3120_v59 = vpop.xlane.xlu1 %3119 }
 0xb5c   : > { %5933 = vrcp.f32 %v3120_v59 }
 0xb5d   : > { %5935 = vrcp.f32 %v3126_v34  ;;  %v3117_v56 = vpop.xlane.xlu0 %3116 }
 0xb5e   : > { %5937 = vrcp.f32 %v3117_v56 }
 0xb61   : > { %v3293_v1 = vpop.permute.xlu0 %3292 }
 0xb62   : > { %5432 = vmatprep.subr.bf16.mxu0 %v3293_v1 }
 0xb63   : > { %5433 = vmatpush3.bf16.msra.mxu0 %v3293_v1 }
 0xb64   : > { %v5932_v13 = vpop.eup %5931 }
 0xb65   : > { %v3181_v51 = vmul.f32 %v5932_v13, %v7983_v45 }
 0xb66   : > { %v5934_v60 = vpop.eup %5933 }
 0xb67   : > { %v5936_v8 = vpop.eup %5935  ;;  %v3180_v5 = vmul.f32 %v5934_v60, %v7987_v7 }
 0xb68   : > { %v5938_v47 = vpop.eup %5937  ;;  %v3182_v16 = vmul.f32 %v5936_v8, %v7981_v53 }
 0xb69   : > { %v3135_v32 = vpop.xlane.xlu1 %3134  ;;  %v3179_v12 = vmul.f32 %v5938_v47, %v7991_v44 }
 0xb6a   : > { %v3196_v14 = vpack.c.bf16 %v3182_v16, %v3181_v51 }
 0xb6b   : > { %v3195_v39 = vpack.c.bf16 %v3180_v5, %v3179_v12 }
 0xb6d   : > { %5424 = vmatprep.mubr.msk.bf16.mxu1 %vm1188_vm1, %v3195_v39  ;;  %v3129_v48 = vpop.xlane.xlu1 %3128 }
 0xb6e   : > { %5425 = vmatmul.mubr.msk.bf16.vlgmr.msra.gmra.mrb[64].mxu1 %vm1188_vm1, %v3196_v14 }
 0xb71   : > { %v3138_v3 = vpop.xlane.xlu1 %3137 }
 0xb72   : > { %5939 = vrcp.f32 %v3138_v3 }
 0xb73   : > { %5941 = vrcp.f32 %v3129_v48 }
 0xb74   : > { %5943 = vrcp.f32 %v3135_v32 }
 0xb75   : > { %v3132_v33 = vpop.xlane.xlu1 %3131 }
 0xb76   : > { %5945 = vrcp.f32 %v3132_v33 }
 0xb7c   : > { %v5940_v45 = vpop.eup %5939 }
 0xb7d   : > { %v5942_v24 = vpop.eup %5941  ;;  %v3186_v7 = vmul.f32 %v5940_v45, %v8009_v40 }
 0xb7e   : > { %v5944_v44 = vpop.eup %5943  ;;  %v3183_v53 = vmul.f32 %v5942_v24, %v8005_v17 }
 0xb7f   : > { %v3185_v54 = vmul.f32 %v5944_v44, %v8001_v20 }
 0xb80   : > { %v5946_v42 = vpop.eup %5945 }
 0xb81   : > { %v3184_v23 = vmul.f32 %v5946_v42, %v8013_v31  ;;  %v3198_v41 = vpack.c.bf16 %v3186_v7, %v3185_v54  ;;  %v5628_v54 = vld [vmem:[%s6576_s18 + $0x8] sm:$0xff]  }
 0xb83   : > { %v3197_v61 = vpack.c.bf16 %v3184_v23, %v3183_v53  ;;  %v8825_v23 = vmov 0  }
 0xb85   : > { %5428 = vmatprep.mubr.msk.bf16.mxu1 %vm1188_vm1, %v3197_v61  ;;  %v5629_v61 = vld [vmem:[%s6576_s18 + $0x10] sm:$0xff]  }
 0xb86   : > { %5429 = vmatmul.mubr.msk.bf16.gmra.mrb[68].mxu1 %vm1188_vm1, %v3198_v41  ;;  %v5632_v41 = vld [vmem:[%s6576_s18 + $0x28] sm:$0xff]  }
 0xbb2   : > { %v3147_v63 = vpop.xlane.xlu0 %3146 }
 0xbb6   : > { %v3141_v34 = vpop.xlane.xlu0 %3140 }
 0xbb7   : > { %5947 = vrcp.f32 %v3141_v34  ;;  %v5634_v34 = vld [vmem:[%s6576_s18 + $0x38] sm:$0xff]  }
 0xbb8   : > { %v3144_v15 = vpop.xlane.xlu1 %3143 }
 0xbb9   : > { %5949 = vrcp.f32 %v3144_v15 }
 0xbba   : > { %v3150_v59 = vpop.xlane.xlu0 %3149 }
 0xbbb   : > { %5951 = vrcp.f32 %v3150_v59 }
 0xbbc   : > { %v3159_v56 = vpop.xlane.xlu1 %3158  ;;  %5953 = vrcp.f32 %v3147_v63  ;;  %v5633_v63 = vld [vmem:[%s6576_s18 + $0x30] sm:$0xff]  }
 0xbbe   : > { %v3297_v40 = vpop.permute.xlu0 %3296 }
 0xbc0   : > { %v3153_v1 = vpop.xlane.xlu1 %3152 }
 0xbc1   : > { %v5948_v17 = vpop.eup %5947  ;;  %5955 = vrcp.f32 %v3153_v1 }
 0xbc2   : > { %v3299_v13 = vpop.permute.xlu0 %3298  ;;  %v3187_v20 = vmul.f32 %v5948_v17, %v8031_v18 }
 0xbc3   : > { %v5950_v31 = vpop.eup %5949 }
 0xbc4   : > { %v3162_v60 = vpop.xlane.xlu1 %3161  ;;  %v3188_v8 = vmul.f32 %v5950_v31, %v8037_v10  ;;  %v8827_v31 = vpack.c.bf16 %v7591_v11, %v7585_v30  ;;  %v8830_v30 = vpack.c.bf16 %v7615_v9, %v7611_v26  ;;  %v8831_v11 = vpack.c.bf16 %v7619_v2, %v7613_v37 }
 0xbc5   : > { %v5952_v18 = vpop.eup %5951  ;;  %v8834_v2 = vpack.c.bf16 %v7643_v27, %v7639_v52  ;;  %v8837_v52 = vpack.c.bf16 %v7931_v55, %v7927_v29  ;;  %v8838_v27 = vld [vmem:[#allocation24_spill] sm:$0xff] }
 0xbc6   : > { %v2156_v47 = vpop.permute.xlu0 %2155  ;;  %v3199_v51 = vpack.c.bf16 %v3188_v8, %v3187_v20  ;;  %v5954_v16 = vpop.eup %5953  ;;  %v3190_v48 = vmul.f32 %v5952_v18, %v8033_v28  ;;  %v8829_v20 = vpack.c.bf16 %v7879_v49, %v7873_v43  ;;  %v8833_v43 = vpack.c.bf16 %v7923_v38, %v7917_v58  ;;  %v8835_v58 = vld [vmem:[#allocation23_spill] sm:$0xff] }
 0xbc7   : > { %2180 = vst.msk [vmem:[#allocation2] sm:$0xff] %vm2179_vm2, %v2156_v47  ;;  %v3189_v45 = vmul.f32 %v5954_v16, %v8026_v25 }
 0xbc8   : > { %5440 = vmatprep.mubr.msk.bf16.mxu0 %vm1188_vm1, %v3199_v51  ;;  %v3156_v32 = vpop.xlane.xlu1 %3155 }
 0xbc9   : > { %5957 = vrcp.f32 %v3156_v32  ;;  %v3200_v44 = vpack.c.bf16 %v3190_v48, %v3189_v45 }
 0xbca   : > { %v2777_v12 = vpop.permute.xlu0 %2776  ;;  %5959 = vrcp.f32 %v3162_v60  ;;  %v8828_v60 = vpack.c.bf16 %v7875_v6, %v7871_v62  ;;  %v8832_v62 = vpack.c.bf16 %v7919_v21, %v7915_v35  ;;  %v8836_v21 = vpack.c.bf16 %v7647_v50, %v8835_v58 }
 0xbcb   : > { %2801 = vst.msk [vmem:[#allocation2] sm:$0xff] %vm2800_vm3, %v2777_v12  ;;  %5961 = vrcp.f32 %v3159_v56  ;;  %v5956_v39 = vpop.eup %5955  ;;  %v8839_v50 = vpack.c.bf16 %v7935_v46, %v8838_v27 }
 0xbcc   : > { %v3295_v5 = vpop.permute.xlu1 %3294  ;;  %v3191_v24 = vmul.f32 %v5956_v39, %v8047_v0  ;;  %v5627_v0 = vld [vmem:[%s6576_s18] sm:$0xff]  }
 0xbcd   : > { %5434 = vmatprep.subr.bf16.mxu0 %v3295_v5  ;;  %5448 = vmatprep.subr.bf16.mxu1 %v5627_v0 }
 0xbce   : > { %5435 = vmatpush3.bf16.msra.mxu0 %v3295_v5  ;;  %5449 = vmatpush3.bf16.msra.mxu1 %v5627_v0 }
 0xbcf   : > { %5436 = vmatprep.subr.bf16.mxu0 %v3297_v40  ;;  %5450 = vmatprep.subr.bf16.mxu1 %v5628_v54 }
 0xbd0   : > { %v2158_v10 = vpop.permute.xlu1 %2157 }
 0xbd1   : > { %2181 = vst.msk [vmem:[#allocation2 + $0x8] sm:$0xff] %vm2179_vm2, %v2158_v10 }
 0xbd2   : > { %5437 = vmatpush3.bf16.msra.mxu0 %v3297_v40  ;;  %5451 = vmatpush3.bf16.msra.mxu1 %v5628_v54 }
 0xbd3   : > { %v5958_v14 = vpop.eup %5957  ;;  %5438 = vmatprep.subr.bf16.mxu0 %v3299_v13  ;;  %5452 = vmatprep.subr.bf16.mxu1 %v5629_v61 }
 0xbd4   : > { %v2779_v3 = vpop.permute.xlu1 %2778  ;;  %v3192_v33 = vmul.f32 %v5958_v14, %v8055_v57  ;;  %v5960_v42 = vpop.eup %5959 }
 0xbd5   : > { %2802 = vst.msk [vmem:[#allocation2 + $0x8] sm:$0xff] %vm2800_vm3, %v2779_v3  ;;  %v5962_v28 = vpop.eup %5961  ;;  %v3194_v57 = vmul.f32 %v5960_v42, %v8051_v36  ;;  %v5630_v36 = vld [vmem:[%s6576_s18 + $0x18] sm:$0xff]  }
 0xbd6   : > { %5439 = vmatpush3.bf16.msra.mxu0 %v3299_v13  ;;  %v3201_v7 = vpack.c.bf16 %v3192_v33, %v3191_v24  ;;  %v3193_v25 = vmul.f32 %v5962_v28, %v8041_v4  ;;  %5453 = vmatpush3.bf16.msra.mxu1 %v5629_v61  ;;  %v5631_v4 = vld [vmem:[%s6576_s18 + $0x20] sm:$0xff]   ;;  %v8826_v13 = vpack.c.bf16 %v7587_v19, %v7583_v22 }
 0xbd7   : > { %5454 = vmatprep.subr.bf16.mxu1 %v5630_v36 }
 0xbd8   : > { %v3202_v53 = vpack.c.bf16 %v3194_v57, %v3193_v25 }
 0xbd9   : > { %5441 = vmatmul.mubr.msk.bf16.vlgmr.msra.gmra.mrb[80].mxu0 %vm1188_vm1, %v3200_v44 }
 0xbda   : > { %5444 = vmatprep.mubr.msk.bf16.mxu0 %vm1188_vm1, %v3201_v7  ;;  %5455 = vmatpush3.bf16.msra.mxu1 %v5630_v36 }
 0xbdb   : > { %5456 = vmatprep.subr.bf16.mxu1 %v5631_v4 }
 0xbde   : > { %5457 = vmatpush3.bf16.msra.mxu1 %v5631_v4 }
 0xbdf   : > { %5458 = vmatprep.subr.bf16.mxu1 %v5632_v41 }
 0xbe1   : > { %5445 = vmatmul.mubr.msk.bf16.gmra.mrb[84].mxu0 %vm1188_vm1, %v3202_v53 }
 0xbe2   : > { %4031 = vmatprep.mubr.bf16.mxu0 %v8825_v23  ;;  %5459 = vmatpush3.bf16.msra.mxu1 %v5632_v41 }
 0xbe3   : > { %5460 = vmatprep.subr.bf16.mxu1 %v5633_v63 }
 0xbe6   : > { %5461 = vmatpush3.bf16.msra.mxu1 %v5633_v63 }
 0xbe7   : > { %5462 = vmatprep.subr.bf16.mxu1 %v5634_v34 }
 0xbea   : > { %5463 = vmatpush3.bf16.msra.mxu1 %v5634_v34 }
 0xc41   : > { %v5426_v15 = vpop.f32.mrb[64].mxu1 }
 0xc42   : > { %v3261_v59 = vpop.f32.mrb[65].mxu1 }
 0xc43   : > { %v5427_v56 = vpop.f32.mrb[66].mxu1 }
 0xc44   : > { %v3382_v40 = vpack.c.bf16 %v5427_v56, %v5426_v15  ;;  %v3264_v1 = vpop.f32.mrb[67].mxu1 }
 0xc45   : > { %v3381_v17 = vpack.c.bf16 %v3264_v1, %v3261_v59 }
 0xc46   : > { %3399 = vrot.lane.b32.xlu1 %v3382_v40, %s6311_s20  ;;  %v8840_v40 = vld [vmem:[#allocation22_spill] sm:$0xff] }
 0xc47   : > { %3397 = vrot.lane.b32.xlu0 %v3381_v17, %s6311_s20  ;;  %v3456_v1 = vsub.s32 6, %v8840_v40  ;;  %v8196_v17 = vld [vmem:[%s6595_s16] sm:$0xff] }
 0xc4a   : > { %2161 = vrot.lane.b32.xlu1 %v8826_v13, %s6313_s27  ;;  %v8199_v13 = vrot.slane %v8196_v17, %v3456_v1 }
 0xc4b   : > { %2159 = vrot.lane.b32.xlu0 %v8827_v31, %s6313_s27 }
 0xc4e   : > { %2782 = vrot.lane.b32.xlu1 %v8828_v60, %s6312_s23 }
 0xc4f   : > { %2780 = vrot.lane.b32.xlu0 %v8829_v20, %s6312_s23 }
 0xc59   : > { %v5430_v8 = vpop.f32.mrb[68].mxu1 }
 0xc5a   : > { %v3277_v47 = vpop.f32.mrb[69].mxu1 }
 0xc5b   : > { %v5431_v51 = vpop.f32.mrb[70].mxu1 }
 0xc5c   : > { %v3384_v22 = vpack.c.bf16 %v5431_v51, %v5430_v8  ;;  %v3280_v19 = vpop.f32.mrb[71].mxu1  ;;  %v6060_v51 = vld [vmem:[#allocation12] sm:$0xff] }
 0xc5d   : > { %v3383_v32 = vpack.c.bf16 %v3280_v19, %v3277_v47 }
 0xc5e   : > { %3403 = vrot.lane.b32.xlu1 %v3384_v22, %s6311_s20 }
 0xc5f   : > { %3401 = vrot.lane.b32.xlu0 %v3383_v32, %s6311_s20 }
 0xc62   : > { %2165 = vrot.lane.b32.xlu1 %v8830_v30, %s6313_s27  ;;  %v6061_v30 = vld [vmem:[#allocation12 + $0x8] sm:$0xff] }
 0xc63   : > { %2163 = vrot.lane.b32.xlu0 %v8831_v11, %s6313_s27 }
 0xc66   : > { %2786 = vrot.lane.b32.xlu1 %v8832_v62, %s6312_s23 }
 0xc67   : > { %2784 = vrot.lane.b32.xlu0 %v8833_v43, %s6312_s23  ;;  %v6062_v43 = vld [vmem:[#allocation12 + $0x18] sm:$0xff] }
 0xcac   : > { %v5442_v6 = vpop.f32.mrb[80].mxu0 }
 0xcad   : > { %v3350_v49 = vpop.f32.mrb[81].mxu0 }
 0xcae   : > { %v5443_v12 = vpop.f32.mrb[82].mxu0 }
 0xcaf   : > { %v3386_v26 = vpack.c.bf16 %v5443_v12, %v5442_v6  ;;  %v3353_v9 = vpop.f32.mrb[83].mxu0 }
 0xcb0   : > { %v3385_v5 = vpack.c.bf16 %v3353_v9, %v3350_v49  ;;  %v6063_v9 = vld [vmem:[#allocation12 + $0x10] sm:$0xff] }
 0xcb1   : > { %3407 = vrot.lane.b32.xlu1 %v3386_v26, %s6311_s20 }
 0xcb2   : > { %3405 = vrot.lane.b32.xlu0 %v3385_v5, %s6311_s20 }
 0xcb4   : > { %v5446_v37 = vpop.f32.mrb[84].mxu0 }
 0xcb5   : > { %2169 = vrot.lane.b32.xlu1 %v8834_v2, %s6313_s27  ;;  %v3366_v35 = vpop.f32.mrb[85].mxu0  ;;  %v5637_v2 = vld [vmem:[%s6582_s8 + $0x4] ss:$8 sps:$4 sm:$0xff]  }
 0xcb6   : > { %2167 = vrot.lane.b32.xlu0 %v8836_v21, %s6313_s27  ;;  %v5447_v38 = vpop.f32.mrb[86].mxu0  ;;  %3999 = vmatprep.subr.bf16.mxu0 %v5637_v2 }
 0xcb7   : > { %v3388_v18 = vpack.c.bf16 %v5447_v38, %v5446_v37  ;;  %v3369_v10 = vpop.f32.mrb[87].mxu0 }
 0xcb8   : > { %v3387_v16 = vpack.c.bf16 %v3369_v10, %v3366_v35  ;;  %v3400_v39 = vpop.permute.xlu1 %3399  ;;  %v5635_v35 = vld [vmem:[%s6582_s8] ss:$8 sps:$4 sm:$0xff]   ;;  %v5640_v10 = vld [vmem:[%s6582_s8 + $0x14] ss:$8 sps:$4 sm:$0xff]  }
 0xcb9   : > { %3423 = vst.msk [vmem:[#allocation2 + $0x8] sm:$0xff] %vm3421_vm4, %v3400_v39  ;;  %v3398_v14 = vpop.permute.xlu0 %3397  ;;  %2790 = vrot.lane.b32.xlu1 %v8837_v52, %s6312_s23  ;;  %4000 = vmatpush1.bf16.msra.mxu0 %v5635_v35  ;;  %v5638_v39 = vld [vmem:[%s6582_s8 + $0x10] ss:$8 sps:$4 sm:$0xff]  }
 0xcba   : > { %3422 = vst.msk [vmem:[#allocation2] sm:$0xff] %vm3421_vm4, %v3398_v14  ;;  %2788 = vrot.lane.b32.xlu0 %v8839_v50, %s6312_s23  ;;  %v6064_v14 = vld [vmem:[#allocation12 + $0x20] sm:$0xff]  ;;  %4001 = vmatprep.subr.bf16.mxu0 %v5640_v10  ;;  %v6065_v50 = vld [vmem:[#allocation12 + $0x28] sm:$0xff] }
 0xcbb   : > { %v6072_v10 = vld [vmem:[#allocation12 + $0x60] sm:$0xff] }
 0xcbc   : > { %v2162_v48 = vpop.permute.xlu1 %2161 }
 0xcbd   : > { %2183 = vst.msk [vmem:[#allocation2 + $0x18] sm:$0xff] %vm2179_vm2, %v2162_v48  ;;  %v2160_v3 = vpop.permute.xlu0 %2159  ;;  %3411 = vrot.lane.b32.xlu1 %v3388_v18, %s6311_s20  ;;  %4002 = vmatpush1.bf16.msra.mxu0 %v5638_v39  ;;  %v6073_v39 = vld [vmem:[#allocation12 + $0x68] sm:$0xff] }
 0xcbe   : > { %2182 = vst.msk [vmem:[#allocation2 + $0x10] sm:$0xff] %vm2179_vm2, %v2160_v3  ;;  %3409 = vrot.lane.b32.xlu0 %v3387_v16, %s6311_s20  ;;  %v5643_v3 = vld [vmem:[%s6582_s8 + $0x24] ss:$8 sps:$4 sm:$0xff]  }
 0xcbf   : > { %4003 = vmatprep.subr.bf16.mxu0 %v5643_v3 }
 0xcc0   : > { %v2783_v33 = vpop.permute.xlu1 %2782  ;;  %v3431_v46 = vld [vmem:[#allocation2 + $0x8] sm:$0xff] }
 0xcc1   : > { %2804 = vst.msk [vmem:[#allocation2 + $0x18] sm:$0xff] %vm2800_vm3, %v2783_v33  ;;  %v2781_v29 = vpop.permute.xlu0 %2780  ;;  %v3430_v55 = vld [vmem:[#allocation2] sm:$0xff] }
 0xcc2   : > { %2803 = vst.msk [vmem:[#allocation2 + $0x10] sm:$0xff] %vm2800_vm3, %v2781_v29  ;;  %5464 = vmatprep.mubr.bf16.mxu1 %v3430_v55  ;;  %v5641_v33 = vld [vmem:[%s6582_s8 + $0x20] ss:$8 sps:$4 sm:$0xff]  }
 0xcc3   : > { %5465 = vmatmul.mubr.bf16.vlgmr.msra.gmra.mrb[72].mxu1 %v3431_v46  ;;  %4004 = vmatpush1.bf16.msra.mxu0 %v5641_v33 }
 0xcd0   : > { %v3404_v45 = vpop.permute.xlu1 %3403 }
 0xcd1   : > { %3425 = vst.msk [vmem:[#allocation2 + $0x18] sm:$0xff] %vm3421_vm4, %v3404_v45  ;;  %v3402_v24 = vpop.permute.xlu0 %3401 }
 0xcd2   : > { %3424 = vst.msk [vmem:[#allocation2 + $0x10] sm:$0xff] %vm3421_vm4, %v3402_v24  ;;  %v5646_v24 = vld [vmem:[%s6582_s8 + $0x34] ss:$8 sps:$4 sm:$0xff]  }
 0xcd3   : > { %4005 = vmatprep.subr.bf16.mxu0 %v5646_v24 }
 0xcd4   : > { %v2166_v44 = vpop.permute.xlu1 %2165 }
 0xcd5   : > { %2185 = vst.msk [vmem:[#allocation2 + $0x28] sm:$0xff] %vm2179_vm2, %v2166_v44  ;;  %v2164_v42 = vpop.permute.xlu0 %2163  ;;  %v5644_v44 = vld [vmem:[%s6582_s8 + $0x30] ss:$8 sps:$4 sm:$0xff]  }
 0xcd6   : > { %2184 = vst.msk [vmem:[#allocation2 + $0x20] sm:$0xff] %vm2179_vm2, %v2164_v42  ;;  %v6066_v42 = vld [vmem:[#allocation12 + $0x30] sm:$0xff]  ;;  %4006 = vmatpush1.bf16.msra.mxu0 %v5644_v44 }
 0xcd8   : > { %v2787_v7 = vpop.permute.xlu1 %2786  ;;  %v3433_v25 = vld [vmem:[#allocation2 + $0x18] sm:$0xff] }
 0xcd9   : > { %2806 = vst.msk [vmem:[#allocation2 + $0x28] sm:$0xff] %vm2800_vm3, %v2787_v7  ;;  %v2785_v28 = vpop.permute.xlu0 %2784  ;;  %v3432_v57 = vld [vmem:[#allocation2 + $0x10] sm:$0xff] }
 0xcda   : > { %2805 = vst.msk [vmem:[#allocation2 + $0x20] sm:$0xff] %vm2800_vm3, %v2785_v28  ;;  %5468 = vmatprep.mubr.bf16.mxu1 %v3432_v57  ;;  %v6067_v28 = vld [vmem:[#allocation12 + $0x38] sm:$0xff] }
 0xcdb   : > { %5469 = vmatmul.mubr.bf16.gmra.mrb[76].mxu1 %v3433_v25  ;;  %v5649_v25 = vld [vmem:[%s6582_s8 + $0x44] ss:$8 sps:$4 sm:$0xff]  }
 0xcdc   : > { %4007 = vmatprep.subr.bf16.mxu0 %v5649_v25 }
 0xd23   : > { %v3408_v53 = vpop.permute.xlu1 %3407 }
 0xd24   : > { %3427 = vst.msk [vmem:[#allocation2 + $0x28] sm:$0xff] %vm3421_vm4, %v3408_v53  ;;  %v3406_v0 = vpop.permute.xlu0 %3405  ;;  %v5647_v53 = vld [vmem:[%s6582_s8 + $0x40] ss:$8 sps:$4 sm:$0xff]  }
 0xd25   : > { %3426 = vst.msk [vmem:[#allocation2 + $0x20] sm:$0xff] %vm3421_vm4, %v3406_v0  ;;  %4008 = vmatpush1.bf16.msra.mxu0 %v5647_v53 }
 0xd27   : > { %v2170_v54 = vpop.permute.xlu1 %2169 }
 0xd28   : > { %2187 = vst.msk [vmem:[#allocation2 + $0x38] sm:$0xff] %vm2179_vm2, %v2170_v54  ;;  %v2168_v61 = vpop.permute.xlu0 %2167 }
 0xd29   : > { %2186 = vst.msk [vmem:[#allocation2 + $0x30] sm:$0xff] %vm2179_vm2, %v2168_v61  ;;  %v5652_v61 = vld [vmem:[%s6582_s8 + $0x54] ss:$8 sps:$4 sm:$0xff]  }
 0xd2a   : > { %4009 = vmatprep.subr.bf16.mxu0 %v5652_v61 }
 0xd2b   : > { %v2791_v36 = vpop.permute.xlu1 %2790  ;;  %v3435_v63 = vld [vmem:[#allocation2 + $0x28] sm:$0xff] }
 0xd2c   : > { %2808 = vst.msk [vmem:[#allocation2 + $0x38] sm:$0xff] %vm2800_vm3, %v2791_v36  ;;  %v2789_v4 = vpop.permute.xlu0 %2788  ;;  %v3434_v41 = vld [vmem:[#allocation2 + $0x20] sm:$0xff]  ;;  %v5650_v36 = vld [vmem:[%s6582_s8 + $0x50] ss:$8 sps:$4 sm:$0xff]  }
 0xd2d   : > { %2807 = vst.msk [vmem:[#allocation2 + $0x30] sm:$0xff] %vm2800_vm3, %v2789_v4  ;;  %5472 = vmatprep.mubr.bf16.mxu1 %v3434_v41  ;;  %4010 = vmatpush1.bf16.msra.mxu0 %v5650_v36  ;;  %v5655_v4 = vld [vmem:[%s6582_s8 + $0x64] ss:$8 sps:$4 sm:$0xff]   ;;  %v5653_v41 = vld [vmem:[%s6582_s8 + $0x60] ss:$8 sps:$4 sm:$0xff]  }
 0xd2e   : > { %5473 = vmatmul.mubr.bf16.gmra.mrb[80].mxu1 %v3435_v63  ;;  %4011 = vmatprep.subr.bf16.mxu0 %v5655_v4  ;;  %v5658_v63 = vld [vmem:[%s6582_s8 + $0x74] ss:$8 sps:$4 sm:$0xff]  }
 0xd2f   : > { %v3412_v34 = vpop.permute.xlu1 %3411 }
 0xd30   : > { %3429 = vst.msk [vmem:[#allocation2 + $0x38] sm:$0xff] %vm3421_vm4, %v3412_v34  ;;  %v3410_v15 = vpop.permute.xlu0 %3409  ;;  %v5656_v34 = vld [vmem:[%s6582_s8 + $0x70] ss:$8 sps:$4 sm:$0xff]  }
 0xd31   : > { %3428 = vst.msk [vmem:[#allocation2 + $0x30] sm:$0xff] %vm3421_vm4, %v3410_v15  ;;  %4012 = vmatpush1.bf16.msra.mxu0 %v5653_v41 }
 0xd32   : > { %4013 = vmatprep.subr.bf16.mxu0 %v5658_v63 }
 0xd35   : > { %4014 = vmatpush1.bf16.msra.mxu0 %v5656_v34 }
 0xd37   : > { %v3437_v56 = vld [vmem:[#allocation2 + $0x38] sm:$0xff] }
 0xd38   : > { %v3436_v59 = vld [vmem:[#allocation2 + $0x30] sm:$0xff] }
 0xd39   : > { %5476 = vmatprep.mubr.bf16.mxu1 %v3436_v59 }
 0xd3a   : > { %5477 = vmatmul.mubr.bf16.gmra.mrb[84].mxu1 %v3437_v56 }
 0xd96   : > { %v5466_v31 = vpop.f32.mrb[72].mxu1 }
 0xd97   : > { %v3540_v60 = vpop.f32.mrb[73].mxu1  ;;  %v3549_v49 = vadd.f32 %v5466_v31, %v8199_v13 }
 0xd98   : > { %v3541_v20 = vadd.f32 %v3540_v60, %v8199_v13  ;;  %v5467_v8 = vpop.f32.mrb[74].mxu1  ;;  %v6068_v60 = vld [vmem:[#allocation12 + $0x40] sm:$0xff] }
 0xd99   : > { %v3543_v47 = vpop.f32.mrb[75].mxu1  ;;  %v3552_v32 = vadd.f32 %v5467_v8, %v8199_v13  ;;  %v8220_v5 = vadd.f32 %v6063_v9, %v3549_v49  ;;  %v6071_v9 = vld [vmem:[#allocation12 + $0x58] sm:$0xff] }
 0xd9a   : > { %v8202_v22 = vadd.f32 %v6060_v51, %v3541_v20  ;;  %v3544_v19 = vadd.f32 %v3543_v47, %v8199_v13  ;;  %v6069_v47 = vld [vmem:[#allocation12 + $0x48] sm:$0xff] }
 0xd9b   : > { %v8212_v6 = vadd.f32 %v6062_v43, %v3552_v32  ;;  %v3669_v37 = vmul.f32 %v8220_v5, %v8220_v5  ;;  %v6070_v43 = vld [vmem:[#allocation12 + $0x50] sm:$0xff] }
 0xd9c   : > { %v8206_v11 = vadd.f32 %v6061_v30, %v3544_v19  ;;  %3619 = vadd.xlane.f32.xlu0 %v8202_v22  ;;  %v3667_v62 = vmul.f32 %v8202_v22, %v8202_v22 }
 0xd9d   : > { %v3670_v26 = vmul.f32 %v8212_v6, %v8212_v6 }
 0xd9e   : > { %3621 = vadd.xlane.f32.xlu1 %v8206_v11  ;;  %v3668_v12 = vmul.f32 %v8206_v11, %v8206_v11 }
 0xda0   : > { %3683 = vadd.xlane.f32.xlu0 %v3667_v62 }
 0xda2   : > { %3625 = vadd.xlane.f32.xlu1 %v8212_v6 }
 0xda4   : > { %3685 = vadd.xlane.f32.xlu0 %v3668_v12 }
 0xda6   : > { %3689 = vadd.xlane.f32.xlu1 %v3670_v26 }
 0xda8   : > { %3623 = vadd.xlane.f32.xlu0 %v8220_v5 }
 0xdac   : > { %3687 = vadd.xlane.f32.xlu0 %v3669_v37 }
 0xdae   : > { %v5470_v58 = vpop.f32.mrb[76].mxu1 }
 0xdaf   : > { %v3556_v21 = vpop.f32.mrb[77].mxu1  ;;  %v3565_v29 = vadd.f32 %v5470_v58, %v8199_v13 }
 0xdb0   : > { %v3557_v38 = vadd.f32 %v3556_v21, %v8199_v13  ;;  %v5471_v18 = vpop.f32.mrb[78].mxu1 }
 0xdb1   : > { %v3559_v16 = vpop.f32.mrb[79].mxu1  ;;  %v3568_v46 = vadd.f32 %v5471_v18, %v8199_v13  ;;  %v8247_v7 = vadd.f32 %v6066_v42, %v3565_v29  ;;  %v6074_v29 = vld [vmem:[#allocation12 + $0x70] sm:$0xff] }
 0xdb2   : > { %v8230_v52 = vadd.f32 %v6064_v14, %v3557_v38  ;;  %v3560_v27 = vadd.f32 %v3559_v16, %v8199_v13 }
 0xdb3   : > { %v8249_v57 = vadd.f32 %v6067_v28, %v3568_v46  ;;  %v3673_v0 = vmul.f32 %v8247_v7, %v8247_v7  ;;  %v6075_v46 = vld [vmem:[#allocation12 + $0x78] sm:$0xff] }
 0xdb4   : > { %v8233_v48 = vadd.f32 %v6065_v50, %v3560_v27  ;;  %3627 = vadd.xlane.f32.xlu0 %v8230_v52  ;;  %v3671_v55 = vmul.f32 %v8230_v52, %v8230_v52 }
 0xdb5   : > { %v3674_v54 = vmul.f32 %v8249_v57, %v8249_v57 }
 0xdb6   : > { %3629 = vadd.xlane.f32.xlu1 %v8233_v48  ;;  %v3672_v45 = vmul.f32 %v8233_v48, %v8233_v48 }
 0xdb8   : > { %3691 = vadd.xlane.f32.xlu0 %v3671_v55 }
 0xdba   : > { %3693 = vadd.xlane.f32.xlu1 %v3672_v45 }
 0xdbc   : > { %3631 = vadd.xlane.f32.xlu0 %v8247_v7 }
 0xdbe   : > { %3633 = vadd.xlane.f32.xlu1 %v8249_v57 }
 0xdc0   : > { %3695 = vadd.xlane.f32.xlu0 %v3673_v0 }
 0xdc2   : > { %3697 = vadd.xlane.f32.xlu1 %v3674_v54 }
 0xe01   : > { %v5474_v15 = vpop.f32.mrb[80].mxu1 }
 0xe02   : > { %v3572_v59 = vpop.f32.mrb[81].mxu1  ;;  %v3581_v19 = vadd.f32 %v5474_v15, %v8199_v13 }
 0xe03   : > { %v3573_v56 = vadd.f32 %v3572_v59, %v8199_v13  ;;  %v5475_v1 = vpop.f32.mrb[82].mxu1 }
 0xe04   : > { %v3575_v31 = vpop.f32.mrb[83].mxu1  ;;  %v3584_v30 = vadd.f32 %v5475_v1, %v8199_v13  ;;  %v8279_v49 = vadd.f32 %v6070_v43, %v3581_v19 }
 0xe05   : > { %v8266_v20 = vadd.f32 %v6068_v60, %v3573_v56  ;;  %v3576_v8 = vadd.f32 %v3575_v31, %v8199_v13 }
 0xe06   : > { %v8281_v37 = vadd.f32 %v6071_v9, %v3584_v30  ;;  %v3677_v21 = vmul.f32 %v8279_v49, %v8279_v49 }
 0xe07   : > { %v8269_v51 = vadd.f32 %v6069_v47, %v3576_v8  ;;  %3635 = vadd.xlane.f32.xlu0 %v8266_v20  ;;  %v3675_v32 = vmul.f32 %v8266_v20, %v8266_v20 }
 0xe08   : > { %v3678_v18 = vmul.f32 %v8281_v37, %v8281_v37 }
 0xe09   : > { %3637 = vadd.xlane.f32.xlu1 %v8269_v51  ;;  %v3676_v62 = vmul.f32 %v8269_v51, %v8269_v51 }
 0xe0b   : > { %3699 = vadd.xlane.f32.xlu0 %v3675_v32 }
 0xe0d   : > { %3701 = vadd.xlane.f32.xlu1 %v3676_v62  ;;  %v5478_v12 = vpop.f32.mrb[84].mxu1 }
 0xe0e   : > { %v3588_v26 = vpop.f32.mrb[85].mxu1  ;;  %v3597_v27 = vadd.f32 %v5478_v12, %v8199_v13 }
 0xe0f   : > { %3639 = vadd.xlane.f32.xlu0 %v8279_v49  ;;  %v5479_v2 = vpop.f32.mrb[86].mxu1  ;;  %v3589_v58 = vadd.f32 %v3588_v26, %v8199_v13 }
 0xe10   : > { %v3591_v35 = vpop.f32.mrb[87].mxu1  ;;  %v3600_v3 = vadd.f32 %v5479_v2, %v8199_v13  ;;  %v8303_v55 = vadd.f32 %v6074_v29, %v3597_v27 }
 0xe11   : > { %3641 = vadd.xlane.f32.xlu1 %v8281_v37  ;;  %v3592_v38 = vadd.f32 %v3591_v35, %v8199_v13  ;;  %v8291_v16 = vadd.f32 %v6072_v10, %v3589_v58  ;;  %v3845_v35 = vsub.s32 2, %v8840_v40 }
 0xe12   : > { %v8305_v45 = vadd.f32 %v6075_v46, %v3600_v3  ;;  %v3681_v24 = vmul.f32 %v8303_v55, %v8303_v55 }
 0xe13   : > { %3703 = vadd.xlane.f32.xlu0 %v3677_v21  ;;  %v8293_v14 = vadd.f32 %v6073_v39, %v3592_v38  ;;  %v3679_v50 = vmul.f32 %v8291_v16, %v8291_v16  ;;  %v8316_v27 = vrot.slane %v8196_v17, %v3845_v35 }
 0xe14   : > { %v3682_v13 = vmul.f32 %v8305_v45, %v8305_v45 }
 0xe15   : > { %3705 = vadd.xlane.f32.xlu1 %v3678_v18  ;;  %v3680_v33 = vmul.f32 %v8293_v14, %v8293_v14 }
 0xe17   : > { %3643 = vadd.xlane.f32.xlu0 %v8291_v16 }
 0xe19   : > { %3645 = vadd.xlane.f32.xlu1 %v8293_v14 }
 0xe1b   : > { %3707 = vadd.xlane.f32.xlu0 %v3679_v50  ;;  %v3865_v50 = vsub.s32 3, %v8840_v40 }
 0xe1d   : > { %3709 = vadd.xlane.f32.xlu1 %v3680_v33 }
 0xe1f   : > { %3647 = vadd.xlane.f32.xlu0 %v8303_v55 }
 0xe21   : > { %3649 = vadd.xlane.f32.xlu1 %v8305_v45 }
 0xe23   : > { %3711 = vadd.xlane.f32.xlu0 %v3681_v24 }
 0xe25   : > { %3713 = vadd.xlane.f32.xlu1 %v3682_v13 }
 0xe29   : > { %v3620_v44 = vpop.xlane.xlu0 %3619 }
 0xe2a   : > { %v3651_v42 = vmul.f32 0.0078125, %v3620_v44 }
 0xe2b   : > { %v3622_v28 = vpop.xlane.xlu1 %3621 }
 0xe2c   : > { %v3731_v53 = vmul.f32 %v3651_v42, %v3651_v42  ;;  %v3652_v0 = vmul.f32 0.0078125, %v3622_v28  ;;  %v3779_v21 = vsub.f32 %v8202_v22, %v3651_v42  ;;  %v8324_v28 = vrot.slane %v8196_v17, %v3865_v50 }
 0xe2d   : > { %v3684_v25 = vpop.xlane.xlu0 %3683 }
 0xe2e   : > { %v3715_v54 = vmul.f32 0.0078125, %v3684_v25  ;;  %v3732_v63 = vmul.f32 %v3652_v0, %v3652_v0  ;;  %v3780_v33 = vsub.f32 %v8206_v11, %v3652_v0 }
 0xe2f   : > { %v3626_v61 = vpop.xlane.xlu1 %3625 }
 0xe30   : > { %v3747_v36 = vsub.f32 %v3715_v54, %v3731_v53  ;;  %v3654_v4 = vmul.f32 0.0078125, %v3626_v61 }
 0xe31   : > { %v3686_v41 = vpop.xlane.xlu0 %3685 }
 0xe32   : > { %v3763_v34 = vmax.f32 %v3747_v36, 0.0  ;;  %v3716_v15 = vmul.f32 0.0078125, %v3686_v41  ;;  %v3734_v1 = vmul.f32 %v3654_v4, %v3654_v4  ;;  %v3782_v61 = vsub.f32 %v8212_v6, %v3654_v4 }
 0xe33   : > { %v3690_v59 = vpop.xlane.xlu1 %3689 }
 0xe34   : > { %v3795_v56 = vadd.f32 1e-06, %v3763_v34  ;;  %v3748_v31 = vsub.f32 %v3716_v15, %v3732_v63  ;;  %v3718_v60 = vmul.f32 0.0078125, %v3690_v59 }
 0xe35   : > { %v3624_v8 = vpop.xlane.xlu0 %3623 }
 0xe36   : > { %5963 = vrsqrt.f32 %v3795_v56  ;;  %v3764_v47 = vmax.f32 %v3748_v31, 0.0  ;;  %v3750_v19 = vsub.f32 %v3718_v60, %v3734_v1  ;;  %v3653_v32 = vmul.f32 0.0078125, %v3624_v8 }
 0xe38   : > { %v3796_v30 = vadd.f32 1e-06, %v3764_v47  ;;  %v3766_v62 = vmax.f32 %v3750_v19, 0.0  ;;  %v3733_v26 = vmul.f32 %v3653_v32, %v3653_v32  ;;  %v3781_v8 = vsub.f32 %v8220_v5, %v3653_v32 }
 0xe39   : > { %v3688_v43 = vpop.xlane.xlu0 %3687 }
 0xe3a   : > { %5965 = vrsqrt.f32 %v3796_v30  ;;  %v3798_v12 = vadd.f32 1e-06, %v3766_v62  ;;  %v3717_v9 = vmul.f32 0.0078125, %v3688_v43 }
 0xe3c   : > { %5967 = vrsqrt.f32 %v3798_v12  ;;  %v3749_v2 = vsub.f32 %v3717_v9, %v3733_v26 }
 0xe3e   : > { %v3765_v58 = vmax.f32 %v3749_v2, 0.0 }
 0xe40   : > { %v5964_v38 = vpop.eup %5963  ;;  %v3797_v18 = vadd.f32 1e-06, %v3765_v58 }
 0xe41   : > { %v3827_v10 = vmul.f32 %v5964_v38, %v3779_v21  ;;  %v3628_v39 = vpop.xlane.xlu0 %3627 }
 0xe42   : > { %5969 = vrsqrt.f32 %v3797_v18  ;;  %v8319_v3 = vmul.f32 0.0078125, %v3628_v39 }
 0xe43   : > { %v3630_v29 = vpop.xlane.xlu1 %3629  ;;  %v3847_v42 = vmul.f32 %v8316_v27, %v3827_v10 }
 0xe44   : > { %v5966_v46 = vpop.eup %5965  ;;  %v3656_v24 = vmul.f32 0.0078125, %v3630_v29  ;;  %v3735_v53 = vmul.f32 %v8319_v3, %v8319_v3 }
 0xe45   : > { %v3828_v13 = vmul.f32 %v5966_v46, %v3780_v33  ;;  %v3692_v44 = vpop.xlane.xlu0 %3691  ;;  %v3867_v59 = vadd.f32 %v8324_v28, %v3847_v42 }
 0xe46   : > { %v5968_v25 = vpop.eup %5967  ;;  %v3719_v54 = vmul.f32 0.0078125, %v3692_v44  ;;  %v3736_v41 = vmul.f32 %v3656_v24, %v3656_v24 }
 0xe47   : > { %v3694_v36 = vpop.xlane.xlu1 %3693  ;;  %v3848_v0 = vmul.f32 %v8316_v27, %v3828_v13  ;;  %v3830_v17 = vmul.f32 %v5968_v25, %v3782_v61  ;;  %v3783_v25 = vsub.f32 %v8230_v52, %v8319_v3 }
 0xe48   : > { %v3751_v63 = vsub.f32 %v3719_v54, %v3735_v53  ;;  %v3720_v34 = vmul.f32 0.0078125, %v3694_v36  ;;  %v3784_v54 = vsub.f32 %v8233_v48, %v3656_v24 }
 0xe49   : > { %v3632_v15 = vpop.xlane.xlu0 %3631  ;;  %v3868_v56 = vadd.f32 %v8324_v28, %v3848_v0  ;;  %v3850_v9 = vmul.f32 %v8316_v27, %v3830_v17 }
 0xe4a   : > { %v3767_v1 = vmax.f32 %v3751_v63, 0.0  ;;  %v3752_v31 = vsub.f32 %v3720_v34, %v3736_v41  ;;  %v3657_v60 = vmul.f32 0.0078125, %v3632_v15 }
 0xe4b   : > { %v3634_v47 = vpop.xlane.xlu1 %3633  ;;  %v3883_v19 = vpack.c.bf16 %v3868_v56, %v3867_v59  ;;  %v3870_v50 = vadd.f32 %v8324_v28, %v3850_v9 }
 0xe4c   : > { %v5970_v4 = vpop.eup %5969  ;;  %v3799_v30 = vadd.f32 1e-06, %v3767_v1  ;;  %v3768_v62 = vmax.f32 %v3752_v31, 0.0  ;;  %v3658_v43 = vmul.f32 0.0078125, %v3634_v47  ;;  %v3737_v35 = vmul.f32 %v3657_v60, %v3657_v60 }
 0xe4d   : > { %v3696_v12 = vpop.xlane.xlu0 %3695  ;;  %4032 = vmatmul.mubr.bf16.vlgmr.msra.gmra.mrb[88].mxu0 %v3883_v19  ;;  %v3829_v26 = vmul.f32 %v5970_v4, %v3781_v8  ;;  %v3785_v34 = vsub.f32 %v8247_v7, %v3657_v60 }
 0xe4e   : > { %5971 = vrsqrt.f32 %v3799_v30  ;;  %v3800_v2 = vadd.f32 1e-06, %v3768_v62  ;;  %v3721_v58 = vmul.f32 0.0078125, %v3696_v12  ;;  %4041 = vmatprep.mubr.bf16.mxu0 %v8825_v23  ;;  %v3738_v38 = vmul.f32 %v3658_v43, %v3658_v43 }
 0xe4f   : > { %v3698_v21 = vpop.xlane.xlu1 %3697  ;;  %v3849_v32 = vmul.f32 %v8316_v27, %v3829_v26  ;;  %v3786_v3 = vsub.f32 %v8249_v57, %v3658_v43 }
 0xe50   : > { %5973 = vrsqrt.f32 %v3800_v2  ;;  %v3753_v18 = vsub.f32 %v3721_v58, %v3737_v35  ;;  %v3722_v10 = vmul.f32 0.0078125, %v3698_v21 }
 0xe51   : > { %v3869_v39 = vadd.f32 %v8324_v28, %v3849_v32 }
 0xe52   : > { %v3769_v33 = vmax.f32 %v3753_v18, 0.0  ;;  %v3754_v29 = vsub.f32 %v3722_v10, %v3738_v38 }
 0xe53   : > { %v3884_v46 = vpack.c.bf16 %v3870_v50, %v3869_v39 }
 0xe54   : > { %v3801_v13 = vadd.f32 1e-06, %v3769_v33  ;;  %v3770_v44 = vmax.f32 %v3754_v29, 0.0 }
 0xe55   : > { %4042 = vmatmul.mubr.bf16.gmra.mrb[92].mxu0 %v3884_v46 }
 0xe56   : > { %5975 = vrsqrt.f32 %v3801_v13  ;;  %v3802_v42 = vadd.f32 1e-06, %v3770_v44  ;;  %4051 = vmatprep.mubr.bf16.mxu0 %v8825_v23 }
 0xe58   : > { %v5972_v53 = vpop.eup %5971  ;;  %5977 = vrsqrt.f32 %v3802_v42 }
 0xe59   : > { %v3831_v61 = vmul.f32 %v5972_v53, %v3783_v25 }
 0xe5a   : > { %v5974_v36 = vpop.eup %5973 }
 0xe5b   : > { %v3832_v0 = vmul.f32 %v5974_v36, %v3784_v54  ;;  %v3851_v41 = vmul.f32 %v8316_v27, %v3831_v61 }
 0xe5d   : > { %v3852_v63 = vmul.f32 %v8316_v27, %v3832_v0  ;;  %v3871_v15 = vadd.f32 %v8324_v28, %v3851_v41  ;;  %v5659_v0 = vld [vmem:[%s6584_s15 + $0x40] sm:$0xff]  }
 0xe5e   : > { %5128 = vmatprep.subr.bf16.mxu0 %v5659_v0  ;;  %5480 = vmatprep.subr.bf16.mxu1 %v5659_v0 }
 0xe5f   : > { %v3872_v59 = vadd.f32 %v8324_v28, %v3852_v63  ;;  %v5660_v63 = vld [vmem:[%s6584_s15] sm:$0xff]  }
 0xe60   : > { %v5976_v56 = vpop.eup %5975  ;;  %5129 = vmatpush3.bf16.msra.mxu0 %v5660_v63  ;;  %5488 = vmatpush3.bf16.msra.mxu1 %v5660_v63 }
 0xe61   : > { %v3885_v17 = vpack.c.bf16 %v3872_v59, %v3871_v15  ;;  %v3833_v1 = vmul.f32 %v5976_v56, %v3785_v34 }
 0xe62   : > { %v5978_v31 = vpop.eup %5977 }
 0xe63   : > { %4052 = vmatmul.mubr.bf16.gmra.mrb[96].mxu0 %v3885_v17  ;;  %v3834_v24 = vmul.f32 %v5978_v31, %v3786_v3  ;;  %v3853_v8 = vmul.f32 %v8316_v27, %v3833_v1  ;;  %v5661_v1 = vld [vmem:[%s6584_s15 + $0x48] sm:$0xff]  }
 0xe64   : > { %4061 = vmatprep.mubr.bf16.mxu0 %v8825_v23  ;;  %5130 = vmatprep.subr.bf16.mxu0 %v5661_v1 }
 0xe65   : > { %v3854_v47 = vmul.f32 %v8316_v27, %v3834_v24  ;;  %v3873_v60 = vadd.f32 %v8324_v28, %v3853_v8  ;;  %v5662_v8 = vld [vmem:[%s6584_s15 + $0x8] sm:$0xff]   ;;  %5481 = vmatprep.subr.bf16.mxu1 %v5661_v1 }
 0xe66   : > { %5131 = vmatpush3.bf16.msra.mxu0 %v5662_v8  ;;  %5489 = vmatpush3.bf16.msra.mxu1 %v5662_v8  ;;  %v5667_v8 = vld [vmem:[%s6584_s15 + $0x60] sm:$0xff]  }
 0xe67   : > { %v3874_v19 = vadd.f32 %v8324_v28, %v3854_v47 }
 0xe69   : > { %v3886_v4 = vpack.c.bf16 %v3874_v19, %v3873_v60 }
 0xe6b   : > { %4062 = vmatmul.mubr.bf16.gmra.mrb[100].mxu0 %v3886_v4 }
 0xe6c   : > { %4071 = vmatprep.mubr.bf16.mxu0 %v8825_v23 }
 0xe94   : > { %v3636_v30 = vpop.xlane.xlu0 %3635 }
 0xe95   : > { %v8354_v62 = vmul.f32 0.0078125, %v3636_v30 }
 0xe96   : > { %v3638_v43 = vpop.xlane.xlu1 %3637 }
 0xe97   : > { %v8356_v12 = vmul.f32 0.0078125, %v3638_v43  ;;  %v3739_v9 = vmul.f32 %v8354_v62, %v8354_v62  ;;  %v3787_v4 = vsub.f32 %v8266_v20, %v8354_v62 }
 0xe98   : > { %v3700_v26 = vpop.xlane.xlu0 %3699 }
 0xe99   : > { %v3723_v2 = vmul.f32 0.0078125, %v3700_v26  ;;  %v3740_v58 = vmul.f32 %v8356_v12, %v8356_v12 }
 0xe9a   : > { %v3702_v35 = vpop.xlane.xlu1 %3701 }
 0xe9b   : > { %v3755_v21 = vsub.f32 %v3723_v2, %v3739_v9  ;;  %v3724_v32 = vmul.f32 0.0078125, %v3702_v35  ;;  %v5663_v35 = vld [vmem:[%s6584_s15 + $0x50] sm:$0xff]  }
 0xe9c   : > { %v3640_v38 = vpop.xlane.xlu0 %3639  ;;  %5132 = vmatprep.subr.bf16.mxu0 %v5663_v35  ;;  %5482 = vmatprep.subr.bf16.mxu1 %v5663_v35 }
 0xe9d   : > { %v3771_v18 = vmax.f32 %v3755_v21, 0.0  ;;  %v3756_v10 = vsub.f32 %v3724_v32, %v3740_v58  ;;  %v8362_v39 = vmul.f32 0.0078125, %v3640_v38  ;;  %v3788_v58 = vsub.f32 %v8269_v51, %v8356_v12  ;;  %v5664_v38 = vld [vmem:[%s6584_s15 + $0x10] sm:$0xff]  }
 0xe9e   : > { %v3642_v50 = vpop.xlane.xlu1 %3641  ;;  %5133 = vmatpush3.bf16.msra.mxu0 %v5664_v38  ;;  %5490 = vmatpush3.bf16.msra.mxu1 %v5664_v38 }
 0xe9f   : > { %v3803_v33 = vadd.f32 1e-06, %v3771_v18  ;;  %v3772_v29 = vmax.f32 %v3756_v10, 0.0  ;;  %v8364_v46 = vmul.f32 0.0078125, %v3642_v50  ;;  %v3741_v42 = vmul.f32 %v8362_v39, %v8362_v39 }
 0xea0   : > { %v3704_v13 = vpop.xlane.xlu0 %3703  ;;  %v3789_v63 = vsub.f32 %v8279_v49, %v8362_v39 }
 0xea1   : > { %5979 = vrsqrt.f32 %v3803_v33  ;;  %v3804_v44 = vadd.f32 1e-06, %v3772_v29  ;;  %v3725_v25 = vmul.f32 0.0078125, %v3704_v13  ;;  %v3742_v54 = vmul.f32 %v8364_v46, %v8364_v46 }
 0xea2   : > { %v3706_v53 = vpop.xlane.xlu1 %3705 }
 0xea3   : > { %5981 = vrsqrt.f32 %v3804_v44  ;;  %v3757_v61 = vsub.f32 %v3725_v25, %v3741_v42  ;;  %v3726_v36 = vmul.f32 0.0078125, %v3706_v53  ;;  %v5665_v42 = vld [vmem:[%s6584_s15 + $0x58] sm:$0xff]  }
 0xea4   : > { %v3644_v41 = vpop.xlane.xlu0 %3643  ;;  %5134 = vmatprep.subr.bf16.mxu0 %v5665_v42  ;;  %5483 = vmatprep.subr.bf16.mxu1 %v5665_v42 }
 0xea5   : > { %v3773_v34 = vmax.f32 %v3757_v61, 0.0  ;;  %v3758_v15 = vsub.f32 %v3726_v36, %v3742_v54  ;;  %v8372_v59 = vmul.f32 0.0078125, %v3644_v41  ;;  %v5666_v61 = vld [vmem:[%s6584_s15 + $0x18] sm:$0xff]  }
 0xea6   : > { %v3646_v56 = vpop.xlane.xlu1 %3645  ;;  %5135 = vmatpush3.bf16.msra.mxu0 %v5666_v61  ;;  %5491 = vmatpush3.bf16.msra.mxu1 %v5666_v61 }
 0xea7   : > { %v3805_v3 = vadd.f32 1e-06, %v3773_v34  ;;  %v3774_v17 = vmax.f32 %v3758_v15, 0.0  ;;  %v8375_v31 = vmul.f32 0.0078125, %v3646_v56  ;;  %v3743_v60 = vmul.f32 %v8372_v59, %v8372_v59  ;;  %5136 = vmatprep.subr.bf16.mxu0 %v5667_v8  ;;  %5484 = vmatprep.subr.bf16.mxu1 %v5667_v8 }
 0xea8   : > { %v3708_v24 = vpop.xlane.xlu0 %3707  ;;  %v3791_v38 = vsub.f32 %v8291_v16, %v8372_v59 }
 0xea9   : > { %5983 = vrsqrt.f32 %v3805_v3  ;;  %v3806_v47 = vadd.f32 1e-06, %v3774_v17  ;;  %v3727_v19 = vmul.f32 0.0078125, %v3708_v24  ;;  %v3744_v26 = vmul.f32 %v8375_v31, %v8375_v31 }
 0xeaa   : > { %v3710_v30 = vpop.xlane.xlu1 %3709 }
 0xeab   : > { %v5980_v43 = vpop.eup %5979  ;;  %5985 = vrsqrt.f32 %v3806_v47  ;;  %v3759_v9 = vsub.f32 %v3727_v19, %v3743_v60  ;;  %v3728_v2 = vmul.f32 0.0078125, %v3710_v30  ;;  %v3790_v47 = vsub.f32 %v8281_v37, %v8364_v46  ;;  %v5668_v19 = vld [vmem:[%s6584_s15 + $0x20] sm:$0xff]   ;;  %v5669_v46 = vld [vmem:[%s6584_s15 + $0x68] sm:$0xff]  }
 0xeac   : > { %v3648_v21 = vpop.xlane.xlu0 %3647  ;;  %v3835_v32 = vmul.f32 %v5980_v43, %v3787_v4  ;;  %5492 = vmatpush3.bf16.msra.mxu1 %v5668_v19  ;;  %5137 = vmatpush3.bf16.msra.mxu0 %v5668_v19  ;;  %v8842_v19 = vsub.s32 1, %v8840_v40 }
 0xead   : > { %v5982_v18 = vpop.eup %5981  ;;  %v3775_v62 = vmax.f32 %v3759_v9, 0.0  ;;  %v3760_v10 = vsub.f32 %v3728_v2, %v3744_v26  ;;  %v8388_v50 = vmul.f32 0.0078125, %v3648_v21  ;;  %v5670_v21 = vld [vmem:[%s6584_s15 + $0x28] sm:$0xff]   ;;  %5138 = vmatprep.subr.bf16.mxu0 %v5669_v46  ;;  %5485 = vmatprep.subr.bf16.mxu1 %v5669_v46 }
 0xeae   : > { %v3650_v33 = vpop.xlane.xlu1 %3649  ;;  %v3836_v29 = vmul.f32 %v5982_v18, %v3788_v58  ;;  %v3855_v13 = vmul.f32 %v8316_v27, %v3835_v32 }
 0xeaf   : > { %v3807_v44 = vadd.f32 1e-06, %v3775_v62  ;;  %v3776_v12 = vmax.f32 %v3760_v10, 0.0  ;;  %v8392_v25 = vmul.f32 0.0078125, %v3650_v33  ;;  %v3745_v0 = vmul.f32 %v8388_v50, %v8388_v50  ;;  %v5671_v33 = vld [vmem:[%s6584_s15 + $0x70] sm:$0xff]  }
 0xeb0   : > { %v3712_v53 = vpop.xlane.xlu0 %3711  ;;  %v3856_v54 = vmul.f32 %v8316_v27, %v3836_v29  ;;  %v3875_v15 = vadd.f32 %v8324_v28, %v3855_v13  ;;  %5493 = vmatpush3.bf16.msra.mxu1 %v5670_v21  ;;  %5139 = vmatpush3.bf16.msra.mxu0 %v5670_v21  ;;  %v3792_v29 = vsub.f32 %v8293_v14, %v8375_v31 }
 0xeb1   : > { %5987 = vrsqrt.f32 %v3807_v44  ;;  %v3808_v36 = vadd.f32 1e-06, %v3776_v12  ;;  %v3729_v41 = vmul.f32 0.0078125, %v3712_v53  ;;  %v3746_v17 = vmul.f32 %v8392_v25, %v8392_v25  ;;  %v5672_v12 = vld [vmem:[%s6584_s15 + $0x30] sm:$0xff]   ;;  %5140 = vmatprep.subr.bf16.mxu0 %v5671_v33  ;;  %5486 = vmatprep.subr.bf16.mxu1 %v5671_v33 }
 0xeb2   : > { %v3714_v34 = vpop.xlane.xlu1 %3713  ;;  %v3876_v56 = vadd.f32 %v8324_v28, %v3856_v54  ;;  %v3793_v31 = vsub.f32 %v8303_v55, %v8388_v50 }
 0xeb3   : > { %v5984_v3 = vpop.eup %5983  ;;  %5989 = vrsqrt.f32 %v3808_v36  ;;  %v3761_v1 = vsub.f32 %v3729_v41, %v3745_v0  ;;  %v3730_v24 = vmul.f32 0.0078125, %v3714_v34  ;;  %v5673_v0 = vld [vmem:[%s6584_s15 + $0x78] sm:$0xff]   ;;  %v3794_v34 = vsub.f32 %v8305_v45, %v8392_v25 }
 0xeb4   : > { %v3887_v60 = vpack.c.bf16 %v3876_v56, %v3875_v15  ;;  %v3837_v39 = vmul.f32 %v5984_v3, %v3789_v63  ;;  %5494 = vmatpush3.bf16.msra.mxu1 %v5672_v12  ;;  %5141 = vmatpush3.bf16.msra.mxu0 %v5672_v12  ;;  %v5674_v63 = vld [vmem:[%s6584_s15 + $0x38] sm:$0xff]  }
 0xeb5   : > { %v5986_v4 = vpop.eup %5985  ;;  %v3777_v30 = vmax.f32 %v3761_v1, 0.0  ;;  %v3762_v43 = vsub.f32 %v3730_v24, %v3746_v17  ;;  %5142 = vmatprep.subr.bf16.mxu0 %v5673_v0  ;;  %5487 = vmatprep.subr.bf16.mxu1 %v5673_v0 }
 0xeb6   : > { %4072 = vmatmul.mubr.bf16.gmra.mrb[104].mxu0 %v3887_v60  ;;  %v3838_v26 = vmul.f32 %v5986_v4, %v3790_v47  ;;  %v3857_v9 = vmul.f32 %v8316_v27, %v3837_v39  ;;  %v3907_v47 = vld [vmem:[%s6600_s21] sm:$0x3]  ;;  %v8841_v60 = vsub.s32 0, %v8840_v40 }
 0xeb7   : > { %v3809_v2 = vadd.f32 1e-06, %v3777_v30  ;;  %v3778_v35 = vmax.f32 %v3762_v43, 0.0  ;;  %4081 = vmatprep.mubr.bf16.mxu0 %v8825_v23  ;;  %v8444_v4 = vrot.slane %v3907_v47, %v8842_v19 }
 0xeb8   : > { %v3858_v58 = vmul.f32 %v8316_v27, %v3838_v26  ;;  %v3877_v18 = vadd.f32 %v8324_v28, %v3857_v9  ;;  %5143 = vmatpush3.bf16.msra.mxu0 %v5674_v63  ;;  %5495 = vmatpush3.bf16.msra.mxu1 %v5674_v63  ;;  %v8440_v39 = vrot.slane %v3907_v47, %v8841_v60 }
 0xeb9   : > { %5991 = vrsqrt.f32 %v3809_v2  ;;  %v3810_v32 = vadd.f32 1e-06, %v3778_v35 }
 0xeba   : > { %v3878_v62 = vadd.f32 %v8324_v28, %v3858_v58 }
 0xebb   : > { %v5988_v10 = vpop.eup %5987  ;;  %5993 = vrsqrt.f32 %v3810_v32 }
 0xebc   : > { %v3888_v13 = vpack.c.bf16 %v3878_v62, %v3877_v18  ;;  %v3839_v44 = vmul.f32 %v5988_v10, %v3791_v38 }
 0xebd   : > { %v5990_v42 = vpop.eup %5989 }
 0xebe   : > { %4082 = vmatmul.mubr.bf16.gmra.mrb[108].mxu0 %v3888_v13  ;;  %v3840_v59 = vmul.f32 %v5990_v42, %v3792_v29  ;;  %v3859_v53 = vmul.f32 %v8316_v27, %v3839_v44 }
 0xebf   : > { %4091 = vmatprep.mubr.bf16.mxu0 %v8825_v23 }
 0xec0   : > { %v3860_v54 = vmul.f32 %v8316_v27, %v3840_v59  ;;  %v3879_v61 = vadd.f32 %v8324_v28, %v3859_v53 }
 0xec2   : > { %v3880_v36 = vadd.f32 %v8324_v28, %v3860_v54 }
 0xec3   : > { %v5992_v41 = vpop.eup %5991 }
 0xec4   : > { %v3889_v15 = vpack.c.bf16 %v3880_v36, %v3879_v61  ;;  %v3841_v56 = vmul.f32 %v5992_v41, %v3793_v31 }
 0xec5   : > { %v5994_v3 = vpop.eup %5993 }
 0xec6   : > { %4092 = vmatmul.mubr.bf16.gmra.mrb[112].mxu0 %v3889_v15  ;;  %v3842_v50 = vmul.f32 %v5994_v3, %v3794_v34  ;;  %v3861_v17 = vmul.f32 %v8316_v27, %v3841_v56 }
 0xec7   : > { %4101 = vmatprep.mubr.bf16.mxu0 %v8825_v23 }
 0xec8   : > { %v3862_v1 = vmul.f32 %v8316_v27, %v3842_v50  ;;  %v3881_v24 = vadd.f32 %v8324_v28, %v3861_v17 }
 0xeca   : > { %v3882_v25 = vadd.f32 %v8324_v28, %v3862_v1 }
 0xecc   : > { %v3890_v8 = vpack.c.bf16 %v3882_v25, %v3881_v24 }
 0xece   : > { %4102 = vmatmul.mubr.bf16.gmra.mrb[116].mxu0 %v3890_v8 }
 0xf20   : > { %v4033_v30 = vpop.f32.mrb[88].mxu0 }
 0xf21   : > { %v8447_v23 = vadd.f32 %v4033_v30, %v8440_v39  ;;  %v4035_v27 = vpop.f32.mrb[89].mxu0 }
 0xf22   : > { %v8450_v43 = vadd.f32 %v4035_v27, %v8444_v4  ;;  %v4037_v28 = vpop.f32.mrb[90].mxu0 }
 0xf23   : > { %v4112_v26 = vmul.f32 %v8447_v23, %v8447_v23  ;;  %v8455_v9 = vadd.f32 %v4037_v28, %v8440_v39  ;;  %v4039_v2 = vpop.f32.mrb[91].mxu0 }
 0xf24   : > { %v4113_v35 = vmul.f32 %v8450_v43, %v8450_v43  ;;  %v8460_v46 = vadd.f32 %v4039_v2, %v8444_v4 }
 0xf25   : > { %v4144_v58 = vmul.f32 %v4112_v26, %v8447_v23  ;;  %v4114_v21 = vmul.f32 %v8455_v9, %v8455_v9 }
 0xf26   : > { %v4145_v32 = vmul.f32 %v4113_v35, %v8450_v43  ;;  %v4115_v38 = vmul.f32 %v8460_v46, %v8460_v46 }
 0xf27   : > { %v4176_v18 = vmul.f32 0.044715, %v4144_v58  ;;  %v4146_v62 = vmul.f32 %v4114_v21, %v8455_v9 }
 0xf28   : > { %v4177_v10 = vmul.f32 0.044715, %v4145_v32  ;;  %v4147_v33 = vmul.f32 %v4115_v38, %v8460_v46  ;;  %v4043_v29 = vpop.f32.mrb[92].mxu0 }
 0xf29   : > { %v4208_v13 = vadd.f32 %v4176_v18, %v8447_v23  ;;  %v4178_v44 = vmul.f32 0.044715, %v4146_v62  ;;  %v8472_v12 = vadd.f32 %v4043_v29, %v8440_v39  ;;  %v4045_v42 = vpop.f32.mrb[93].mxu0 }
 0xf2a   : > { %v4209_v59 = vadd.f32 %v4177_v10, %v8450_v43  ;;  %v4179_v53 = vmul.f32 0.044715, %v4147_v33  ;;  %v8476_v54 = vadd.f32 %v4045_v42, %v8444_v4  ;;  %v4047_v31 = vpop.f32.mrb[94].mxu0 }
 0xf2b   : > { %v4240_v61 = vmul.f32 0.7978846, %v4208_v13  ;;  %v4210_v36 = vadd.f32 %v4178_v44, %v8455_v9  ;;  %v4116_v0 = vmul.f32 %v8472_v12, %v8472_v12  ;;  %v8482_v41 = vadd.f32 %v4047_v31, %v8440_v39  ;;  %v4049_v63 = vpop.f32.mrb[95].mxu0 }
 0xf2c   : > { %v4241_v34 = vmul.f32 0.7978846, %v4209_v59  ;;  %v4211_v15 = vadd.f32 %v4179_v53, %v8460_v46  ;;  %v4117_v56 = vmul.f32 %v8476_v54, %v8476_v54  ;;  %v8488_v3 = vadd.f32 %v4049_v63, %v8444_v4 }
 0xf2d   : > { %5995 = vtanh.f32 %v4240_v61  ;;  %v4242_v50 = vmul.f32 0.7978846, %v4210_v36  ;;  %v4148_v17 = vmul.f32 %v4116_v0, %v8472_v12  ;;  %v4118_v1 = vmul.f32 %v8482_v41, %v8482_v41 }
 0xf2e   : > { %5997 = vtanh.f32 %v4241_v34  ;;  %v4243_v24 = vmul.f32 0.7978846, %v4211_v15  ;;  %v4149_v25 = vmul.f32 %v4117_v56, %v8476_v54  ;;  %v4119_v8 = vmul.f32 %v8488_v3, %v8488_v3 }
 0xf2f   : > { %5999 = vtanh.f32 %v4242_v50  ;;  %v4180_v47 = vmul.f32 0.044715, %v4148_v17  ;;  %v4150_v60 = vmul.f32 %v4118_v1, %v8482_v41 }
 0xf30   : > { %6001 = vtanh.f32 %v4243_v24  ;;  %v4181_v19 = vmul.f32 0.044715, %v4149_v25  ;;  %v4151_v30 = vmul.f32 %v4119_v8, %v8488_v3 }
 0xf31   : > { %v4212_v27 = vadd.f32 %v4180_v47, %v8472_v12  ;;  %v4182_v28 = vmul.f32 0.044715, %v4150_v60 }
 0xf32   : > { %v4213_v26 = vadd.f32 %v4181_v19, %v8476_v54  ;;  %v4183_v2 = vmul.f32 0.044715, %v4151_v30 }
 0xf33   : > { %v4244_v35 = vmul.f32 0.7978846, %v4212_v27  ;;  %v4214_v58 = vadd.f32 %v4182_v28, %v8482_v41 }
 0xf34   : > { %v4245_v21 = vmul.f32 0.7978846, %v4213_v26  ;;  %v4215_v32 = vadd.f32 %v4183_v2, %v8488_v3 }
 0xf35   : > { %6003 = vtanh.f32 %v4244_v35  ;;  %v4246_v38 = vmul.f32 0.7978846, %v4214_v58 }
 0xf36   : > { %v4247_v18 = vmul.f32 0.7978846, %v4215_v32  ;;  %v4053_v62 = vpop.f32.mrb[96].mxu0 }
 0xf37   : > { %v5996_v10 = vpop.eup %5995  ;;  %6005 = vtanh.f32 %v4246_v38  ;;  %v8503_v33 = vadd.f32 %v4053_v62, %v8440_v39  ;;  %v4055_v29 = vpop.f32.mrb[97].mxu0 }
 0xf38   : > { %v5998_v13 = vpop.eup %5997  ;;  %v4304_v44 = vadd.f32 1.0, %v5996_v10  ;;  %6007 = vtanh.f32 %v4245_v21  ;;  %v8506_v42 = vadd.f32 %v4055_v29, %v8444_v4  ;;  %v4057_v59 = vpop.f32.mrb[98].mxu0 }
 0xf39   : > { %v6000_v53 = vpop.eup %5999  ;;  %6009 = vtanh.f32 %v4247_v18  ;;  %v4120_v31 = vmul.f32 %v8503_v33, %v8503_v33  ;;  %v8511_v61 = vadd.f32 %v4057_v59, %v8440_v39  ;;  %v4059_v36 = vpop.f32.mrb[99].mxu0  ;;  %v4305_v0 = vadd.f32 1.0, %v5998_v13 }
 0xf3a   : > { %v6002_v63 = vpop.eup %6001  ;;  %v4336_v34 = vmul.f32 0.5, %v4304_v44  ;;  %v4306_v15 = vadd.f32 1.0, %v6000_v53  ;;  %v4121_v56 = vmul.f32 %v8506_v42, %v8506_v42  ;;  %v8516_v50 = vadd.f32 %v4059_v36, %v8444_v4 }
 0xf3b   : > { %v4152_v17 = vmul.f32 %v4120_v31, %v8503_v33  ;;  %v4122_v1 = vmul.f32 %v8511_v61, %v8511_v61  ;;  %v4307_v24 = vadd.f32 1.0, %v6002_v63  ;;  %v4337_v25 = vmul.f32 0.5, %v4305_v0 }
 0xf3c   : > { %v4338_v8 = vmul.f32 0.5, %v4306_v15  ;;  %v4153_v47 = vmul.f32 %v4121_v56, %v8506_v42  ;;  %v4123_v60 = vmul.f32 %v8516_v50, %v8516_v50  ;;  %v4368_v19 = vmul.f32 %v4336_v34, %v8447_v23 }
 0xf3d   : > { %v4184_v30 = vmul.f32 0.044715, %v4152_v17  ;;  %v4154_v27 = vmul.f32 %v4122_v1, %v8511_v61  ;;  %v4339_v28 = vmul.f32 0.5, %v4307_v24  ;;  %v4369_v21 = vmul.f32 %v4337_v25, %v8450_v43 }
 0xf3e   : > { %v4370_v26 = vmul.f32 %v4338_v8, %v8455_v9  ;;  %v4185_v2 = vmul.f32 0.044715, %v4153_v47  ;;  %v4155_v35 = vmul.f32 %v4123_v60, %v8516_v50  ;;  %v4063_v58 = vpop.f32.mrb[100].mxu0 }
 0xf3f   : > { %v6004_v32 = vpop.eup %6003  ;;  %v4216_v38 = vadd.f32 %v4184_v30, %v8503_v33  ;;  %v4186_v18 = vmul.f32 0.044715, %v4154_v27  ;;  %v8531_v62 = vadd.f32 %v4063_v58, %v8440_v39  ;;  %v4065_v23 = vpop.f32.mrb[101].mxu0  ;;  %v4371_v10 = vmul.f32 %v4339_v28, %v8460_v46 }
 0xf40   : > { %v4400_v29 = vpack.c.bf16 %v4370_v26, %v4368_v19  ;;  %v4308_v13 = vadd.f32 1.0, %v6004_v32  ;;  %v4217_v9 = vadd.f32 %v4185_v2, %v8506_v42  ;;  %v4187_v44 = vmul.f32 0.044715, %v4155_v35  ;;  %v4067_v59 = vpop.f32.mrb[102].mxu0 }
 0xf41   : > { %v6006_v53 = vpop.eup %6005  ;;  %v4248_v31 = vmul.f32 0.7978846, %v4216_v38  ;;  %v4218_v43 = vadd.f32 %v4186_v18, %v8511_v61  ;;  %v4124_v36 = vmul.f32 %v8531_v62, %v8531_v62  ;;  %v8539_v0 = vadd.f32 %v4065_v23, %v8444_v4  ;;  %v4069_v63 = vpop.f32.mrb[103].mxu0 }
 0xf42   : > { %v6008_v34 = vpop.eup %6007  ;;  %v4340_v15 = vmul.f32 0.5, %v4308_v13  ;;  %v4310_v46 = vadd.f32 1.0, %v6006_v53  ;;  %v4249_v56 = vmul.f32 0.7978846, %v4217_v9  ;;  %v4219_v17 = vadd.f32 %v4187_v44, %v8516_v50 }
 0xf43   : > { %v6010_v1 = vpop.eup %6009  ;;  %6011 = vtanh.f32 %v4248_v31  ;;  %v4250_v24 = vmul.f32 0.7978846, %v4218_v43  ;;  %v4156_v25 = vmul.f32 %v4124_v36, %v8531_v62  ;;  %v4125_v8 = vmul.f32 %v8539_v0, %v8539_v0 }
 0xf44   : > { %v4372_v47 = vmul.f32 %v4340_v15, %v8472_v12  ;;  %v4342_v60 = vmul.f32 0.5, %v4310_v46  ;;  %6013 = vtanh.f32 %v4249_v56  ;;  %v4251_v19 = vmul.f32 0.7978846, %v4219_v17 }
 0xf45   : > { %6015 = vtanh.f32 %v4250_v24  ;;  %v4188_v30 = vmul.f32 0.044715, %v4156_v25  ;;  %v4157_v27 = vmul.f32 %v4125_v8, %v8539_v0  ;;  %v8548_v28 = vadd.f32 %v4067_v59, %v8440_v39 }
 0xf46   : > { %v4374_v26 = vmul.f32 %v4342_v60, %v8482_v41  ;;  %6017 = vtanh.f32 %v4251_v19  ;;  %v8552_v2 = vadd.f32 %v4069_v63, %v8444_v4  ;;  %v4401_v35 = vpack.c.bf16 %v4371_v10, %v4369_v21 }
 0xf47   : > { %v4220_v58 = vadd.f32 %v4188_v30, %v8531_v62  ;;  %v4189_v12 = vmul.f32 0.044715, %v4157_v27  ;;  %v4126_v32 = vmul.f32 %v8548_v28, %v8548_v28  ;;  %v4309_v38 = vadd.f32 1.0, %v6008_v34 }
 0xf48   : > { %v4402_v18 = vpack.c.bf16 %v4374_v26, %v4372_v47  ;;  %v4127_v23 = vmul.f32 %v8552_v2, %v8552_v2  ;;  %4580 = vmatprep.mubr.bf16.mxu0 %v4401_v35  ;;  %v4311_v13 = vadd.f32 1.0, %v6010_v1 }
 0xf49   : > { %v4252_v9 = vmul.f32 0.7978846, %v4220_v58  ;;  %v4221_v41 = vadd.f32 %v4189_v12, %v8539_v0  ;;  %v4158_v44 = vmul.f32 %v4126_v32, %v8548_v28  ;;  %4581 = vmatmul.mubr.bf16.vlgmr.msra.gmra.mrb[120].mxu0 %v4400_v29  ;;  %v4341_v21 = vmul.f32 0.5, %v4309_v38 }
 0xf4a   : > { %v4159_v10 = vmul.f32 %v4127_v23, %v8552_v2  ;;  %v4343_v59 = vmul.f32 0.5, %v4311_v13 }
 0xf4b   : > { %6019 = vtanh.f32 %v4252_v9  ;;  %v4253_v53 = vmul.f32 0.7978846, %v4221_v41  ;;  %v4190_v31 = vmul.f32 0.044715, %v4158_v44  ;;  %v4373_v36 = vmul.f32 %v4341_v21, %v8476_v54 }
 0xf4c   : > { %v4191_v43 = vmul.f32 0.044715, %v4159_v10  ;;  %v4375_v63 = vmul.f32 %v4343_v59, %v8488_v3 }
 0xf4d   : > { %v6012_v34 = vpop.eup %6011  ;;  %6021 = vtanh.f32 %v4253_v53  ;;  %v4222_v15 = vadd.f32 %v4190_v31, %v8548_v28 }
 0xf4e   : > { %v6014_v46 = vpop.eup %6013  ;;  %v4223_v56 = vadd.f32 %v4191_v43, %v8552_v2  ;;  %v4403_v29 = vpack.c.bf16 %v4375_v63, %v4373_v36  ;;  %v4312_v17 = vadd.f32 1.0, %v6012_v34 }
 0xf4f   : > { %v6016_v1 = vpop.eup %6015  ;;  %v4254_v24 = vmul.f32 0.7978846, %v4222_v15  ;;  %v4313_v25 = vadd.f32 1.0, %v6014_v46 }
 0xf50   : > { %v6018_v8 = vpop.eup %6017  ;;  %v4255_v47 = vmul.f32 0.7978846, %v4223_v56  ;;  %4588 = vmatprep.mubr.bf16.mxu1 %v4403_v29  ;;  %v4314_v60 = vadd.f32 1.0, %v6016_v1  ;;  %v4344_v19 = vmul.f32 0.5, %v4312_v17 }
 0xf51   : > { %6023 = vtanh.f32 %v4254_v24  ;;  %4589 = vmatmul.mubr.bf16.vlgmr.msra.gmra.mrb[88].mxu1 %v4402_v18  ;;  %v4315_v54 = vadd.f32 1.0, %v6018_v8  ;;  %v4345_v3 = vmul.f32 0.5, %v4313_v25 }
 0xf52   : > { %6025 = vtanh.f32 %v4255_v47  ;;  %v4346_v30 = vmul.f32 0.5, %v4314_v60  ;;  %v4376_v26 = vmul.f32 %v4344_v19, %v8503_v33 }
 0xf53   : > { %v4347_v27 = vmul.f32 0.5, %v4315_v54  ;;  %v4377_v12 = vmul.f32 %v4345_v3, %v8506_v42 }
 0xf54   : > { %v4378_v35 = vmul.f32 %v4346_v30, %v8511_v61 }
 0xf55   : > { %v6020_v58 = vpop.eup %6019  ;;  %v4379_v32 = vmul.f32 %v4347_v27, %v8516_v50 }
 0xf56   : > { %v4404_v38 = vpack.c.bf16 %v4378_v35, %v4376_v26  ;;  %v4316_v9 = vadd.f32 1.0, %v6020_v58 }
 0xf57   : > { %v6022_v23 = vpop.eup %6021  ;;  %v4405_v13 = vpack.c.bf16 %v4379_v32, %v4377_v12 }
 0xf58   : > { %v4317_v18 = vadd.f32 1.0, %v6022_v23  ;;  %v4348_v10 = vmul.f32 0.5, %v4316_v9 }
 0xf59   : > { %4596 = vmatprep.mubr.bf16.mxu1 %v4405_v13 }
 0xf5a   : > { %4597 = vmatmul.mubr.bf16.gmra.mrb[92].mxu1 %v4404_v38  ;;  %v4349_v33 = vmul.f32 0.5, %v4317_v18  ;;  %v4380_v31 = vmul.f32 %v4348_v10, %v8531_v62 }
 0xf5b   : > { %v6024_v41 = vpop.eup %6023 }
 0xf5c   : > { %v6026_v44 = vpop.eup %6025  ;;  %v4318_v21 = vadd.f32 1.0, %v6024_v41  ;;  %v4381_v50 = vmul.f32 %v4349_v33, %v8539_v0 }
 0xf5d   : > { %v4319_v59 = vadd.f32 1.0, %v6026_v44 }
 0xf5e   : > { %v4350_v53 = vmul.f32 0.5, %v4318_v21 }
 0xf5f   : > { %v4351_v61 = vmul.f32 0.5, %v4319_v59 }
 0xf60   : > { %v4382_v42 = vmul.f32 %v4350_v53, %v8548_v28 }
 0xf61   : > { %v4383_v43 = vmul.f32 %v4351_v61, %v8552_v2 }
 0xf62   : > { %v4406_v36 = vpack.c.bf16 %v4382_v42, %v4380_v31 }
 0xf63   : > { %v4407_v63 = vpack.c.bf16 %v4383_v43, %v4381_v50 }
 0xf65   : > { %4604 = vmatprep.mubr.bf16.mxu1 %v4407_v63 }
 0xf66   : > { %4605 = vmatmul.mubr.bf16.gmra.mrb[96].mxu1 %v4406_v36 }
 0xf89   : > { %v4073_v34 = vpop.f32.mrb[104].mxu0 }
 0xf8a   : > { %v8575_v15 = vadd.f32 %v4073_v34, %v8440_v39  ;;  %v4075_v46 = vpop.f32.mrb[105].mxu0 }
 0xf8b   : > { %v8578_v56 = vadd.f32 %v4075_v46, %v8444_v4  ;;  %v4077_v29 = vpop.f32.mrb[106].mxu0 }
 0xf8c   : > { %v4128_v62 = vmul.f32 %v8575_v15, %v8575_v15  ;;  %v8583_v0 = vadd.f32 %v4077_v29, %v8440_v39  ;;  %v4079_v28 = vpop.f32.mrb[107].mxu0 }
 0xf8d   : > { %v4129_v2 = vmul.f32 %v8578_v56, %v8578_v56  ;;  %v8588_v17 = vadd.f32 %v4079_v28, %v8444_v4 }
 0xf8e   : > { %v4160_v1 = vmul.f32 %v4128_v62, %v8575_v15  ;;  %v4130_v24 = vmul.f32 %v8583_v0, %v8583_v0 }
 0xf8f   : > { %v4161_v25 = vmul.f32 %v4129_v2, %v8578_v56  ;;  %v4131_v8 = vmul.f32 %v8588_v17, %v8588_v17 }
 0xf90   : > { %v4192_v47 = vmul.f32 0.044715, %v4160_v1  ;;  %v4162_v60 = vmul.f32 %v4130_v24, %v8583_v0 }
 0xf91   : > { %v4193_v19 = vmul.f32 0.044715, %v4161_v25  ;;  %v4163_v54 = vmul.f32 %v4131_v8, %v8588_v17  ;;  %v4083_v3 = vpop.f32.mrb[108].mxu0 }
 0xf92   : > { %v4224_v30 = vadd.f32 %v4192_v47, %v8575_v15  ;;  %v4194_v27 = vmul.f32 0.044715, %v4162_v60  ;;  %v8600_v26 = vadd.f32 %v4083_v3, %v8440_v39  ;;  %v4085_v35 = vpop.f32.mrb[109].mxu0 }
 0xf93   : > { %v4225_v58 = vadd.f32 %v4193_v19, %v8578_v56  ;;  %v4195_v12 = vmul.f32 0.044715, %v4163_v54  ;;  %v8604_v32 = vadd.f32 %v4085_v35, %v8444_v4  ;;  %v4087_v38 = vpop.f32.mrb[110].mxu0 }
 0xf94   : > { %v4256_v23 = vmul.f32 0.7978846, %v4224_v30  ;;  %v4226_v13 = vadd.f32 %v4194_v27, %v8583_v0  ;;  %v4132_v9 = vmul.f32 %v8600_v26, %v8600_v26  ;;  %v8610_v18 = vadd.f32 %v4087_v38, %v8440_v39  ;;  %v4089_v41 = vpop.f32.mrb[111].mxu0 }
 0xf95   : > { %v4257_v44 = vmul.f32 0.7978846, %v4225_v58  ;;  %v4227_v21 = vadd.f32 %v4195_v12, %v8588_v17  ;;  %v4133_v10 = vmul.f32 %v8604_v32, %v8604_v32  ;;  %v8616_v59 = vadd.f32 %v4089_v41, %v8444_v4 }
 0xf96   : > { %6027 = vtanh.f32 %v4256_v23  ;;  %v4258_v33 = vmul.f32 0.7978846, %v4226_v13  ;;  %v4164_v53 = vmul.f32 %v4132_v9, %v8600_v26  ;;  %v4134_v61 = vmul.f32 %v8610_v18, %v8610_v18 }
 0xf97   : > { %6029 = vtanh.f32 %v4257_v44  ;;  %v4259_v31 = vmul.f32 0.7978846, %v4227_v21  ;;  %v4165_v42 = vmul.f32 %v4133_v10, %v8604_v32  ;;  %v4135_v50 = vmul.f32 %v8616_v59, %v8616_v59 }
 0xf98   : > { %6031 = vtanh.f32 %v4258_v33  ;;  %v4196_v43 = vmul.f32 0.044715, %v4164_v53  ;;  %v4166_v36 = vmul.f32 %v4134_v61, %v8610_v18 }
 0xf99   : > { %v4197_v63 = vmul.f32 0.044715, %v4165_v42  ;;  %v4167_v34 = vmul.f32 %v4135_v50, %v8616_v59  ;;  %v4093_v46 = vpop.f32.mrb[112].mxu0  ;;  %6033 = vtanh.f32 %v4259_v31 }
 0xf9a   : > { %v4228_v29 = vadd.f32 %v4196_v43, %v8600_v26  ;;  %v4198_v62 = vmul.f32 0.044715, %v4166_v36  ;;  %v8628_v28 = vadd.f32 %v4093_v46, %v8440_v39  ;;  %v4095_v2 = vpop.f32.mrb[113].mxu0 }
 0xf9b   : > { %v4229_v1 = vadd.f32 %v4197_v63, %v8604_v32  ;;  %v4199_v24 = vmul.f32 0.044715, %v4167_v34  ;;  %v8632_v25 = vadd.f32 %v4095_v2, %v8444_v4  ;;  %v4097_v8 = vpop.f32.mrb[114].mxu0 }
 0xf9c   : > { %v4260_v47 = vmul.f32 0.7978846, %v4228_v29  ;;  %v4230_v60 = vadd.f32 %v4198_v62, %v8610_v18  ;;  %v4136_v19 = vmul.f32 %v8628_v28, %v8628_v28  ;;  %v8638_v54 = vadd.f32 %v4097_v8, %v8440_v39  ;;  %v4099_v3 = vpop.f32.mrb[115].mxu0 }
 0xf9d   : > { %v4261_v30 = vmul.f32 0.7978846, %v4229_v1  ;;  %v4231_v27 = vadd.f32 %v4199_v24, %v8616_v59  ;;  %v4137_v35 = vmul.f32 %v8632_v25, %v8632_v25  ;;  %v8644_v58 = vadd.f32 %v4099_v3, %v8444_v4 }
 0xf9e   : > { %6035 = vtanh.f32 %v4260_v47  ;;  %v4262_v12 = vmul.f32 0.7978846, %v4230_v60  ;;  %v4168_v38 = vmul.f32 %v4136_v19, %v8628_v28  ;;  %v4138_v23 = vmul.f32 %v8638_v54, %v8638_v54 }
 0xf9f   : > { %6037 = vtanh.f32 %v4261_v30  ;;  %v4263_v13 = vmul.f32 0.7978846, %v4231_v27  ;;  %v4169_v9 = vmul.f32 %v4137_v35, %v8632_v25  ;;  %v4139_v41 = vmul.f32 %v8644_v58, %v8644_v58 }
 0xfa0   : > { %v6028_v44 = vpop.eup %6027  ;;  %6039 = vtanh.f32 %v4262_v12  ;;  %v4200_v21 = vmul.f32 0.044715, %v4168_v38  ;;  %v4170_v10 = vmul.f32 %v4138_v23, %v8638_v54 }
 0xfa1   : > { %v6030_v33 = vpop.eup %6029  ;;  %6041 = vtanh.f32 %v4263_v13  ;;  %v4201_v53 = vmul.f32 0.044715, %v4169_v9  ;;  %v4171_v61 = vmul.f32 %v4139_v41, %v8644_v58  ;;  %v4103_v31 = vpop.f32.mrb[116].mxu0  ;;  %v4320_v42 = vadd.f32 1.0, %v6028_v44 }
 0xfa2   : > { %v6032_v50 = vpop.eup %6031  ;;  %v4232_v43 = vadd.f32 %v4200_v21, %v8628_v28  ;;  %v4202_v36 = vmul.f32 0.044715, %v4170_v10  ;;  %v8656_v63 = vadd.f32 %v4103_v31, %v8440_v39  ;;  %v4105_v34 = vpop.f32.mrb[117].mxu0  ;;  %v4321_v46 = vadd.f32 1.0, %v6030_v33 }
 0xfa3   : > { %v4233_v29 = vadd.f32 %v4201_v53, %v8632_v25  ;;  %v4203_v62 = vmul.f32 0.044715, %v4171_v61  ;;  %v8660_v2 = vadd.f32 %v4105_v34, %v8444_v4  ;;  %v4107_v1 = vpop.f32.mrb[118].mxu0  ;;  %v4322_v24 = vadd.f32 1.0, %v6032_v50  ;;  %v6034_v30 = vpop.eup %6033 }
 0xfa4   : > { %v4264_v8 = vmul.f32 0.7978846, %v4232_v43  ;;  %v4234_v47 = vadd.f32 %v4202_v36, %v8638_v54  ;;  %v4140_v60 = vmul.f32 %v8656_v63, %v8656_v63  ;;  %v8666_v19 = vadd.f32 %v4107_v1, %v8440_v39  ;;  %v4109_v3 = vpop.f32.mrb[119].mxu0 }
 0xfa5   : > { %v4265_v27 = vmul.f32 0.7978846, %v4233_v29  ;;  %v4235_v35 = vadd.f32 %v4203_v62, %v8644_v58  ;;  %v4141_v12 = vmul.f32 %v8660_v2, %v8660_v2  ;;  %v8672_v38 = vadd.f32 %v4109_v3, %v8444_v4 }
 0xfa6   : > { %6043 = vtanh.f32 %v4264_v8  ;;  %v4266_v23 = vmul.f32 0.7978846, %v4234_v47  ;;  %v4172_v13 = vmul.f32 %v4140_v60, %v8656_v63  ;;  %v4142_v9 = vmul.f32 %v8666_v19, %v8666_v19 }
 0xfa7   : > { %6045 = vtanh.f32 %v4265_v27  ;;  %v4267_v39 = vmul.f32 0.7978846, %v4235_v35  ;;  %v4173_v41 = vmul.f32 %v4141_v12, %v8660_v2  ;;  %v4143_v44 = vmul.f32 %v8672_v38, %v8672_v38 }
 0xfa8   : > { %v6036_v21 = vpop.eup %6035  ;;  %6047 = vtanh.f32 %v4266_v23  ;;  %v4204_v10 = vmul.f32 0.044715, %v4172_v13  ;;  %v4174_v4 = vmul.f32 %v4142_v9, %v8666_v19  ;;  %v4323_v33 = vadd.f32 1.0, %v6034_v30 }
 0xfa9   : > { %v6038_v53 = vpop.eup %6037  ;;  %6049 = vtanh.f32 %v4267_v39  ;;  %v4205_v61 = vmul.f32 0.044715, %v4173_v41  ;;  %v4175_v31 = vmul.f32 %v4143_v44, %v8672_v38  ;;  %v4353_v50 = vmul.f32 0.5, %v4321_v46 }
 0xfaa   : > { %v6040_v43 = vpop.eup %6039  ;;  %v4236_v36 = vadd.f32 %v4204_v10, %v8656_v63  ;;  %v4206_v34 = vmul.f32 0.044715, %v4174_v4  ;;  %v4355_v29 = vmul.f32 0.5, %v4323_v33  ;;  %v4352_v62 = vmul.f32 0.5, %v4320_v42 }
 0xfab   : > { %v6042_v1 = vpop.eup %6041  ;;  %v4237_v8 = vadd.f32 %v4205_v61, %v8660_v2  ;;  %v4207_v47 = vmul.f32 0.044715, %v4175_v31  ;;  %v4385_v60 = vmul.f32 %v4353_v50, %v8578_v56  ;;  %v4354_v3 = vmul.f32 0.5, %v4322_v24 }
 0xfac   : > { %v4268_v30 = vmul.f32 0.7978846, %v4236_v36  ;;  %v4238_v27 = vadd.f32 %v4206_v34, %v8666_v19  ;;  %v4387_v35 = vmul.f32 %v4355_v29, %v8588_v17  ;;  %v4384_v46 = vmul.f32 %v4352_v62, %v8575_v15 }
 0xfad   : > { %v4269_v12 = vmul.f32 0.7978846, %v4237_v8  ;;  %v4239_v23 = vadd.f32 %v4207_v47, %v8672_v38  ;;  %v4386_v13 = vmul.f32 %v4354_v3, %v8583_v0  ;;  %v4325_v42 = vadd.f32 1.0, %v6038_v53 }
 0xfae   : > { %6051 = vtanh.f32 %v4268_v30  ;;  %v4270_v9 = vmul.f32 0.7978846, %v4238_v27  ;;  %v4409_v39 = vpack.c.bf16 %v4387_v35, %v4385_v60  ;;  %v4327_v41 = vadd.f32 1.0, %v6042_v1 }
 0xfaf   : > { %6053 = vtanh.f32 %v4269_v12  ;;  %v4271_v56 = vmul.f32 0.7978846, %v4239_v23  ;;  %v4408_v24 = vpack.c.bf16 %v4386_v13, %v4384_v46  ;;  %v4357_v44 = vmul.f32 0.5, %v4325_v42 }
 0xfb0   : > { %v6044_v10 = vpop.eup %6043  ;;  %6055 = vtanh.f32 %v4270_v9  ;;  %4612 = vmatprep.mubr.bf16.mxu1 %v4409_v39  ;;  %v4359_v17 = vmul.f32 0.5, %v4327_v41  ;;  %v4324_v4 = vadd.f32 1.0, %v6036_v21  ;;  %v4326_v15 = vadd.f32 1.0, %v6040_v43 }
 0xfb1   : > { %v6046_v33 = vpop.eup %6045  ;;  %6057 = vtanh.f32 %v4271_v56  ;;  %4613 = vmatmul.mubr.bf16.gmra.mrb[100].mxu1 %v4408_v24  ;;  %v4389_v0 = vmul.f32 %v4357_v44, %v8604_v32  ;;  %v4328_v53 = vadd.f32 1.0, %v6044_v10 }
 0xfb2   : > { %v6048_v61 = vpop.eup %6047  ;;  %v4391_v31 = vmul.f32 %v4359_v17, %v8616_v59  ;;  %v4356_v50 = vmul.f32 0.5, %v4324_v4  ;;  %v4358_v36 = vmul.f32 0.5, %v4326_v15  ;;  %v4329_v34 = vadd.f32 1.0, %v6046_v33 }
 0xfb3   : > { %v6050_v29 = vpop.eup %6049  ;;  %v4330_v62 = vadd.f32 1.0, %v6048_v61  ;;  %v4360_v1 = vmul.f32 0.5, %v4328_v53  ;;  %v4450_v33 = vsub.s32 7, %v8840_v40  ;;  %v6076_v53 = vld [vmem:[%s6595_s16] sm:$0xff] }
 0xfb4   : > { %v4411_v8 = vpack.c.bf16 %v4391_v31, %v4389_v0  ;;  %v4388_v47 = vmul.f32 %v4356_v50, %v8600_v26  ;;  %v4390_v21 = vmul.f32 %v4358_v36, %v8610_v18  ;;  %v4331_v43 = vadd.f32 1.0, %v6050_v29 }
 0xfb5   : > { %v4361_v60 = vmul.f32 0.5, %v4329_v34  ;;  %v4362_v3 = vmul.f32 0.5, %v4330_v62  ;;  %v4392_v27 = vmul.f32 %v4360_v1, %v8628_v28  ;;  %v8704_v61 = vrot.slane %v6076_v53, %v4450_v33 }
 0xfb6   : > { %4620 = vmatprep.mubr.bf16.mxu1 %v4411_v8  ;;  %v4410_v32 = vpack.c.bf16 %v4390_v21, %v4388_v47  ;;  %v4363_v30 = vmul.f32 0.5, %v4331_v43 }
 0xfb7   : > { %v4394_v59 = vmul.f32 %v4362_v3, %v8638_v54  ;;  %v4393_v46 = vmul.f32 %v4361_v60, %v8632_v25 }
 0xfb8   : > { %v6052_v35 = vpop.eup %6051  ;;  %v4395_v12 = vmul.f32 %v4363_v30, %v8644_v58 }
 0xfb9   : > { %v6054_v23 = vpop.eup %6053  ;;  %4621 = vmatmul.mubr.bf16.gmra.mrb[104].mxu1 %v4410_v32  ;;  %v4412_v26 = vpack.c.bf16 %v4394_v59, %v4392_v27  ;;  %v4332_v13 = vadd.f32 1.0, %v6052_v35 }
 0xfba   : > { %v6056_v18 = vpop.eup %6055  ;;  %v4413_v42 = vpack.c.bf16 %v4395_v12, %v4393_v46  ;;  %v4333_v9 = vadd.f32 1.0, %v6054_v23 }
 0xfbb   : > { %v6058_v39 = vpop.eup %6057  ;;  %v4334_v41 = vadd.f32 1.0, %v6056_v18  ;;  %v4364_v56 = vmul.f32 0.5, %v4332_v13 }
 0xfbc   : > { %4628 = vmatprep.mubr.bf16.mxu1 %v4413_v42  ;;  %v4335_v28 = vadd.f32 1.0, %v6058_v39  ;;  %v4365_v24 = vmul.f32 0.5, %v4333_v9 }
 0xfbd   : > { %v4366_v54 = vmul.f32 0.5, %v4334_v41  ;;  %v4396_v25 = vmul.f32 %v4364_v56, %v8656_v63 }
 0xfbe   : > { %v4367_v44 = vmul.f32 0.5, %v4335_v28  ;;  %v4397_v10 = vmul.f32 %v4365_v24, %v8660_v2 }
 0xfbf   : > { %v4398_v58 = vmul.f32 %v4366_v54, %v8666_v19 }
 0xfc0   : > { %v4399_v17 = vmul.f32 %v4367_v44, %v8672_v38 }
 0xfc1   : > { %4629 = vmatmul.mubr.bf16.gmra.mrb[108].mxu1 %v4412_v26  ;;  %v4414_v4 = vpack.c.bf16 %v4398_v58, %v4396_v25 }
 0xfc2   : > { %v4415_v15 = vpack.c.bf16 %v4399_v17, %v4397_v10 }
 0xfc4   : > { %4636 = vmatprep.mubr.bf16.mxu1 %v4415_v15 }
 0xfc9   : > { %4637 = vmatmul.mubr.bf16.gmra.mrb[112].mxu1 %v4414_v4 }
0x101c   : > { %v5144_v0 = vpop.f32.mrb[120].mxu0 }
0x101d   : > { %v5145_v31 = vpop.f32.mrb[121].mxu0 }
0x101e   : > { %v5146_v50 = vadd.f32 %v5145_v31, %v5144_v0  ;;  %v5147_v63 = vpop.f32.mrb[122].mxu0 }
0x101f   : > { %v5148_v36 = vpop.f32.mrb[123].mxu0 }
0x1020   : > { %v4583_v19 = vadd.f32 %v5146_v50, %v8704_v61  ;;  %v5149_v2 = vadd.f32 %v5148_v36, %v5147_v63 }
0x1022   : > { %v4645_v38 = vadd.f32 %v4583_v19, %v8202_v22  ;;  %v4586_v34 = vadd.f32 %v5149_v2, %v8704_v61 }
0x1024   : > { %4661 = vst [vmem:[#allocation12] sm:$0xff] %v4645_v38  ;;  %v4646_v29 = vadd.f32 %v4586_v34, %v8206_v11  ;;  %v5150_v62 = vpop.f32.mrb[88].mxu1 }
0x1025   : > { %v5151_v40 = vpop.f32.mrb[89].mxu1 }
0x1026   : > { %4662 = vst [vmem:[#allocation12 + $0x8] sm:$0xff] %v4646_v29  ;;  %v5152_v1 = vadd.f32 %v5151_v40, %v5150_v62  ;;  %v5153_v8 = vpop.f32.mrb[90].mxu1 }
0x1027   : > { %v5154_v47 = vpop.f32.mrb[91].mxu1 }
0x1028   : > { %v4591_v21 = vadd.f32 %v5152_v1, %v8704_v61  ;;  %v5155_v43 = vadd.f32 %v5154_v47, %v5153_v8 }
0x102a   : > { %v4647_v60 = vadd.f32 %v4591_v21, %v8220_v5  ;;  %v4594_v3 = vadd.f32 %v5155_v43, %v8704_v61 }
0x102c   : > { %4663 = vst [vmem:[#allocation12 + $0x10] sm:$0xff] %v4647_v60  ;;  %v4648_v22 = vadd.f32 %v4594_v3, %v8212_v6 }
0x102d   : > { %v5156_v32 = vpop.f32.mrb[92].mxu1 }
0x102e   : > { %4664 = vst [vmem:[#allocation12 + $0x18] sm:$0xff] %v4648_v22  ;;  %v5157_v30 = vpop.f32.mrb[93].mxu1 }
0x102f   : > { %v5158_v11 = vadd.f32 %v5157_v30, %v5156_v32  ;;  %v5159_v27 = vpop.f32.mrb[94].mxu1 }
0x1030   : > { %v5160_v59 = vpop.f32.mrb[95].mxu1 }
0x1031   : > { %v4599_v35 = vadd.f32 %v5158_v11, %v8704_v61  ;;  %v5161_v46 = vadd.f32 %v5160_v59, %v5159_v27 }
0x1033   : > { %v4649_v12 = vadd.f32 %v4599_v35, %v8230_v52  ;;  %v4602_v23 = vadd.f32 %v5161_v46, %v8704_v61 }
0x1035   : > { %4665 = vst [vmem:[#allocation12 + $0x20] sm:$0xff] %v4649_v12  ;;  %v4650_v5 = vadd.f32 %v4602_v23, %v8233_v48 }
0x1037   : > { %4666 = vst [vmem:[#allocation12 + $0x28] sm:$0xff] %v4650_v5 }
0x1039   : > { %v5162_v26 = vpop.f32.mrb[96].mxu1 }
0x103a   : > { %v5163_v13 = vpop.f32.mrb[97].mxu1 }
0x103b   : > { %v5164_v6 = vadd.f32 %v5163_v13, %v5162_v26  ;;  %v5165_v18 = vpop.f32.mrb[98].mxu1 }
0x103c   : > { %v5166_v42 = vpop.f32.mrb[99].mxu1 }
0x103d   : > { %v4607_v9 = vadd.f32 %v5164_v6, %v8704_v61  ;;  %v5167_v39 = vadd.f32 %v5166_v42, %v5165_v18 }
0x103f   : > { %v4651_v41 = vadd.f32 %v4607_v9, %v8247_v7  ;;  %v4610_v56 = vadd.f32 %v5167_v39, %v8704_v61 }
0x1041   : > { %4667 = vst [vmem:[#allocation12 + $0x30] sm:$0xff] %v4651_v41  ;;  %v4652_v52 = vadd.f32 %v4610_v56, %v8249_v57 }
0x1043   : > { %4668 = vst [vmem:[#allocation12 + $0x38] sm:$0xff] %v4652_v52 }
0x1084   : > { %v5168_v28 = vpop.f32.mrb[100].mxu1 }
0x1085   : > { %v5169_v24 = vpop.f32.mrb[101].mxu1 }
0x1086   : > { %v5170_v48 = vadd.f32 %v5169_v24, %v5168_v28  ;;  %v5171_v54 = vpop.f32.mrb[102].mxu1 }
0x1087   : > { %v5172_v44 = vpop.f32.mrb[103].mxu1 }
0x1088   : > { %v4615_v25 = vadd.f32 %v5170_v48, %v8704_v61  ;;  %v5173_v58 = vadd.f32 %v5172_v44, %v5171_v54 }
0x108a   : > { %v4653_v10 = vadd.f32 %v4615_v25, %v8266_v20  ;;  %v4618_v17 = vadd.f32 %v5173_v58, %v8704_v61 }
0x108c   : > { %4669 = vst [vmem:[#allocation12 + $0x40] sm:$0xff] %v4653_v10  ;;  %v4654_v7 = vadd.f32 %v4618_v17, %v8269_v51  ;;  %v5174_v4 = vpop.f32.mrb[104].mxu1 }
0x108d   : > { %v5175_v15 = vpop.f32.mrb[105].mxu1 }
0x108e   : > { %4670 = vst [vmem:[#allocation12 + $0x48] sm:$0xff] %v4654_v7  ;;  %v5176_v57 = vadd.f32 %v5175_v15, %v5174_v4  ;;  %v5177_v33 = vpop.f32.mrb[106].mxu1 }
0x108f   : > { %v5178_v0 = vpop.f32.mrb[107].mxu1 }
0x1090   : > { %v4623_v53 = vadd.f32 %v5176_v57, %v8704_v61  ;;  %v5179_v31 = vadd.f32 %v5178_v0, %v5177_v33 }
0x1092   : > { %v4655_v50 = vadd.f32 %v4623_v53, %v8279_v49  ;;  %v4626_v63 = vadd.f32 %v5179_v31, %v8704_v61 }
0x1094   : > { %4671 = vst [vmem:[#allocation12 + $0x50] sm:$0xff] %v4655_v50  ;;  %v4656_v20 = vadd.f32 %v4626_v63, %v8281_v37  ;;  %v5180_v36 = vpop.f32.mrb[108].mxu1 }
0x1095   : > { %v5181_v19 = vpop.f32.mrb[109].mxu1 }
0x1096   : > { %4672 = vst [vmem:[#allocation12 + $0x58] sm:$0xff] %v4656_v20  ;;  %v5182_v51 = vadd.f32 %v5181_v19, %v5180_v36  ;;  %v5183_v2 = vpop.f32.mrb[110].mxu1 }
0x1097   : > { %v5184_v38 = vpop.f32.mrb[111].mxu1 }
0x1098   : > { %v4631_v34 = vadd.f32 %v5182_v51, %v8704_v61  ;;  %v5185_v29 = vadd.f32 %v5184_v38, %v5183_v2 }
0x109a   : > { %v4657_v62 = vadd.f32 %v4631_v34, %v8291_v16  ;;  %v4634_v40 = vadd.f32 %v5185_v29, %v8704_v61 }
0x109c   : > { %4673 = vst [vmem:[#allocation12 + $0x60] sm:$0xff] %v4657_v62  ;;  %v4658_v49 = vadd.f32 %v4634_v40, %v8293_v14  ;;  %v5186_v37 = vpop.f32.mrb[112].mxu1 }
0x109d   : > { %v5187_v1 = vpop.f32.mrb[113].mxu1 }
0x109e   : > { %4674 = vst [vmem:[#allocation12 + $0x68] sm:$0xff] %v4658_v49  ;;  %v5188_v8 = vadd.f32 %v5187_v1, %v5186_v37  ;;  %v5189_v47 = vpop.f32.mrb[114].mxu1 }
0x109f   : > { %v5190_v21 = vpop.f32.mrb[115].mxu1 }
0x10a0   : > { %v4639_v43 = vadd.f32 %v5188_v8, %v8704_v61  ;;  %v5191_v60 = vadd.f32 %v5190_v21, %v5189_v47 }
0x10a2   : > { %v4659_v16 = vadd.f32 %v4639_v43, %v8303_v55  ;;  %v4642_v3 = vadd.f32 %v5191_v60, %v8704_v61 }
0x10a4   : > { %4675 = vst [vmem:[#allocation12 + $0x70] sm:$0xff] %v4659_v16  ;;  %v4660_v22 = vadd.f32 %v4642_v3, %v8305_v45 }
0x10a6   : > { %4676 = vst [vmem:[#allocation12 + $0x78] sm:$0xff] %v4660_v22 }
0x10a7   : > { %6236 = shalt.err (!%p6233_p9)
}
0x10a8   : > { %s6237_s15 = scalar_lea.hbm %s8787_s7, 2048 }
0x10a9   : > { %p6238_p0 = scmp.ne.s32.totalorder %s8787_s7, %s6237_s15  ;;  %p6243_p13 = scmp.lt.u32.totalorder %s6237_s15, %s8787_s7 }
0x10ab   : > { %p6239_p7 = pnand %p6238_p0, %p5558_p12 }
0x10ad   : > { %p6240_p1 = pneg %p6239_p7 }
0x10af   : > { %p6245_p10 = pnand %p6243_p13, %p6240_p1 }
0x10b1   : > { %6248 = shalt.err (!%p6245_p10)
}
0x10b2   : > { %s6314_s12 = smov 128   ;;  %s6315_s17 = smov 8  }
0x10b3   : > { %5540 = dma.vmem_to_hbm [thread:$0]  (%p5558_p12), %s6602_s30, 2048, %s8787_s7, [#allocation6], %s6314_s12, %s6314_s12, %s6315_s17  }
0x10b4   : > { %6282 = dma.done.wait (%p5558_p12), [#allocation6], 2048  }
0x10b5   : > { %6284 = vsyncadd (%p5558_p12), [#allocation6], 4294965248 }
0x10b6 PF: > { %p24_p5 = scmp.ge.s32.totalorder %s6378_s29, 4   ;;  %s8843_s24 = smov %s6291_s25 }
0x10b7   : > { %s8844_s25 = smov %s6295_s26  ;;  %s8845_s26 = smov %s6388_s9 }
0x10b8   : > { %s8846_s27 = smov %s6378_s29  ;;  %26 = sbr.rel (!%p24_p5) target bundleno = 11 (0xb), region = 132 }
0x10bf   :  { %4699 = vsyncpa [#allocation5], 1 }
0x10c0   :  { %4701 = vsyncpa [#allocation5 + $0x1], 1 }
0x10c1   :  { %4702 = vsyncpa [#allocation8], 1 }
0x10c2   :  { %4704 = vsyncpa [#allocation8 + $0x1], 1 }
0x10c3   :  { %4705 = vsyncpa [#allocation11], 1 }
0x10c4   :  { %4707 = vsyncpa [#allocation11 + $0x1], 1 }
0x10c5   :  { %4708 = vsyncpa [#allocation6], 1 }
0x10c6   :  { %4710 = vsyncpa [#allocation6 + $0x1], 1 }
0x10c7   :  { %4711 = vsyncmov [#allocation3] }
0x10ca   :  { %s4712_s28 = vpop.sfrf %4711 }
0x10cb   :  { %p4979_p8 = scmp.ne.s32.totalorder %s4712_s28, 0 }
0x10cd   :  { %4716 = shalt.err (%p4979_p8)  }

</bundles_post_ra>
